<compile_context>
chip_gen: v7x
topology: tpu7x:2x2x1
jax: 0.10.0
libtpu: 0.0.40
codegen_flags: <defaults>
</compile_context>

<pallas_src>
import jax
import jax.numpy as jnp
from jax import lax
from jax.experimental import pallas as pl
from jax.experimental.pallas import tpu as pltpu

LANE = 128


def _round_up(x, m):
    return (x + m - 1) // m * m


# ---------------------------------------------------------------------------
# Fused Pallas kernel: conv3x3 + BN + 2x2 max-pool + ReLU + flatten + FC
# ---------------------------------------------------------------------------
def fused_cnn_kernel(xs_ref, wt_ref, shift_ref, wfc_ref, bfc_ref, o_ref, feat_ref):
    # xs_ref:    (4, Hp+1, Wp+1, Cin) f32  parity-split zero-padded image:
    #            row (py*2+px), [hh, ww, c] == x_pad[2*hh+py, 2*ww+px, c]
    # wt_ref:    (9, Cin, Cout) f32        3x3 conv taps with BN scale folded in
    # shift_ref: (1, Cout)      f32        BN shift (+conv bias), applied post-pool
    # wfc_ref:   (D, Kp)        bf16       FC weight, feature order (hp, wp, c)
    # bfc_ref:   (1, Kp)        f32        FC bias
    # o_ref:     (1, 8, Kp)     f32        logits (broadcast over 8 pad rows)
    # feat_ref:  (1, D)         f32        VMEM scratch: flattened pooled features
    Hp = xs_ref.shape[1] - 1
    Wp = xs_ref.shape[2] - 1
    Cin = xs_ref.shape[3]
    Cout = wt_ref.shape[2]
    P = Hp * Wp

    # --- conv3x3 (stride 1, pad 1): in-kernel im2col -> 9 accumulate-GEMMs.
    # Output rows are grouped as [parity(dy,dx)] x [hp*Wp + wp]; contraction is
    # only Cin (MXU underutilized, but the kernel is DMA/overhead bound anyway).
    acc = jnp.zeros((4 * P, Cout), jnp.float32)
    for ky in range(3):
        for kx in range(3):
            taps = []
            for dy in range(2):
                for dx in range(2):
                    a, b = dy + ky, dx + kx            # offsets into x_pad
                    t = xs_ref[(a % 2) * 2 + (b % 2),
                               a // 2:a // 2 + Hp,
                               b // 2:b // 2 + Wp, :]   # (Hp, Wp, Cin)
                    taps.append(t.reshape(P, Cin))
            tap_all = jnp.concatenate(taps, axis=0)     # (4P, Cin)
            acc = acc + jnp.dot(tap_all, wt_ref[ky * 3 + kx],
                                preferred_element_type=jnp.float32)

    # --- 2x2 max-pool == max over the four output-pixel parities (pure VPU);
    # the per-channel BN shift commutes with max; then ReLU.
    pooled = jnp.maximum(jnp.maximum(acc[0:P], acc[P:2 * P]),
                         jnp.maximum(acc[2 * P:3 * P], acc[3 * P:4 * P]))
    pooled = jnp.maximum(pooled + shift_ref[...], 0.0)              # (P, Cout)

    # --- flatten (P, Cout) -> (1, P*Cout) through the VMEM scratch (pure
    # layout change via static-offset stores; avoids a sublane->lane reshape).
    for p in range(P):
        feat_ref[:, p * Cout:(p + 1) * Cout] = pooled[p:p + 1, :]

    # --- FC: one GEMM against the VMEM-resident (D, Kp) weight, f32 accumulate.
    logits = jnp.dot(feat_ref[...].astype(jnp.bfloat16), wfc_ref[...],
                     preferred_element_type=jnp.float32) + bfc_ref[...]
    # (8, Kp) store keeps the output tile (8,128)-aligned; wrapper reads row 0.
    o_ref[0] = jnp.broadcast_to(logits, (8, logits.shape[1]))


# ---------------------------------------------------------------------------
# Wrapper: layout plumbing + pallas_call
# ---------------------------------------------------------------------------
def custom_cnn_forward(x_nchw, params, eps=1e-5):
    N, Cin, H, W = x_nchw.shape
    assert H % 2 == 0 and W % 2 == 0, "even spatial dims required (2x2 pool)"
    Cout = params["conv_w"].shape[0]
    num_classes = params["fc_b"].shape[0]
    Hp, Wp = H // 2, W // 2
    P = Hp * Wp
    D = P * Cout                                   # true FC reduction dim (no pad)
    K_pad = _round_up(num_classes, LANE)           # 10 -> 128: lane-dense logits

    # Fold conv bias + eval-mode BatchNorm into per-channel scale/shift; scale
    # goes into the conv weights, shift is applied after the max-pool.
    scale = params["bn_gamma"] / jnp.sqrt(params["bn_var"] + eps)
    shift = params["bn_beta"] + (params["conv_b"] - params["bn_mean"]) * scale

    # Input: NCHW -> padded NHWC -> 2x2 parity split (same bytes as the input,
    # no materialized im2col).  xs[n*4 + py*2 + px, hh, ww, c] = x_pad[n, 2hh+py, 2ww+px, c]
    x = jnp.transpose(x_nchw, (0, 2, 3, 1)).astype(jnp.float32)
    xp = jnp.pad(x, ((0, 0), (1, 1), (1, 1), (0, 0)))              # padding=1
    xs = xp.reshape(N, Hp + 1, 2, Wp + 1, 2, Cin)
    xs = jnp.transpose(xs, (0, 2, 4, 1, 3, 5)).reshape(N * 4, Hp + 1, Wp + 1, Cin)

    # Conv weights per tap, BN scale folded: (9, Cin, Cout) f32.
    w_taps = jnp.transpose(params["conv_w"], (2, 3, 1, 0)).reshape(9, Cin, Cout)
    w_taps = (w_taps * scale[None, None, :]).astype(jnp.float32)
    shift2d = shift.reshape(1, Cout).astype(jnp.float32)

    # FC weight permuted to the kernel's (hp, wp, c) feature order; D is NOT
    # channel-padded (4096, not 8192), only the class dim is padded to 128.
    w_fc = params["fc_w"].reshape(num_classes, Cout, Hp, Wp)
    w_fc = jnp.transpose(w_fc, (2, 3, 1, 0)).reshape(D, num_classes)
    w_fc = jnp.pad(w_fc, ((0, 0), (0, K_pad - num_classes))).astype(jnp.bfloat16)
    b_fc = jnp.pad(params["fc_b"], (0, K_pad - num_classes))
    b_fc = b_fc.reshape(1, K_pad).astype(jnp.float32)

    out = pl.pallas_call(
        fused_cnn_kernel,
        out_shape=jax.ShapeDtypeStruct((N, 8, K_pad), jnp.float32),
        grid_spec=pltpu.PrefetchScalarGridSpec(
            num_scalar_prefetch=0,
            grid=(N,),
            in_specs=[
                pl.BlockSpec((4, Hp + 1, Wp + 1, Cin), lambda b: (b, 0, 0, 0)),
                pl.BlockSpec((9, Cin, Cout), lambda b: (0, 0, 0)),
                pl.BlockSpec((1, Cout), lambda b: (0, 0)),
                pl.BlockSpec((D, K_pad), lambda b: (0, 0)),   # VMEM-resident FC weight
                pl.BlockSpec((1, K_pad), lambda b: (0, 0)),
            ],
            out_specs=pl.BlockSpec((1, 8, K_pad), lambda b: (b, 0, 0)),
            scratch_shapes=[pltpu.VMEM((1, D), jnp.float32)],
        ),
        compiler_params=pltpu.CompilerParams(
            dimension_semantics=("parallel",)),
    )(xs, w_taps, shift2d, w_fc, b_fc)

    return out[:, 0, :num_classes]


# ---------------------------------------------------------------------------
# Pure-JAX reference (PyTorch semantics, NCHW, f32)
# ---------------------------------------------------------------------------
def reference_forward(x_nchw, params, eps=1e-5):
    y = lax.conv_general_dilated(
        x_nchw, params["conv_w"], window_strides=(1, 1),
        padding=((1, 1), (1, 1)),
        dimension_numbers=("NCHW", "OIHW", "NCHW"))
    y = y + params["conv_b"][None, :, None, None]
    y = ((y - params["bn_mean"][None, :, None, None])
         / jnp.sqrt(params["bn_var"] + eps)[None, :, None, None]
         * params["bn_gamma"][None, :, None, None]
         + params["bn_beta"][None, :, None, None])
    y = lax.reduce_window(y, -jnp.inf, lax.max, (1, 1, 2, 2), (1, 1, 2, 2), "VALID")
    y = jnp.maximum(y, 0.0)
    y = y.reshape(y.shape[0], -1)
    return y @ params["fc_w"].T + params["fc_b"]


# ---------------------------------------------------------------------------
if __name__ == "__main__":
    # Small shapes consistent with the module structure.
    N, Cin, H, W = 2, 3, 16, 16
    Cout, num_classes = 64, 10
    Hp, Wp = H // 2, W // 2
    fc_in = Cout * Hp * Wp

    key = jax.random.PRNGKey(0)
    ks = jax.random.split(key, 9)

    # conv1: xavier_uniform weight, default-uniform bias (deterministic init).
    fan_in_c, fan_out_c = Cin * 9, Cout * 9
    b_c = (6.0 / (fan_in_c + fan_out_c)) ** 0.5
    conv_w = jax.random.uniform(ks[0], (Cout, Cin, 3, 3), jnp.float32, -b_c, b_c)
    conv_b = jax.random.uniform(ks[1], (Cout,), jnp.float32,
                                -1.0 / fan_in_c ** 0.5, 1.0 / fan_in_c ** 0.5)
    # BatchNorm2d(64) parameters / running stats (eval-mode semantics).
    bn_gamma = jax.random.uniform(ks[2], (Cout,), jnp.float32, 0.5, 1.5)
    bn_beta = jax.random.uniform(ks[3], (Cout,), jnp.float32, -0.1, 0.1)
    bn_mean = jax.random.uniform(ks[4], (Cout,), jnp.float32, -0.1, 0.1)
    bn_var = jax.random.uniform(ks[5], (Cout,), jnp.float32, 0.5, 1.5)
    # fc2: xavier_uniform weight, default-uniform bias.
    b_f = (6.0 / (fc_in + num_classes)) ** 0.5
    fc_w = jax.random.uniform(ks[6], (num_classes, fc_in), jnp.float32, -b_f, b_f)
    fc_b = jax.random.uniform(ks[7], (num_classes,), jnp.float32,
                              -1.0 / fc_in ** 0.5, 1.0 / fc_in ** 0.5)

    params = dict(conv_w=conv_w, conv_b=conv_b, bn_gamma=bn_gamma,
                  bn_beta=bn_beta, bn_mean=bn_mean, bn_var=bn_var,
                  fc_w=fc_w, fc_b=fc_b)

    x = jax.random.normal(ks[8], (N, Cin, H, W), jnp.float32)   # NCHW input

    out = jax.block_until_ready(custom_cnn_forward(x, params))
    ref = jax.block_until_ready(reference_forward(x, params))

    assert out.shape == (N, num_classes), out.shape
    assert jnp.allclose(out, ref, rtol=2e-2, atol=2e-2), (
        "mismatch vs reference", float(jnp.max(jnp.abs(out - ref))))
    print("KERNEL_OK")
</pallas_src>

<mosaic_0001>
module attributes {stable_mosaic.version = 11 : i64} {
  func.func @fused_cnn_kernel(%arg0: i32, %arg1: memref<4x9x9x3xf32, #tpu.memory_space<vmem>>, %arg2: memref<9x3x64xf32, #tpu.memory_space<vmem>>, %arg3: memref<1x64xf32, #tpu.memory_space<vmem>>, %arg4: memref<4096x128xbf16, #tpu.memory_space<vmem>>, %arg5: memref<1x128xf32, #tpu.memory_space<vmem>>, %arg6: memref<1x8x128xf32, #tpu.memory_space<vmem>>, %arg7: memref<1x4096xf32, #tpu.memory_space<vmem>>) attributes {dimension_semantics = [#tpu.dimension_semantics<parallel>], iteration_bounds = array<i64: 2>, scalar_prefetch = 0 : i64, scratch_operands = 1 : i64, tpu.core_type = #tpu.core_type<tc>, window_params = [{transform_indices = @transform_0, window_bounds = array<i64: 4, 9, 9, 3>}, {pipeline_mode = #tpu.pipeline_mode<synchronous>, transform_indices = @transform_1, window_bounds = array<i64: 9, 3, 64>}, {pipeline_mode = #tpu.pipeline_mode<synchronous>, transform_indices = @transform_2, window_bounds = array<i64: 1, 64>}, {pipeline_mode = #tpu.pipeline_mode<synchronous>, transform_indices = @transform_3, window_bounds = array<i64: 4096, 128>}, {pipeline_mode = #tpu.pipeline_mode<synchronous>, transform_indices = @transform_4, window_bounds = array<i64: 1, 128>}, {transform_indices = @transform_5, window_bounds = array<i64: 1, 8, 128>}]} {
    %cst = arith.constant 0.000000e+00 : f32
    %0 = vector.broadcast %cst : f32 to vector<256x64xf32>
    %c0 = arith.constant 0 : index
    %c0_0 = arith.constant 0 : index
    %c0_1 = arith.constant 0 : index
    %c0_2 = arith.constant 0 : index
    %1 = vector.load %arg1[%c0, %c0_0, %c0_1, %c0_2] : memref<4x9x9x3xf32, #tpu.memory_space<vmem>>, vector<1x8x8x3xf32>
    %2 = vector.shape_cast %1 : vector<1x8x8x3xf32> to vector<8x8x3xf32>
    %3 = vector.shape_cast %2 : vector<8x8x3xf32> to vector<64x3xf32>
    %c1 = arith.constant 1 : index
    %c0_3 = arith.constant 0 : index
    %c0_4 = arith.constant 0 : index
    %c0_5 = arith.constant 0 : index
    %4 = vector.load %arg1[%c1, %c0_3, %c0_4, %c0_5] : memref<4x9x9x3xf32, #tpu.memory_space<vmem>>, vector<1x8x8x3xf32>
    %5 = vector.shape_cast %4 : vector<1x8x8x3xf32> to vector<8x8x3xf32>
    %6 = vector.shape_cast %5 : vector<8x8x3xf32> to vector<64x3xf32>
    %c2 = arith.constant 2 : index
    %c0_6 = arith.constant 0 : index
    %c0_7 = arith.constant 0 : index
    %c0_8 = arith.constant 0 : index
    %7 = vector.load %arg1[%c2, %c0_6, %c0_7, %c0_8] : memref<4x9x9x3xf32, #tpu.memory_space<vmem>>, vector<1x8x8x3xf32>
    %8 = vector.shape_cast %7 : vector<1x8x8x3xf32> to vector<8x8x3xf32>
    %9 = vector.shape_cast %8 : vector<8x8x3xf32> to vector<64x3xf32>
    %c3 = arith.constant 3 : index
    %c0_9 = arith.constant 0 : index
    %c0_10 = arith.constant 0 : index
    %c0_11 = arith.constant 0 : index
    %10 = vector.load %arg1[%c3, %c0_9, %c0_10, %c0_11] : memref<4x9x9x3xf32, #tpu.memory_space<vmem>>, vector<1x8x8x3xf32>
    %11 = vector.shape_cast %10 : vector<1x8x8x3xf32> to vector<8x8x3xf32>
    %12 = vector.shape_cast %11 : vector<8x8x3xf32> to vector<64x3xf32>
    %13 = tpu.concatenate %3, %6, %9, %12 in 0 : vector<64x3xf32>, vector<64x3xf32>, vector<64x3xf32>, vector<64x3xf32> -> vector<256x3xf32>
    %c0_12 = arith.constant 0 : index
    %c0_13 = arith.constant 0 : index
    %c0_14 = arith.constant 0 : index
    %14 = vector.load %arg2[%c0_12, %c0_13, %c0_14] : memref<9x3x64xf32, #tpu.memory_space<vmem>>, vector<1x3x64xf32>
    %15 = vector.shape_cast %14 : vector<1x3x64xf32> to vector<3x64xf32>
    %cst_15 = arith.constant dense<0.000000e+00> : vector<256x64xf32>
    %16 = tpu.matmul %13, %15, %cst_15 {dimension_numbers = #tpu.dot_dimension_numbers<[1], [0], [0], [1], [0, 0, 1, 1], [], []>} : vector<256x3xf32>, vector<3x64xf32>, vector<256x64xf32> -> vector<256x64xf32>
    %17 = arith.addf %0, %16 : vector<256x64xf32>
    %c1_16 = arith.constant 1 : index
    %c0_17 = arith.constant 0 : index
    %c0_18 = arith.constant 0 : index
    %c0_19 = arith.constant 0 : index
    %18 = vector.load %arg1[%c1_16, %c0_17, %c0_18, %c0_19] : memref<4x9x9x3xf32, #tpu.memory_space<vmem>>, vector<1x8x8x3xf32>
    %19 = vector.shape_cast %18 : vector<1x8x8x3xf32> to vector<8x8x3xf32>
    %20 = vector.shape_cast %19 : vector<8x8x3xf32> to vector<64x3xf32>
    %c0_20 = arith.constant 0 : index
    %c0_21 = arith.constant 0 : index
    %c1_22 = arith.constant 1 : index
    %c0_23 = arith.constant 0 : index
    %21 = vector.load %arg1[%c0_20, %c0_21, %c1_22, %c0_23] : memref<4x9x9x3xf32, #tpu.memory_space<vmem>>, vector<1x8x8x3xf32>
    %22 = vector.shape_cast %21 : vector<1x8x8x3xf32> to vector<8x8x3xf32>
    %23 = vector.shape_cast %22 : vector<8x8x3xf32> to vector<64x3xf32>
    %c3_24 = arith.constant 3 : index
    %c0_25 = arith.constant 0 : index
    %c0_26 = arith.constant 0 : index
    %c0_27 = arith.constant 0 : index
    %24 = vector.load %arg1[%c3_24, %c0_25, %c0_26, %c0_27] : memref<4x9x9x3xf32, #tpu.memory_space<vmem>>, vector<1x8x8x3xf32>
    %25 = vector.shape_cast %24 : vector<1x8x8x3xf32> to vector<8x8x3xf32>
    %26 = vector.shape_cast %25 : vector<8x8x3xf32> to vector<64x3xf32>
    %c2_28 = arith.constant 2 : index
    %c0_29 = arith.constant 0 : index
    %c1_30 = arith.constant 1 : index
    %c0_31 = arith.constant 0 : index
    %27 = vector.load %arg1[%c2_28, %c0_29, %c1_30, %c0_31] : memref<4x9x9x3xf32, #tpu.memory_space<vmem>>, vector<1x8x8x3xf32>
    %28 = vector.shape_cast %27 : vector<1x8x8x3xf32> to vector<8x8x3xf32>
    %29 = vector.shape_cast %28 : vector<8x8x3xf32> to vector<64x3xf32>
    %30 = tpu.concatenate %20, %23, %26, %29 in 0 : vector<64x3xf32>, vector<64x3xf32>, vector<64x3xf32>, vector<64x3xf32> -> vector<256x3xf32>
    %c1_32 = arith.constant 1 : index
    %c0_33 = arith.constant 0 : index
    %c0_34 = arith.constant 0 : index
    %31 = vector.load %arg2[%c1_32, %c0_33, %c0_34] : memref<9x3x64xf32, #tpu.memory_space<vmem>>, vector<1x3x64xf32>
    %32 = vector.shape_cast %31 : vector<1x3x64xf32> to vector<3x64xf32>
    %cst_35 = arith.constant dense<0.000000e+00> : vector<256x64xf32>
    %33 = tpu.matmul %30, %32, %cst_35 {dimension_numbers = #tpu.dot_dimension_numbers<[1], [0], [0], [1], [0, 0, 1, 1], [], []>} : vector<256x3xf32>, vector<3x64xf32>, vector<256x64xf32> -> vector<256x64xf32>
    %34 = arith.addf %17, %33 : vector<256x64xf32>
    %c0_36 = arith.constant 0 : index
    %c0_37 = arith.constant 0 : index
    %c1_38 = arith.constant 1 : index
    %c0_39 = arith.constant 0 : index
    %35 = vector.load %arg1[%c0_36, %c0_37, %c1_38, %c0_39] : memref<4x9x9x3xf32, #tpu.memory_space<vmem>>, vector<1x8x8x3xf32>
    %36 = vector.shape_cast %35 : vector<1x8x8x3xf32> to vector<8x8x3xf32>
    %37 = vector.shape_cast %36 : vector<8x8x3xf32> to vector<64x3xf32>
    %c1_40 = arith.constant 1 : index
    %c0_41 = arith.constant 0 : index
    %c1_42 = arith.constant 1 : index
    %c0_43 = arith.constant 0 : index
    %38 = vector.load %arg1[%c1_40, %c0_41, %c1_42, %c0_43] : memref<4x9x9x3xf32, #tpu.memory_space<vmem>>, vector<1x8x8x3xf32>
    %39 = vector.shape_cast %38 : vector<1x8x8x3xf32> to vector<8x8x3xf32>
    %40 = vector.shape_cast %39 : vector<8x8x3xf32> to vector<64x3xf32>
    %c2_44 = arith.constant 2 : index
    %c0_45 = arith.constant 0 : index
    %c1_46 = arith.constant 1 : index
    %c0_47 = arith.constant 0 : index
    %41 = vector.load %arg1[%c2_44, %c0_45, %c1_46, %c0_47] : memref<4x9x9x3xf32, #tpu.memory_space<vmem>>, vector<1x8x8x3xf32>
    %42 = vector.shape_cast %41 : vector<1x8x8x3xf32> to vector<8x8x3xf32>
    %43 = vector.shape_cast %42 : vector<8x8x3xf32> to vector<64x3xf32>
    %c3_48 = arith.constant 3 : index
    %c0_49 = arith.constant 0 : index
    %c1_50 = arith.constant 1 : index
    %c0_51 = arith.constant 0 : index
    %44 = vector.load %arg1[%c3_48, %c0_49, %c1_50, %c0_51] : memref<4x9x9x3xf32, #tpu.memory_space<vmem>>, vector<1x8x8x3xf32>
    %45 = vector.shape_cast %44 : vector<1x8x8x3xf32> to vector<8x8x3xf32>
    %46 = vector.shape_cast %45 : vector<8x8x3xf32> to vector<64x3xf32>
    %47 = tpu.concatenate %37, %40, %43, %46 in 0 : vector<64x3xf32>, vector<64x3xf32>, vector<64x3xf32>, vector<64x3xf32> -> vector<256x3xf32>
    %c2_52 = arith.constant 2 : index
    %c0_53 = arith.constant 0 : index
    %c0_54 = arith.constant 0 : index
    %48 = vector.load %arg2[%c2_52, %c0_53, %c0_54] : memref<9x3x64xf32, #tpu.memory_space<vmem>>, vector<1x3x64xf32>
    %49 = vector.shape_cast %48 : vector<1x3x64xf32> to vector<3x64xf32>
    %cst_55 = arith.constant dense<0.000000e+00> : vector<256x64xf32>
    %50 = tpu.matmul %47, %49, %cst_55 {dimension_numbers = #tpu.dot_dimension_numbers<[1], [0], [0], [1], [0, 0, 1, 1], [], []>} : vector<256x3xf32>, vector<3x64xf32>, vector<256x64xf32> -> vector<256x64xf32>
    %51 = arith.addf %34, %50 : vector<256x64xf32>
    %c2_56 = arith.constant 2 : index
    %c0_57 = arith.constant 0 : index
    %c0_58 = arith.constant 0 : index
    %c0_59 = arith.constant 0 : index
    %52 = vector.load %arg1[%c2_56, %c0_57, %c0_58, %c0_59] : memref<4x9x9x3xf32, #tpu.memory_space<vmem>>, vector<1x8x8x3xf32>
    %53 = vector.shape_cast %52 : vector<1x8x8x3xf32> to vector<8x8x3xf32>
    %54 = vector.shape_cast %53 : vector<8x8x3xf32> to vector<64x3xf32>
    %c3_60 = arith.constant 3 : index
    %c0_61 = arith.constant 0 : index
    %c0_62 = arith.constant 0 : index
    %c0_63 = arith.constant 0 : index
    %55 = vector.load %arg1[%c3_60, %c0_61, %c0_62, %c0_63] : memref<4x9x9x3xf32, #tpu.memory_space<vmem>>, vector<1x8x8x3xf32>
    %56 = vector.shape_cast %55 : vector<1x8x8x3xf32> to vector<8x8x3xf32>
    %57 = vector.shape_cast %56 : vector<8x8x3xf32> to vector<64x3xf32>
    %c0_64 = arith.constant 0 : index
    %c1_65 = arith.constant 1 : index
    %c0_66 = arith.constant 0 : index
    %c0_67 = arith.constant 0 : index
    %58 = vector.load %arg1[%c0_64, %c1_65, %c0_66, %c0_67] : memref<4x9x9x3xf32, #tpu.memory_space<vmem>>, vector<1x8x8x3xf32>
    %59 = vector.shape_cast %58 : vector<1x8x8x3xf32> to vector<8x8x3xf32>
    %60 = vector.shape_cast %59 : vector<8x8x3xf32> to vector<64x3xf32>
    %c1_68 = arith.constant 1 : index
    %c1_69 = arith.constant 1 : index
    %c0_70 = arith.constant 0 : index
    %c0_71 = arith.constant 0 : index
    %61 = vector.load %arg1[%c1_68, %c1_69, %c0_70, %c0_71] : memref<4x9x9x3xf32, #tpu.memory_space<vmem>>, vector<1x8x8x3xf32>
    %62 = vector.shape_cast %61 : vector<1x8x8x3xf32> to vector<8x8x3xf32>
    %63 = vector.shape_cast %62 : vector<8x8x3xf32> to vector<64x3xf32>
    %64 = tpu.concatenate %54, %57, %60, %63 in 0 : vector<64x3xf32>, vector<64x3xf32>, vector<64x3xf32>, vector<64x3xf32> -> vector<256x3xf32>
    %c3_72 = arith.constant 3 : index
    %c0_73 = arith.constant 0 : index
    %c0_74 = arith.constant 0 : index
    %65 = vector.load %arg2[%c3_72, %c0_73, %c0_74] : memref<9x3x64xf32, #tpu.memory_space<vmem>>, vector<1x3x64xf32>
    %66 = vector.shape_cast %65 : vector<1x3x64xf32> to vector<3x64xf32>
    %cst_75 = arith.constant dense<0.000000e+00> : vector<256x64xf32>
    %67 = tpu.matmul %64, %66, %cst_75 {dimension_numbers = #tpu.dot_dimension_numbers<[1], [0], [0], [1], [0, 0, 1, 1], [], []>} : vector<256x3xf32>, vector<3x64xf32>, vector<256x64xf32> -> vector<256x64xf32>
    %68 = arith.addf %51, %67 : vector<256x64xf32>
    %c3_76 = arith.constant 3 : index
    %c0_77 = arith.constant 0 : index
    %c0_78 = arith.constant 0 : index
    %c0_79 = arith.constant 0 : index
    %69 = vector.load %arg1[%c3_76, %c0_77, %c0_78, %c0_79] : memref<4x9x9x3xf32, #tpu.memory_space<vmem>>, vector<1x8x8x3xf32>
    %70 = vector.shape_cast %69 : vector<1x8x8x3xf32> to vector<8x8x3xf32>
    %71 = vector.shape_cast %70 : vector<8x8x3xf32> to vector<64x3xf32>
    %c2_80 = arith.constant 2 : index
    %c0_81 = arith.constant 0 : index
    %c1_82 = arith.constant 1 : index
    %c0_83 = arith.constant 0 : index
    %72 = vector.load %arg1[%c2_80, %c0_81, %c1_82, %c0_83] : memref<4x9x9x3xf32, #tpu.memory_space<vmem>>, vector<1x8x8x3xf32>
    %73 = vector.shape_cast %72 : vector<1x8x8x3xf32> to vector<8x8x3xf32>
    %74 = vector.shape_cast %73 : vector<8x8x3xf32> to vector<64x3xf32>
    %c1_84 = arith.constant 1 : index
    %c1_85 = arith.constant 1 : index
    %c0_86 = arith.constant 0 : index
    %c0_87 = arith.constant 0 : index
    %75 = vector.load %arg1[%c1_84, %c1_85, %c0_86, %c0_87] : memref<4x9x9x3xf32, #tpu.memory_space<vmem>>, vector<1x8x8x3xf32>
    %76 = vector.shape_cast %75 : vector<1x8x8x3xf32> to vector<8x8x3xf32>
    %77 = vector.shape_cast %76 : vector<8x8x3xf32> to vector<64x3xf32>
    %c0_88 = arith.constant 0 : index
    %c1_89 = arith.constant 1 : index
    %c1_90 = arith.constant 1 : index
    %c0_91 = arith.constant 0 : index
    %78 = vector.load %arg1[%c0_88, %c1_89, %c1_90, %c0_91] : memref<4x9x9x3xf32, #tpu.memory_space<vmem>>, vector<1x8x8x3xf32>
    %79 = vector.shape_cast %78 : vector<1x8x8x3xf32> to vector<8x8x3xf32>
    %80 = vector.shape_cast %79 : vector<8x8x3xf32> to vector<64x3xf32>
    %81 = tpu.concatenate %71, %74, %77, %80 in 0 : vector<64x3xf32>, vector<64x3xf32>, vector<64x3xf32>, vector<64x3xf32> -> vector<256x3xf32>
    %c4 = arith.constant 4 : index
    %c0_92 = arith.constant 0 : index
    %c0_93 = arith.constant 0 : index
    %82 = vector.load %arg2[%c4, %c0_92, %c0_93] : memref<9x3x64xf32, #tpu.memory_space<vmem>>, vector<1x3x64xf32>
    %83 = vector.shape_cast %82 : vector<1x3x64xf32> to vector<3x64xf32>
    %cst_94 = arith.constant dense<0.000000e+00> : vector<256x64xf32>
    %84 = tpu.matmul %81, %83, %cst_94 {dimension_numbers = #tpu.dot_dimension_numbers<[1], [0], [0], [1], [0, 0, 1, 1], [], []>} : vector<256x3xf32>, vector<3x64xf32>, vector<256x64xf32> -> vector<256x64xf32>
    %85 = arith.addf %68, %84 : vector<256x64xf32>
    %c2_95 = arith.constant 2 : index
    %c0_96 = arith.constant 0 : index
    %c1_97 = arith.constant 1 : index
    %c0_98 = arith.constant 0 : index
    %86 = vector.load %arg1[%c2_95, %c0_96, %c1_97, %c0_98] : memref<4x9x9x3xf32, #tpu.memory_space<vmem>>, vector<1x8x8x3xf32>
    %87 = vector.shape_cast %86 : vector<1x8x8x3xf32> to vector<8x8x3xf32>
    %88 = vector.shape_cast %87 : vector<8x8x3xf32> to vector<64x3xf32>
    %c3_99 = arith.constant 3 : index
    %c0_100 = arith.constant 0 : index
    %c1_101 = arith.constant 1 : index
    %c0_102 = arith.constant 0 : index
    %89 = vector.load %arg1[%c3_99, %c0_100, %c1_101, %c0_102] : memref<4x9x9x3xf32, #tpu.memory_space<vmem>>, vector<1x8x8x3xf32>
    %90 = vector.shape_cast %89 : vector<1x8x8x3xf32> to vector<8x8x3xf32>
    %91 = vector.shape_cast %90 : vector<8x8x3xf32> to vector<64x3xf32>
    %c0_103 = arith.constant 0 : index
    %c1_104 = arith.constant 1 : index
    %c1_105 = arith.constant 1 : index
    %c0_106 = arith.constant 0 : index
    %92 = vector.load %arg1[%c0_103, %c1_104, %c1_105, %c0_106] : memref<4x9x9x3xf32, #tpu.memory_space<vmem>>, vector<1x8x8x3xf32>
    %93 = vector.shape_cast %92 : vector<1x8x8x3xf32> to vector<8x8x3xf32>
    %94 = vector.shape_cast %93 : vector<8x8x3xf32> to vector<64x3xf32>
    %c1_107 = arith.constant 1 : index
    %c1_108 = arith.constant 1 : index
    %c1_109 = arith.constant 1 : index
    %c0_110 = arith.constant 0 : index
    %95 = vector.load %arg1[%c1_107, %c1_108, %c1_109, %c0_110] : memref<4x9x9x3xf32, #tpu.memory_space<vmem>>, vector<1x8x8x3xf32>
    %96 = vector.shape_cast %95 : vector<1x8x8x3xf32> to vector<8x8x3xf32>
    %97 = vector.shape_cast %96 : vector<8x8x3xf32> to vector<64x3xf32>
    %98 = tpu.concatenate %88, %91, %94, %97 in 0 : vector<64x3xf32>, vector<64x3xf32>, vector<64x3xf32>, vector<64x3xf32> -> vector<256x3xf32>
    %c5 = arith.constant 5 : index
    %c0_111 = arith.constant 0 : index
    %c0_112 = arith.constant 0 : index
    %99 = vector.load %arg2[%c5, %c0_111, %c0_112] : memref<9x3x64xf32, #tpu.memory_space<vmem>>, vector<1x3x64xf32>
    %100 = vector.shape_cast %99 : vector<1x3x64xf32> to vector<3x64xf32>
    %cst_113 = arith.constant dense<0.000000e+00> : vector<256x64xf32>
    %101 = tpu.matmul %98, %100, %cst_113 {dimension_numbers = #tpu.dot_dimension_numbers<[1], [0], [0], [1], [0, 0, 1, 1], [], []>} : vector<256x3xf32>, vector<3x64xf32>, vector<256x64xf32> -> vector<256x64xf32>
    %102 = arith.addf %85, %101 : vector<256x64xf32>
    %c0_114 = arith.constant 0 : index
    %c1_115 = arith.constant 1 : index
    %c0_116 = arith.constant 0 : index
    %c0_117 = arith.constant 0 : index
    %103 = vector.load %arg1[%c0_114, %c1_115, %c0_116, %c0_117] : memref<4x9x9x3xf32, #tpu.memory_space<vmem>>, vector<1x8x8x3xf32>
    %104 = vector.shape_cast %103 : vector<1x8x8x3xf32> to vector<8x8x3xf32>
    %105 = vector.shape_cast %104 : vector<8x8x3xf32> to vector<64x3xf32>
    %c1_118 = arith.constant 1 : index
    %c1_119 = arith.constant 1 : index
    %c0_120 = arith.constant 0 : index
    %c0_121 = arith.constant 0 : index
    %106 = vector.load %arg1[%c1_118, %c1_119, %c0_120, %c0_121] : memref<4x9x9x3xf32, #tpu.memory_space<vmem>>, vector<1x8x8x3xf32>
    %107 = vector.shape_cast %106 : vector<1x8x8x3xf32> to vector<8x8x3xf32>
    %108 = vector.shape_cast %107 : vector<8x8x3xf32> to vector<64x3xf32>
    %c2_122 = arith.constant 2 : index
    %c1_123 = arith.constant 1 : index
    %c0_124 = arith.constant 0 : index
    %c0_125 = arith.constant 0 : index
    %109 = vector.load %arg1[%c2_122, %c1_123, %c0_124, %c0_125] : memref<4x9x9x3xf32, #tpu.memory_space<vmem>>, vector<1x8x8x3xf32>
    %110 = vector.shape_cast %109 : vector<1x8x8x3xf32> to vector<8x8x3xf32>
    %111 = vector.shape_cast %110 : vector<8x8x3xf32> to vector<64x3xf32>
    %c3_126 = arith.constant 3 : index
    %c1_127 = arith.constant 1 : index
    %c0_128 = arith.constant 0 : index
    %c0_129 = arith.constant 0 : index
    %112 = vector.load %arg1[%c3_126, %c1_127, %c0_128, %c0_129] : memref<4x9x9x3xf32, #tpu.memory_space<vmem>>, vector<1x8x8x3xf32>
    %113 = vector.shape_cast %112 : vector<1x8x8x3xf32> to vector<8x8x3xf32>
    %114 = vector.shape_cast %113 : vector<8x8x3xf32> to vector<64x3xf32>
    %115 = tpu.concatenate %105, %108, %111, %114 in 0 : vector<64x3xf32>, vector<64x3xf32>, vector<64x3xf32>, vector<64x3xf32> -> vector<256x3xf32>
    %c6 = arith.constant 6 : index
    %c0_130 = arith.constant 0 : index
    %c0_131 = arith.constant 0 : index
    %116 = vector.load %arg2[%c6, %c0_130, %c0_131] : memref<9x3x64xf32, #tpu.memory_space<vmem>>, vector<1x3x64xf32>
    %117 = vector.shape_cast %116 : vector<1x3x64xf32> to vector<3x64xf32>
    %cst_132 = arith.constant dense<0.000000e+00> : vector<256x64xf32>
    %118 = tpu.matmul %115, %117, %cst_132 {dimension_numbers = #tpu.dot_dimension_numbers<[1], [0], [0], [1], [0, 0, 1, 1], [], []>} : vector<256x3xf32>, vector<3x64xf32>, vector<256x64xf32> -> vector<256x64xf32>
    %119 = arith.addf %102, %118 : vector<256x64xf32>
    %c1_133 = arith.constant 1 : index
    %c1_134 = arith.constant 1 : index
    %c0_135 = arith.constant 0 : index
    %c0_136 = arith.constant 0 : index
    %120 = vector.load %arg1[%c1_133, %c1_134, %c0_135, %c0_136] : memref<4x9x9x3xf32, #tpu.memory_space<vmem>>, vector<1x8x8x3xf32>
    %121 = vector.shape_cast %120 : vector<1x8x8x3xf32> to vector<8x8x3xf32>
    %122 = vector.shape_cast %121 : vector<8x8x3xf32> to vector<64x3xf32>
    %c0_137 = arith.constant 0 : index
    %c1_138 = arith.constant 1 : index
    %c1_139 = arith.constant 1 : index
    %c0_140 = arith.constant 0 : index
    %123 = vector.load %arg1[%c0_137, %c1_138, %c1_139, %c0_140] : memref<4x9x9x3xf32, #tpu.memory_space<vmem>>, vector<1x8x8x3xf32>
    %124 = vector.shape_cast %123 : vector<1x8x8x3xf32> to vector<8x8x3xf32>
    %125 = vector.shape_cast %124 : vector<8x8x3xf32> to vector<64x3xf32>
    %c3_141 = arith.constant 3 : index
    %c1_142 = arith.constant 1 : index
    %c0_143 = arith.constant 0 : index
    %c0_144 = arith.constant 0 : index
    %126 = vector.load %arg1[%c3_141, %c1_142, %c0_143, %c0_144] : memref<4x9x9x3xf32, #tpu.memory_space<vmem>>, vector<1x8x8x3xf32>
    %127 = vector.shape_cast %126 : vector<1x8x8x3xf32> to vector<8x8x3xf32>
    %128 = vector.shape_cast %127 : vector<8x8x3xf32> to vector<64x3xf32>
    %c2_145 = arith.constant 2 : index
    %c1_146 = arith.constant 1 : index
    %c1_147 = arith.constant 1 : index
    %c0_148 = arith.constant 0 : index
    %129 = vector.load %arg1[%c2_145, %c1_146, %c1_147, %c0_148] : memref<4x9x9x3xf32, #tpu.memory_space<vmem>>, vector<1x8x8x3xf32>
    %130 = vector.shape_cast %129 : vector<1x8x8x3xf32> to vector<8x8x3xf32>
    %131 = vector.shape_cast %130 : vector<8x8x3xf32> to vector<64x3xf32>
    %132 = tpu.concatenate %122, %125, %128, %131 in 0 : vector<64x3xf32>, vector<64x3xf32>, vector<64x3xf32>, vector<64x3xf32> -> vector<256x3xf32>
    %c7 = arith.constant 7 : index
    %c0_149 = arith.constant 0 : index
    %c0_150 = arith.constant 0 : index
    %133 = vector.load %arg2[%c7, %c0_149, %c0_150] : memref<9x3x64xf32, #tpu.memory_space<vmem>>, vector<1x3x64xf32>
    %134 = vector.shape_cast %133 : vector<1x3x64xf32> to vector<3x64xf32>
    %cst_151 = arith.constant dense<0.000000e+00> : vector<256x64xf32>
    %135 = tpu.matmul %132, %134, %cst_151 {dimension_numbers = #tpu.dot_dimension_numbers<[1], [0], [0], [1], [0, 0, 1, 1], [], []>} : vector<256x3xf32>, vector<3x64xf32>, vector<256x64xf32> -> vector<256x64xf32>
    %136 = arith.addf %119, %135 : vector<256x64xf32>
    %c0_152 = arith.constant 0 : index
    %c1_153 = arith.constant 1 : index
    %c1_154 = arith.constant 1 : index
    %c0_155 = arith.constant 0 : index
    %137 = vector.load %arg1[%c0_152, %c1_153, %c1_154, %c0_155] : memref<4x9x9x3xf32, #tpu.memory_space<vmem>>, vector<1x8x8x3xf32>
    %138 = vector.shape_cast %137 : vector<1x8x8x3xf32> to vector<8x8x3xf32>
    %139 = vector.shape_cast %138 : vector<8x8x3xf32> to vector<64x3xf32>
    %c1_156 = arith.constant 1 : index
    %c1_157 = arith.constant 1 : index
    %c1_158 = arith.constant 1 : index
    %c0_159 = arith.constant 0 : index
    %140 = vector.load %arg1[%c1_156, %c1_157, %c1_158, %c0_159] : memref<4x9x9x3xf32, #tpu.memory_space<vmem>>, vector<1x8x8x3xf32>
    %141 = vector.shape_cast %140 : vector<1x8x8x3xf32> to vector<8x8x3xf32>
    %142 = vector.shape_cast %141 : vector<8x8x3xf32> to vector<64x3xf32>
    %c2_160 = arith.constant 2 : index
    %c1_161 = arith.constant 1 : index
    %c1_162 = arith.constant 1 : index
    %c0_163 = arith.constant 0 : index
    %143 = vector.load %arg1[%c2_160, %c1_161, %c1_162, %c0_163] : memref<4x9x9x3xf32, #tpu.memory_space<vmem>>, vector<1x8x8x3xf32>
    %144 = vector.shape_cast %143 : vector<1x8x8x3xf32> to vector<8x8x3xf32>
    %145 = vector.shape_cast %144 : vector<8x8x3xf32> to vector<64x3xf32>
    %c3_164 = arith.constant 3 : index
    %c1_165 = arith.constant 1 : index
    %c1_166 = arith.constant 1 : index
    %c0_167 = arith.constant 0 : index
    %146 = vector.load %arg1[%c3_164, %c1_165, %c1_166, %c0_167] : memref<4x9x9x3xf32, #tpu.memory_space<vmem>>, vector<1x8x8x3xf32>
    %147 = vector.shape_cast %146 : vector<1x8x8x3xf32> to vector<8x8x3xf32>
    %148 = vector.shape_cast %147 : vector<8x8x3xf32> to vector<64x3xf32>
    %149 = tpu.concatenate %139, %142, %145, %148 in 0 : vector<64x3xf32>, vector<64x3xf32>, vector<64x3xf32>, vector<64x3xf32> -> vector<256x3xf32>
    %c8 = arith.constant 8 : index
    %c0_168 = arith.constant 0 : index
    %c0_169 = arith.constant 0 : index
    %150 = vector.load %arg2[%c8, %c0_168, %c0_169] : memref<9x3x64xf32, #tpu.memory_space<vmem>>, vector<1x3x64xf32>
    %151 = vector.shape_cast %150 : vector<1x3x64xf32> to vector<3x64xf32>
    %cst_170 = arith.constant dense<0.000000e+00> : vector<256x64xf32>
    %152 = tpu.matmul %149, %151, %cst_170 {dimension_numbers = #tpu.dot_dimension_numbers<[1], [0], [0], [1], [0, 0, 1, 1], [], []>} : vector<256x3xf32>, vector<3x64xf32>, vector<256x64xf32> -> vector<256x64xf32>
    %153 = arith.addf %136, %152 : vector<256x64xf32>
    %154 = vector.extract_strided_slice %153 {offsets = [0, 0], sizes = [64, 64], strides = [1, 1]} : vector<256x64xf32> to vector<64x64xf32>
    %155 = vector.extract_strided_slice %153 {offsets = [64, 0], sizes = [64, 64], strides = [1, 1]} : vector<256x64xf32> to vector<64x64xf32>
    %156 = arith.maximumf %154, %155 : vector<64x64xf32>
    %157 = vector.extract_strided_slice %153 {offsets = [128, 0], sizes = [64, 64], strides = [1, 1]} : vector<256x64xf32> to vector<64x64xf32>
    %158 = vector.extract_strided_slice %153 {offsets = [192, 0], sizes = [64, 64], strides = [1, 1]} : vector<256x64xf32> to vector<64x64xf32>
    %159 = arith.maximumf %157, %158 : vector<64x64xf32>
    %160 = arith.maximumf %156, %159 : vector<64x64xf32>
    %c0_171 = arith.constant 0 : index
    %c0_172 = arith.constant 0 : index
    %161 = vector.load %arg3[%c0_171, %c0_172] : memref<1x64xf32, #tpu.memory_space<vmem>>, vector<1x64xf32>
    %162 = vector.broadcast %161 : vector<1x64xf32> to vector<64x64xf32>
    %163 = arith.addf %160, %162 : vector<64x64xf32>
    %cst_173 = arith.constant 0.000000e+00 : f32
    %164 = vector.broadcast %cst_173 : f32 to vector<64x64xf32>
    %165 = arith.maximumf %163, %164 : vector<64x64xf32>
    %166 = vector.extract_strided_slice %165 {offsets = [0, 0], sizes = [1, 64], strides = [1, 1]} : vector<64x64xf32> to vector<1x64xf32>
    %c0_174 = arith.constant 0 : index
    %c0_175 = arith.constant 0 : index
    %167 = vector.load %arg7[%c0_174, %c0_175] : memref<1x4096xf32, #tpu.memory_space<vmem>>, vector<1x64xf32>
    tpu.vector_store %arg7[%c0_174, %c0_175], %166 {strides = array<i32>} : memref<1x4096xf32, #tpu.memory_space<vmem>>, vector<1x64xf32>,
    %168 = vector.extract_strided_slice %165 {offsets = [1, 0], sizes = [1, 64], strides = [1, 1]} : vector<64x64xf32> to vector<1x64xf32>
    %c0_176 = arith.constant 0 : index
    %c64 = arith.constant 64 : index
    %169 = vector.load %arg7[%c0_176, %c64] : memref<1x4096xf32, #tpu.memory_space<vmem>>, vector<1x64xf32>
    tpu.vector_store %arg7[%c0_176, %c64], %168 {strides = array<i32>} : memref<1x4096xf32, #tpu.memory_space<vmem>>, vector<1x64xf32>,
    %170 = vector.extract_strided_slice %165 {offsets = [2, 0], sizes = [1, 64], strides = [1, 1]} : vector<64x64xf32> to vector<1x64xf32>
    %c0_177 = arith.constant 0 : index
    %c128 = arith.constant 128 : index
    %171 = vector.load %arg7[%c0_177, %c128] : memref<1x4096xf32, #tpu.memory_space<vmem>>, vector<1x64xf32>
    tpu.vector_store %arg7[%c0_177, %c128], %170 {strides = array<i32>} : memref<1x4096xf32, #tpu.memory_space<vmem>>, vector<1x64xf32>,
    %172 = vector.extract_strided_slice %165 {offsets = [3, 0], sizes = [1, 64], strides = [1, 1]} : vector<64x64xf32> to vector<1x64xf32>
    %c0_178 = arith.constant 0 : index
    %c192 = arith.constant 192 : index
    %173 = vector.load %arg7[%c0_178, %c192] : memref<1x4096xf32, #tpu.memory_space<vmem>>, vector<1x64xf32>
    tpu.vector_store %arg7[%c0_178, %c192], %172 {strides = array<i32>} : memref<1x4096xf32, #tpu.memory_space<vmem>>, vector<1x64xf32>,
    %174 = vector.extract_strided_slice %165 {offsets = [4, 0], sizes = [1, 64], strides = [1, 1]} : vector<64x64xf32> to vector<1x64xf32>
    %c0_179 = arith.constant 0 : index
    %c256 = arith.constant 256 : index
    %175 = vector.load %arg7[%c0_179, %c256] : memref<1x4096xf32, #tpu.memory_space<vmem>>, vector<1x64xf32>
    tpu.vector_store %arg7[%c0_179, %c256], %174 {strides = array<i32>} : memref<1x4096xf32, #tpu.memory_space<vmem>>, vector<1x64xf32>,
    %176 = vector.extract_strided_slice %165 {offsets = [5, 0], sizes = [1, 64], strides = [1, 1]} : vector<64x64xf32> to vector<1x64xf32>
    %c0_180 = arith.constant 0 : index
    %c320 = arith.constant 320 : index
    %177 = vector.load %arg7[%c0_180, %c320] : memref<1x4096xf32, #tpu.memory_space<vmem>>, vector<1x64xf32>
    tpu.vector_store %arg7[%c0_180, %c320], %176 {strides = array<i32>} : memref<1x4096xf32, #tpu.memory_space<vmem>>, vector<1x64xf32>,
    %178 = vector.extract_strided_slice %165 {offsets = [6, 0], sizes = [1, 64], strides = [1, 1]} : vector<64x64xf32> to vector<1x64xf32>
    %c0_181 = arith.constant 0 : index
    %c384 = arith.constant 384 : index
    %179 = vector.load %arg7[%c0_181, %c384] : memref<1x4096xf32, #tpu.memory_space<vmem>>, vector<1x64xf32>
    tpu.vector_store %arg7[%c0_181, %c384], %178 {strides = array<i32>} : memref<1x4096xf32, #tpu.memory_space<vmem>>, vector<1x64xf32>,
    %180 = vector.extract_strided_slice %165 {offsets = [7, 0], sizes = [1, 64], strides = [1, 1]} : vector<64x64xf32> to vector<1x64xf32>
    %c0_182 = arith.constant 0 : index
    %c448 = arith.constant 448 : index
    %181 = vector.load %arg7[%c0_182, %c448] : memref<1x4096xf32, #tpu.memory_space<vmem>>, vector<1x64xf32>
    tpu.vector_store %arg7[%c0_182, %c448], %180 {strides = array<i32>} : memref<1x4096xf32, #tpu.memory_space<vmem>>, vector<1x64xf32>,
    %182 = vector.extract_strided_slice %165 {offsets = [8, 0], sizes = [1, 64], strides = [1, 1]} : vector<64x64xf32> to vector<1x64xf32>
    %c0_183 = arith.constant 0 : index
    %c512 = arith.constant 512 : index
    %183 = vector.load %arg7[%c0_183, %c512] : memref<1x4096xf32, #tpu.memory_space<vmem>>, vector<1x64xf32>
    tpu.vector_store %arg7[%c0_183, %c512], %182 {strides = array<i32>} : memref<1x4096xf32, #tpu.memory_space<vmem>>, vector<1x64xf32>,
    %184 = vector.extract_strided_slice %165 {offsets = [9, 0], sizes = [1, 64], strides = [1, 1]} : vector<64x64xf32> to vector<1x64xf32>
    %c0_184 = arith.constant 0 : index
    %c576 = arith.constant 576 : index
    %185 = vector.load %arg7[%c0_184, %c576] : memref<1x4096xf32, #tpu.memory_space<vmem>>, vector<1x64xf32>
    tpu.vector_store %arg7[%c0_184, %c576], %184 {strides = array<i32>} : memref<1x4096xf32, #tpu.memory_space<vmem>>, vector<1x64xf32>,
    %186 = vector.extract_strided_slice %165 {offsets = [10, 0], sizes = [1, 64], strides = [1, 1]} : vector<64x64xf32> to vector<1x64xf32>
    %c0_185 = arith.constant 0 : index
    %c640 = arith.constant 640 : index
    %187 = vector.load %arg7[%c0_185, %c640] : memref<1x4096xf32, #tpu.memory_space<vmem>>, vector<1x64xf32>
    tpu.vector_store %arg7[%c0_185, %c640], %186 {strides = array<i32>} : memref<1x4096xf32, #tpu.memory_space<vmem>>, vector<1x64xf32>,
    %188 = vector.extract_strided_slice %165 {offsets = [11, 0], sizes = [1, 64], strides = [1, 1]} : vector<64x64xf32> to vector<1x64xf32>
    %c0_186 = arith.constant 0 : index
    %c704 = arith.constant 704 : index
    %189 = vector.load %arg7[%c0_186, %c704] : memref<1x4096xf32, #tpu.memory_space<vmem>>, vector<1x64xf32>
    tpu.vector_store %arg7[%c0_186, %c704], %188 {strides = array<i32>} : memref<1x4096xf32, #tpu.memory_space<vmem>>, vector<1x64xf32>,
    %190 = vector.extract_strided_slice %165 {offsets = [12, 0], sizes = [1, 64], strides = [1, 1]} : vector<64x64xf32> to vector<1x64xf32>
    %c0_187 = arith.constant 0 : index
    %c768 = arith.constant 768 : index
    %191 = vector.load %arg7[%c0_187, %c768] : memref<1x4096xf32, #tpu.memory_space<vmem>>, vector<1x64xf32>
    tpu.vector_store %arg7[%c0_187, %c768], %190 {strides = array<i32>} : memref<1x4096xf32, #tpu.memory_space<vmem>>, vector<1x64xf32>,
    %192 = vector.extract_strided_slice %165 {offsets = [13, 0], sizes = [1, 64], strides = [1, 1]} : vector<64x64xf32> to vector<1x64xf32>
    %c0_188 = arith.constant 0 : index
    %c832 = arith.constant 832 : index
    %193 = vector.load %arg7[%c0_188, %c832] : memref<1x4096xf32, #tpu.memory_space<vmem>>, vector<1x64xf32>
    tpu.vector_store %arg7[%c0_188, %c832], %192 {strides = array<i32>} : memref<1x4096xf32, #tpu.memory_space<vmem>>, vector<1x64xf32>,
    %194 = vector.extract_strided_slice %165 {offsets = [14, 0], sizes = [1, 64], strides = [1, 1]} : vector<64x64xf32> to vector<1x64xf32>
    %c0_189 = arith.constant 0 : index
    %c896 = arith.constant 896 : index
    %195 = vector.load %arg7[%c0_189, %c896] : memref<1x4096xf32, #tpu.memory_space<vmem>>, vector<1x64xf32>
    tpu.vector_store %arg7[%c0_189, %c896], %194 {strides = array<i32>} : memref<1x4096xf32, #tpu.memory_space<vmem>>, vector<1x64xf32>,
    %196 = vector.extract_strided_slice %165 {offsets = [15, 0], sizes = [1, 64], strides = [1, 1]} : vector<64x64xf32> to vector<1x64xf32>
    %c0_190 = arith.constant 0 : index
    %c960 = arith.constant 960 : index
    %197 = vector.load %arg7[%c0_190, %c960] : memref<1x4096xf32, #tpu.memory_space<vmem>>, vector<1x64xf32>
    tpu.vector_store %arg7[%c0_190, %c960], %196 {strides = array<i32>} : memref<1x4096xf32, #tpu.memory_space<vmem>>, vector<1x64xf32>,
    %198 = vector.extract_strided_slice %165 {offsets = [16, 0], sizes = [1, 64], strides = [1, 1]} : vector<64x64xf32> to vector<1x64xf32>
    %c0_191 = arith.constant 0 : index
    %c1024 = arith.constant 1024 : index
    %199 = vector.load %arg7[%c0_191, %c1024] : memref<1x4096xf32, #tpu.memory_space<vmem>>, vector<1x64xf32>
    tpu.vector_store %arg7[%c0_191, %c1024], %198 {strides = array<i32>} : memref<1x4096xf32, #tpu.memory_space<vmem>>, vector<1x64xf32>,
    %200 = vector.extract_strided_slice %165 {offsets = [17, 0], sizes = [1, 64], strides = [1, 1]} : vector<64x64xf32> to vector<1x64xf32>
    %c0_192 = arith.constant 0 : index
    %c1088 = arith.constant 1088 : index
    %201 = vector.load %arg7[%c0_192, %c1088] : memref<1x4096xf32, #tpu.memory_space<vmem>>, vector<1x64xf32>
    tpu.vector_store %arg7[%c0_192, %c1088], %200 {strides = array<i32>} : memref<1x4096xf32, #tpu.memory_space<vmem>>, vector<1x64xf32>,
    %202 = vector.extract_strided_slice %165 {offsets = [18, 0], sizes = [1, 64], strides = [1, 1]} : vector<64x64xf32> to vector<1x64xf32>
    %c0_193 = arith.constant 0 : index
    %c1152 = arith.constant 1152 : index
    %203 = vector.load %arg7[%c0_193, %c1152] : memref<1x4096xf32, #tpu.memory_space<vmem>>, vector<1x64xf32>
    tpu.vector_store %arg7[%c0_193, %c1152], %202 {strides = array<i32>} : memref<1x4096xf32, #tpu.memory_space<vmem>>, vector<1x64xf32>,
    %204 = vector.extract_strided_slice %165 {offsets = [19, 0], sizes = [1, 64], strides = [1, 1]} : vector<64x64xf32> to vector<1x64xf32>
    %c0_194 = arith.constant 0 : index
    %c1216 = arith.constant 1216 : index
    %205 = vector.load %arg7[%c0_194, %c1216] : memref<1x4096xf32, #tpu.memory_space<vmem>>, vector<1x64xf32>
    tpu.vector_store %arg7[%c0_194, %c1216], %204 {strides = array<i32>} : memref<1x4096xf32, #tpu.memory_space<vmem>>, vector<1x64xf32>,
    %206 = vector.extract_strided_slice %165 {offsets = [20, 0], sizes = [1, 64], strides = [1, 1]} : vector<64x64xf32> to vector<1x64xf32>
    %c0_195 = arith.constant 0 : index
    %c1280 = arith.constant 1280 : index
    %207 = vector.load %arg7[%c0_195, %c1280] : memref<1x4096xf32, #tpu.memory_space<vmem>>, vector<1x64xf32>
    tpu.vector_store %arg7[%c0_195, %c1280], %206 {strides = array<i32>} : memref<1x4096xf32, #tpu.memory_space<vmem>>, vector<1x64xf32>,
    %208 = vector.extract_strided_slice %165 {offsets = [21, 0], sizes = [1, 64], strides = [1, 1]} : vector<64x64xf32> to vector<1x64xf32>
    %c0_196 = arith.constant 0 : index
    %c1344 = arith.constant 1344 : index
    %209 = vector.load %arg7[%c0_196, %c1344] : memref<1x4096xf32, #tpu.memory_space<vmem>>, vector<1x64xf32>
    tpu.vector_store %arg7[%c0_196, %c1344], %208 {strides = array<i32>} : memref<1x4096xf32, #tpu.memory_space<vmem>>, vector<1x64xf32>,
    %210 = vector.extract_strided_slice %165 {offsets = [22, 0], sizes = [1, 64], strides = [1, 1]} : vector<64x64xf32> to vector<1x64xf32>
    %c0_197 = arith.constant 0 : index
    %c1408 = arith.constant 1408 : index
    %211 = vector.load %arg7[%c0_197, %c1408] : memref<1x4096xf32, #tpu.memory_space<vmem>>, vector<1x64xf32>
    tpu.vector_store %arg7[%c0_197, %c1408], %210 {strides = array<i32>} : memref<1x4096xf32, #tpu.memory_space<vmem>>, vector<1x64xf32>,
    %212 = vector.extract_strided_slice %165 {offsets = [23, 0], sizes = [1, 64], strides = [1, 1]} : vector<64x64xf32> to vector<1x64xf32>
    %c0_198 = arith.constant 0 : index
    %c1472 = arith.constant 1472 : index
    %213 = vector.load %arg7[%c0_198, %c1472] : memref<1x4096xf32, #tpu.memory_space<vmem>>, vector<1x64xf32>
    tpu.vector_store %arg7[%c0_198, %c1472], %212 {strides = array<i32>} : memref<1x4096xf32, #tpu.memory_space<vmem>>, vector<1x64xf32>,
    %214 = vector.extract_strided_slice %165 {offsets = [24, 0], sizes = [1, 64], strides = [1, 1]} : vector<64x64xf32> to vector<1x64xf32>
    %c0_199 = arith.constant 0 : index
    %c1536 = arith.constant 1536 : index
    %215 = vector.load %arg7[%c0_199, %c1536] : memref<1x4096xf32, #tpu.memory_space<vmem>>, vector<1x64xf32>
    tpu.vector_store %arg7[%c0_199, %c1536], %214 {strides = array<i32>} : memref<1x4096xf32, #tpu.memory_space<vmem>>, vector<1x64xf32>,
    %216 = vector.extract_strided_slice %165 {offsets = [25, 0], sizes = [1, 64], strides = [1, 1]} : vector<64x64xf32> to vector<1x64xf32>
    %c0_200 = arith.constant 0 : index
    %c1600 = arith.constant 1600 : index
    %217 = vector.load %arg7[%c0_200, %c1600] : memref<1x4096xf32, #tpu.memory_space<vmem>>, vector<1x64xf32>
    tpu.vector_store %arg7[%c0_200, %c1600], %216 {strides = array<i32>} : memref<1x4096xf32, #tpu.memory_space<vmem>>, vector<1x64xf32>,
    %218 = vector.extract_strided_slice %165 {offsets = [26, 0], sizes = [1, 64], strides = [1, 1]} : vector<64x64xf32> to vector<1x64xf32>
    %c0_201 = arith.constant 0 : index
    %c1664 = arith.constant 1664 : index
    %219 = vector.load %arg7[%c0_201, %c1664] : memref<1x4096xf32, #tpu.memory_space<vmem>>, vector<1x64xf32>
    tpu.vector_store %arg7[%c0_201, %c1664], %218 {strides = array<i32>} : memref<1x4096xf32, #tpu.memory_space<vmem>>, vector<1x64xf32>,
    %220 = vector.extract_strided_slice %165 {offsets = [27, 0], sizes = [1, 64], strides = [1, 1]} : vector<64x64xf32> to vector<1x64xf32>
    %c0_202 = arith.constant 0 : index
    %c1728 = arith.constant 1728 : index
    %221 = vector.load %arg7[%c0_202, %c1728] : memref<1x4096xf32, #tpu.memory_space<vmem>>, vector<1x64xf32>
    tpu.vector_store %arg7[%c0_202, %c1728], %220 {strides = array<i32>} : memref<1x4096xf32, #tpu.memory_space<vmem>>, vector<1x64xf32>,
    %222 = vector.extract_strided_slice %165 {offsets = [28, 0], sizes = [1, 64], strides = [1, 1]} : vector<64x64xf32> to vector<1x64xf32>
    %c0_203 = arith.constant 0 : index
    %c1792 = arith.constant 1792 : index
    %223 = vector.load %arg7[%c0_203, %c1792] : memref<1x4096xf32, #tpu.memory_space<vmem>>, vector<1x64xf32>
    tpu.vector_store %arg7[%c0_203, %c1792], %222 {strides = array<i32>} : memref<1x4096xf32, #tpu.memory_space<vmem>>, vector<1x64xf32>,
    %224 = vector.extract_strided_slice %165 {offsets = [29, 0], sizes = [1, 64], strides = [1, 1]} : vector<64x64xf32> to vector<1x64xf32>
    %c0_204 = arith.constant 0 : index
    %c1856 = arith.constant 1856 : index
    %225 = vector.load %arg7[%c0_204, %c1856] : memref<1x4096xf32, #tpu.memory_space<vmem>>, vector<1x64xf32>
    tpu.vector_store %arg7[%c0_204, %c1856], %224 {strides = array<i32>} : memref<1x4096xf32, #tpu.memory_space<vmem>>, vector<1x64xf32>,
    %226 = vector.extract_strided_slice %165 {offsets = [30, 0], sizes = [1, 64], strides = [1, 1]} : vector<64x64xf32> to vector<1x64xf32>
    %c0_205 = arith.constant 0 : index
    %c1920 = arith.constant 1920 : index
    %227 = vector.load %arg7[%c0_205, %c1920] : memref<1x4096xf32, #tpu.memory_space<vmem>>, vector<1x64xf32>
    tpu.vector_store %arg7[%c0_205, %c1920], %226 {strides = array<i32>} : memref<1x4096xf32, #tpu.memory_space<vmem>>, vector<1x64xf32>,
    %228 = vector.extract_strided_slice %165 {offsets = [31, 0], sizes = [1, 64], strides = [1, 1]} : vector<64x64xf32> to vector<1x64xf32>
    %c0_206 = arith.constant 0 : index
    %c1984 = arith.constant 1984 : index
    %229 = vector.load %arg7[%c0_206, %c1984] : memref<1x4096xf32, #tpu.memory_space<vmem>>, vector<1x64xf32>
    tpu.vector_store %arg7[%c0_206, %c1984], %228 {strides = array<i32>} : memref<1x4096xf32, #tpu.memory_space<vmem>>, vector<1x64xf32>,
    %230 = vector.extract_strided_slice %165 {offsets = [32, 0], sizes = [1, 64], strides = [1, 1]} : vector<64x64xf32> to vector<1x64xf32>
    %c0_207 = arith.constant 0 : index
    %c2048 = arith.constant 2048 : index
    %231 = vector.load %arg7[%c0_207, %c2048] : memref<1x4096xf32, #tpu.memory_space<vmem>>, vector<1x64xf32>
    tpu.vector_store %arg7[%c0_207, %c2048], %230 {strides = array<i32>} : memref<1x4096xf32, #tpu.memory_space<vmem>>, vector<1x64xf32>,
    %232 = vector.extract_strided_slice %165 {offsets = [33, 0], sizes = [1, 64], strides = [1, 1]} : vector<64x64xf32> to vector<1x64xf32>
    %c0_208 = arith.constant 0 : index
    %c2112 = arith.constant 2112 : index
    %233 = vector.load %arg7[%c0_208, %c2112] : memref<1x4096xf32, #tpu.memory_space<vmem>>, vector<1x64xf32>
    tpu.vector_store %arg7[%c0_208, %c2112], %232 {strides = array<i32>} : memref<1x4096xf32, #tpu.memory_space<vmem>>, vector<1x64xf32>,
    %234 = vector.extract_strided_slice %165 {offsets = [34, 0], sizes = [1, 64], strides = [1, 1]} : vector<64x64xf32> to vector<1x64xf32>
    %c0_209 = arith.constant 0 : index
    %c2176 = arith.constant 2176 : index
    %235 = vector.load %arg7[%c0_209, %c2176] : memref<1x4096xf32, #tpu.memory_space<vmem>>, vector<1x64xf32>
    tpu.vector_store %arg7[%c0_209, %c2176], %234 {strides = array<i32>} : memref<1x4096xf32, #tpu.memory_space<vmem>>, vector<1x64xf32>,
    %236 = vector.extract_strided_slice %165 {offsets = [35, 0], sizes = [1, 64], strides = [1, 1]} : vector<64x64xf32> to vector<1x64xf32>
    %c0_210 = arith.constant 0 : index
    %c2240 = arith.constant 2240 : index
    %237 = vector.load %arg7[%c0_210, %c2240] : memref<1x4096xf32, #tpu.memory_space<vmem>>, vector<1x64xf32>
    tpu.vector_store %arg7[%c0_210, %c2240], %236 {strides = array<i32>} : memref<1x4096xf32, #tpu.memory_space<vmem>>, vector<1x64xf32>,
    %238 = vector.extract_strided_slice %165 {offsets = [36, 0], sizes = [1, 64], strides = [1, 1]} : vector<64x64xf32> to vector<1x64xf32>
    %c0_211 = arith.constant 0 : index
    %c2304 = arith.constant 2304 : index
    %239 = vector.load %arg7[%c0_211, %c2304] : memref<1x4096xf32, #tpu.memory_space<vmem>>, vector<1x64xf32>
    tpu.vector_store %arg7[%c0_211, %c2304], %238 {strides = array<i32>} : memref<1x4096xf32, #tpu.memory_space<vmem>>, vector<1x64xf32>,
    %240 = vector.extract_strided_slice %165 {offsets = [37, 0], sizes = [1, 64], strides = [1, 1]} : vector<64x64xf32> to vector<1x64xf32>
    %c0_212 = arith.constant 0 : index
    %c2368 = arith.constant 2368 : index
    %241 = vector.load %arg7[%c0_212, %c2368] : memref<1x4096xf32, #tpu.memory_space<vmem>>, vector<1x64xf32>
    tpu.vector_store %arg7[%c0_212, %c2368], %240 {strides = array<i32>} : memref<1x4096xf32, #tpu.memory_space<vmem>>, vector<1x64xf32>,
    %242 = vector.extract_strided_slice %165 {offsets = [38, 0], sizes = [1, 64], strides = [1, 1]} : vector<64x64xf32> to vector<1x64xf32>
    %c0_213 = arith.constant 0 : index
    %c2432 = arith.constant 2432 : index
    %243 = vector.load %arg7[%c0_213, %c2432] : memref<1x4096xf32, #tpu.memory_space<vmem>>, vector<1x64xf32>
    tpu.vector_store %arg7[%c0_213, %c2432], %242 {strides = array<i32>} : memref<1x4096xf32, #tpu.memory_space<vmem>>, vector<1x64xf32>,
    %244 = vector.extract_strided_slice %165 {offsets = [39, 0], sizes = [1, 64], strides = [1, 1]} : vector<64x64xf32> to vector<1x64xf32>
    %c0_214 = arith.constant 0 : index
    %c2496 = arith.constant 2496 : index
    %245 = vector.load %arg7[%c0_214, %c2496] : memref<1x4096xf32, #tpu.memory_space<vmem>>, vector<1x64xf32>
    tpu.vector_store %arg7[%c0_214, %c2496], %244 {strides = array<i32>} : memref<1x4096xf32, #tpu.memory_space<vmem>>, vector<1x64xf32>,
    %246 = vector.extract_strided_slice %165 {offsets = [40, 0], sizes = [1, 64], strides = [1, 1]} : vector<64x64xf32> to vector<1x64xf32>
    %c0_215 = arith.constant 0 : index
    %c2560 = arith.constant 2560 : index
    %247 = vector.load %arg7[%c0_215, %c2560] : memref<1x4096xf32, #tpu.memory_space<vmem>>, vector<1x64xf32>
    tpu.vector_store %arg7[%c0_215, %c2560], %246 {strides = array<i32>} : memref<1x4096xf32, #tpu.memory_space<vmem>>, vector<1x64xf32>,
    %248 = vector.extract_strided_slice %165 {offsets = [41, 0], sizes = [1, 64], strides = [1, 1]} : vector<64x64xf32> to vector<1x64xf32>
    %c0_216 = arith.constant 0 : index
    %c2624 = arith.constant 2624 : index
    %249 = vector.load %arg7[%c0_216, %c2624] : memref<1x4096xf32, #tpu.memory_space<vmem>>, vector<1x64xf32>
    tpu.vector_store %arg7[%c0_216, %c2624], %248 {strides = array<i32>} : memref<1x4096xf32, #tpu.memory_space<vmem>>, vector<1x64xf32>,
    %250 = vector.extract_strided_slice %165 {offsets = [42, 0], sizes = [1, 64], strides = [1, 1]} : vector<64x64xf32> to vector<1x64xf32>
    %c0_217 = arith.constant 0 : index
    %c2688 = arith.constant 2688 : index
    %251 = vector.load %arg7[%c0_217, %c2688] : memref<1x4096xf32, #tpu.memory_space<vmem>>, vector<1x64xf32>
    tpu.vector_store %arg7[%c0_217, %c2688], %250 {strides = array<i32>} : memref<1x4096xf32, #tpu.memory_space<vmem>>, vector<1x64xf32>,
    %252 = vector.extract_strided_slice %165 {offsets = [43, 0], sizes = [1, 64], strides = [1, 1]} : vector<64x64xf32> to vector<1x64xf32>
    %c0_218 = arith.constant 0 : index
    %c2752 = arith.constant 2752 : index
    %253 = vector.load %arg7[%c0_218, %c2752] : memref<1x4096xf32, #tpu.memory_space<vmem>>, vector<1x64xf32>
    tpu.vector_store %arg7[%c0_218, %c2752], %252 {strides = array<i32>} : memref<1x4096xf32, #tpu.memory_space<vmem>>, vector<1x64xf32>,
    %254 = vector.extract_strided_slice %165 {offsets = [44, 0], sizes = [1, 64], strides = [1, 1]} : vector<64x64xf32> to vector<1x64xf32>
    %c0_219 = arith.constant 0 : index
    %c2816 = arith.constant 2816 : index
    %255 = vector.load %arg7[%c0_219, %c2816] : memref<1x4096xf32, #tpu.memory_space<vmem>>, vector<1x64xf32>
    tpu.vector_store %arg7[%c0_219, %c2816], %254 {strides = array<i32>} : memref<1x4096xf32, #tpu.memory_space<vmem>>, vector<1x64xf32>,
    %256 = vector.extract_strided_slice %165 {offsets = [45, 0], sizes = [1, 64], strides = [1, 1]} : vector<64x64xf32> to vector<1x64xf32>
    %c0_220 = arith.constant 0 : index
    %c2880 = arith.constant 2880 : index
    %257 = vector.load %arg7[%c0_220, %c2880] : memref<1x4096xf32, #tpu.memory_space<vmem>>, vector<1x64xf32>
    tpu.vector_store %arg7[%c0_220, %c2880], %256 {strides = array<i32>} : memref<1x4096xf32, #tpu.memory_space<vmem>>, vector<1x64xf32>,
    %258 = vector.extract_strided_slice %165 {offsets = [46, 0], sizes = [1, 64], strides = [1, 1]} : vector<64x64xf32> to vector<1x64xf32>
    %c0_221 = arith.constant 0 : index
    %c2944 = arith.constant 2944 : index
    %259 = vector.load %arg7[%c0_221, %c2944] : memref<1x4096xf32, #tpu.memory_space<vmem>>, vector<1x64xf32>
    tpu.vector_store %arg7[%c0_221, %c2944], %258 {strides = array<i32>} : memref<1x4096xf32, #tpu.memory_space<vmem>>, vector<1x64xf32>,
    %260 = vector.extract_strided_slice %165 {offsets = [47, 0], sizes = [1, 64], strides = [1, 1]} : vector<64x64xf32> to vector<1x64xf32>
    %c0_222 = arith.constant 0 : index
    %c3008 = arith.constant 3008 : index
    %261 = vector.load %arg7[%c0_222, %c3008] : memref<1x4096xf32, #tpu.memory_space<vmem>>, vector<1x64xf32>
    tpu.vector_store %arg7[%c0_222, %c3008], %260 {strides = array<i32>} : memref<1x4096xf32, #tpu.memory_space<vmem>>, vector<1x64xf32>,
    %262 = vector.extract_strided_slice %165 {offsets = [48, 0], sizes = [1, 64], strides = [1, 1]} : vector<64x64xf32> to vector<1x64xf32>
    %c0_223 = arith.constant 0 : index
    %c3072 = arith.constant 3072 : index
    %263 = vector.load %arg7[%c0_223, %c3072] : memref<1x4096xf32, #tpu.memory_space<vmem>>, vector<1x64xf32>
    tpu.vector_store %arg7[%c0_223, %c3072], %262 {strides = array<i32>} : memref<1x4096xf32, #tpu.memory_space<vmem>>, vector<1x64xf32>,
    %264 = vector.extract_strided_slice %165 {offsets = [49, 0], sizes = [1, 64], strides = [1, 1]} : vector<64x64xf32> to vector<1x64xf32>
    %c0_224 = arith.constant 0 : index
    %c3136 = arith.constant 3136 : index
    %265 = vector.load %arg7[%c0_224, %c3136] : memref<1x4096xf32, #tpu.memory_space<vmem>>, vector<1x64xf32>
    tpu.vector_store %arg7[%c0_224, %c3136], %264 {strides = array<i32>} : memref<1x4096xf32, #tpu.memory_space<vmem>>, vector<1x64xf32>,
    %266 = vector.extract_strided_slice %165 {offsets = [50, 0], sizes = [1, 64], strides = [1, 1]} : vector<64x64xf32> to vector<1x64xf32>
    %c0_225 = arith.constant 0 : index
    %c3200 = arith.constant 3200 : index
    %267 = vector.load %arg7[%c0_225, %c3200] : memref<1x4096xf32, #tpu.memory_space<vmem>>, vector<1x64xf32>
    tpu.vector_store %arg7[%c0_225, %c3200], %266 {strides = array<i32>} : memref<1x4096xf32, #tpu.memory_space<vmem>>, vector<1x64xf32>,
    %268 = vector.extract_strided_slice %165 {offsets = [51, 0], sizes = [1, 64], strides = [1, 1]} : vector<64x64xf32> to vector<1x64xf32>
    %c0_226 = arith.constant 0 : index
    %c3264 = arith.constant 3264 : index
    %269 = vector.load %arg7[%c0_226, %c3264] : memref<1x4096xf32, #tpu.memory_space<vmem>>, vector<1x64xf32>
    tpu.vector_store %arg7[%c0_226, %c3264], %268 {strides = array<i32>} : memref<1x4096xf32, #tpu.memory_space<vmem>>, vector<1x64xf32>,
    %270 = vector.extract_strided_slice %165 {offsets = [52, 0], sizes = [1, 64], strides = [1, 1]} : vector<64x64xf32> to vector<1x64xf32>
    %c0_227 = arith.constant 0 : index
    %c3328 = arith.constant 3328 : index
    %271 = vector.load %arg7[%c0_227, %c3328] : memref<1x4096xf32, #tpu.memory_space<vmem>>, vector<1x64xf32>
    tpu.vector_store %arg7[%c0_227, %c3328], %270 {strides = array<i32>} : memref<1x4096xf32, #tpu.memory_space<vmem>>, vector<1x64xf32>,
    %272 = vector.extract_strided_slice %165 {offsets = [53, 0], sizes = [1, 64], strides = [1, 1]} : vector<64x64xf32> to vector<1x64xf32>
    %c0_228 = arith.constant 0 : index
    %c3392 = arith.constant 3392 : index
    %273 = vector.load %arg7[%c0_228, %c3392] : memref<1x4096xf32, #tpu.memory_space<vmem>>, vector<1x64xf32>
    tpu.vector_store %arg7[%c0_228, %c3392], %272 {strides = array<i32>} : memref<1x4096xf32, #tpu.memory_space<vmem>>, vector<1x64xf32>,
    %274 = vector.extract_strided_slice %165 {offsets = [54, 0], sizes = [1, 64], strides = [1, 1]} : vector<64x64xf32> to vector<1x64xf32>
    %c0_229 = arith.constant 0 : index
    %c3456 = arith.constant 3456 : index
    %275 = vector.load %arg7[%c0_229, %c3456] : memref<1x4096xf32, #tpu.memory_space<vmem>>, vector<1x64xf32>
    tpu.vector_store %arg7[%c0_229, %c3456], %274 {strides = array<i32>} : memref<1x4096xf32, #tpu.memory_space<vmem>>, vector<1x64xf32>,
    %276 = vector.extract_strided_slice %165 {offsets = [55, 0], sizes = [1, 64], strides = [1, 1]} : vector<64x64xf32> to vector<1x64xf32>
    %c0_230 = arith.constant 0 : index
    %c3520 = arith.constant 3520 : index
    %277 = vector.load %arg7[%c0_230, %c3520] : memref<1x4096xf32, #tpu.memory_space<vmem>>, vector<1x64xf32>
    tpu.vector_store %arg7[%c0_230, %c3520], %276 {strides = array<i32>} : memref<1x4096xf32, #tpu.memory_space<vmem>>, vector<1x64xf32>,
    %278 = vector.extract_strided_slice %165 {offsets = [56, 0], sizes = [1, 64], strides = [1, 1]} : vector<64x64xf32> to vector<1x64xf32>
    %c0_231 = arith.constant 0 : index
    %c3584 = arith.constant 3584 : index
    %279 = vector.load %arg7[%c0_231, %c3584] : memref<1x4096xf32, #tpu.memory_space<vmem>>, vector<1x64xf32>
    tpu.vector_store %arg7[%c0_231, %c3584], %278 {strides = array<i32>} : memref<1x4096xf32, #tpu.memory_space<vmem>>, vector<1x64xf32>,
    %280 = vector.extract_strided_slice %165 {offsets = [57, 0], sizes = [1, 64], strides = [1, 1]} : vector<64x64xf32> to vector<1x64xf32>
    %c0_232 = arith.constant 0 : index
    %c3648 = arith.constant 3648 : index
    %281 = vector.load %arg7[%c0_232, %c3648] : memref<1x4096xf32, #tpu.memory_space<vmem>>, vector<1x64xf32>
    tpu.vector_store %arg7[%c0_232, %c3648], %280 {strides = array<i32>} : memref<1x4096xf32, #tpu.memory_space<vmem>>, vector<1x64xf32>,
    %282 = vector.extract_strided_slice %165 {offsets = [58, 0], sizes = [1, 64], strides = [1, 1]} : vector<64x64xf32> to vector<1x64xf32>
    %c0_233 = arith.constant 0 : index
    %c3712 = arith.constant 3712 : index
    %283 = vector.load %arg7[%c0_233, %c3712] : memref<1x4096xf32, #tpu.memory_space<vmem>>, vector<1x64xf32>
    tpu.vector_store %arg7[%c0_233, %c3712], %282 {strides = array<i32>} : memref<1x4096xf32, #tpu.memory_space<vmem>>, vector<1x64xf32>,
    %284 = vector.extract_strided_slice %165 {offsets = [59, 0], sizes = [1, 64], strides = [1, 1]} : vector<64x64xf32> to vector<1x64xf32>
    %c0_234 = arith.constant 0 : index
    %c3776 = arith.constant 3776 : index
    %285 = vector.load %arg7[%c0_234, %c3776] : memref<1x4096xf32, #tpu.memory_space<vmem>>, vector<1x64xf32>
    tpu.vector_store %arg7[%c0_234, %c3776], %284 {strides = array<i32>} : memref<1x4096xf32, #tpu.memory_space<vmem>>, vector<1x64xf32>,
    %286 = vector.extract_strided_slice %165 {offsets = [60, 0], sizes = [1, 64], strides = [1, 1]} : vector<64x64xf32> to vector<1x64xf32>
    %c0_235 = arith.constant 0 : index
    %c3840 = arith.constant 3840 : index
    %287 = vector.load %arg7[%c0_235, %c3840] : memref<1x4096xf32, #tpu.memory_space<vmem>>, vector<1x64xf32>
    tpu.vector_store %arg7[%c0_235, %c3840], %286 {strides = array<i32>} : memref<1x4096xf32, #tpu.memory_space<vmem>>, vector<1x64xf32>,
    %288 = vector.extract_strided_slice %165 {offsets = [61, 0], sizes = [1, 64], strides = [1, 1]} : vector<64x64xf32> to vector<1x64xf32>
    %c0_236 = arith.constant 0 : index
    %c3904 = arith.constant 3904 : index
    %289 = vector.load %arg7[%c0_236, %c3904] : memref<1x4096xf32, #tpu.memory_space<vmem>>, vector<1x64xf32>
    tpu.vector_store %arg7[%c0_236, %c3904], %288 {strides = array<i32>} : memref<1x4096xf32, #tpu.memory_space<vmem>>, vector<1x64xf32>,
    %290 = vector.extract_strided_slice %165 {offsets = [62, 0], sizes = [1, 64], strides = [1, 1]} : vector<64x64xf32> to vector<1x64xf32>
    %c0_237 = arith.constant 0 : index
    %c3968 = arith.constant 3968 : index
    %291 = vector.load %arg7[%c0_237, %c3968] : memref<1x4096xf32, #tpu.memory_space<vmem>>, vector<1x64xf32>
    tpu.vector_store %arg7[%c0_237, %c3968], %290 {strides = array<i32>} : memref<1x4096xf32, #tpu.memory_space<vmem>>, vector<1x64xf32>,
    %292 = vector.extract_strided_slice %165 {offsets = [63, 0], sizes = [1, 64], strides = [1, 1]} : vector<64x64xf32> to vector<1x64xf32>
    %c0_238 = arith.constant 0 : index
    %c4032 = arith.constant 4032 : index
    %293 = vector.load %arg7[%c0_238, %c4032] : memref<1x4096xf32, #tpu.memory_space<vmem>>, vector<1x64xf32>
    tpu.vector_store %arg7[%c0_238, %c4032], %292 {strides = array<i32>} : memref<1x4096xf32, #tpu.memory_space<vmem>>, vector<1x64xf32>,
    %c0_239 = arith.constant 0 : index
    %c0_240 = arith.constant 0 : index
    %294 = vector.load %arg7[%c0_239, %c0_240] : memref<1x4096xf32, #tpu.memory_space<vmem>>, vector<1x4096xf32>
    %295 = arith.truncf %294 : vector<1x4096xf32> to vector<1x4096xbf16>
    %c0_241 = arith.constant 0 : index
    %c0_242 = arith.constant 0 : index
    %296 = vector.load %arg4[%c0_241, %c0_242] : memref<4096x128xbf16, #tpu.memory_space<vmem>>, vector<4096x128xbf16>
    %cst_243 = arith.constant dense<0.000000e+00> : vector<1x128xf32>
    %297 = tpu.matmul %295, %296, %cst_243 {dimension_numbers = #tpu.dot_dimension_numbers<[1], [0], [0], [1], [0, 0, 1, 1], [], []>} : vector<1x4096xbf16>, vector<4096x128xbf16>, vector<1x128xf32> -> vector<1x128xf32>
    %c0_244 = arith.constant 0 : index
    %c0_245 = arith.constant 0 : index
    %298 = vector.load %arg5[%c0_244, %c0_245] : memref<1x128xf32, #tpu.memory_space<vmem>>, vector<1x128xf32>
    %299 = arith.addf %297, %298 : vector<1x128xf32>
    %300 = vector.shape_cast %299 : vector<1x128xf32> to vector<1x128xf32>
    %301 = vector.broadcast %300 : vector<1x128xf32> to vector<8x128xf32>
    %c0_246 = arith.constant 0 : index
    %c0_247 = arith.constant 0 : index
    %c0_248 = arith.constant 0 : index
    %302 = vector.load %arg6[%c0_246, %c0_247, %c0_248] : memref<1x8x128xf32, #tpu.memory_space<vmem>>, vector<1x8x128xf32>
    %303 = vector.shape_cast %302 : vector<1x8x128xf32> to vector<8x128xf32>
    %304 = vector.shape_cast %301 : vector<8x128xf32> to vector<1x8x128xf32>
    tpu.vector_store %arg6[%c0_246, %c0_247, %c0_248], %304 {strides = array<i32>} : memref<1x8x128xf32, #tpu.memory_space<vmem>>, vector<1x8x128xf32>,
    return
  }
  func.func @transform_0(%arg0: i32) -> (i32, i32, i32, i32) {
    %c0_i32 = arith.constant 0 : i32
    %c0_i32_0 = arith.constant 0 : i32
    %c0_i32_1 = arith.constant 0 : i32
    %c0_i32_2 = arith.constant 0 : i32
    return %arg0, %c0_i32, %c0_i32_0, %c0_i32_1 : i32, i32, i32, i32
  }
  func.func @transform_1(%arg0: i32) -> (i32, i32, i32) {
    %c0_i32 = arith.constant 0 : i32
    %c0_i32_0 = arith.constant 0 : i32
    %c0_i32_1 = arith.constant 0 : i32
    %c0_i32_2 = arith.constant 0 : i32
    return %c0_i32, %c0_i32_0, %c0_i32_1 : i32, i32, i32
  }
  func.func @transform_2(%arg0: i32) -> (i32, i32) {
    %c0_i32 = arith.constant 0 : i32
    %c0_i32_0 = arith.constant 0 : i32
    %c0_i32_1 = arith.constant 0 : i32
    return %c0_i32, %c0_i32_0 : i32, i32
  }
  func.func @transform_3(%arg0: i32) -> (i32, i32) {
    %c0_i32 = arith.constant 0 : i32
    %c0_i32_0 = arith.constant 0 : i32
    %c0_i32_1 = arith.constant 0 : i32
    return %c0_i32, %c0_i32_0 : i32, i32
  }
  func.func @transform_4(%arg0: i32) -> (i32, i32) {
    %c0_i32 = arith.constant 0 : i32
    %c0_i32_0 = arith.constant 0 : i32
    %c0_i32_1 = arith.constant 0 : i32
    return %c0_i32, %c0_i32_0 : i32, i32
  }
  func.func @transform_5(%arg0: i32) -> (i32, i32, i32) {
    %c0_i32 = arith.constant 0 : i32
    %c0_i32_0 = arith.constant 0 : i32
    %c0_i32_1 = arith.constant 0 : i32
    return %arg0, %c0_i32, %c0_i32_0 : i32, i32, i32
  }
}

</mosaic_0001>

<bundles_post_ra>
// kernel: tpu_custom_call.1
= control target key start
LH: loop header
LB: loop body
LE: loop exit
PB: predicated region body
PF: predicated region fallthrough
CT: control target
= control target key end

     0   :  { %10 = vsyncpa [#allocation4], 0  ;;  %s10814_s0 = inlined_call_operand.vmem [shape: f32[8,9,9,3], index: 0, kind: input, shape index: {}]   ;;  %s10815_s1 = inlined_call_operand.vmem [shape: f32[9,3,64], index: 1, kind: input, shape index: {}]   ;;  %s10816_s2 = inlined_call_operand.vmem [shape: f32[1,64], index: 2, kind: input, shape index: {}]   ;;  %s10817_s3 = inlined_call_operand.hbm [shape: bf16[4096,128], index: 3, kind: input, shape index: {}]   ;;  %s10818_s4 = inlined_call_operand.vmem [shape: f32[1,128], index: 4, kind: input, shape index: {}]   ;;  %s10819_s5 = inlined_call_operand.hbm [shape: f32[2,8,128], index: 5, kind: output, shape index: {}]  }
   0x1   :  { %11 = vsyncpa [#allocation5], 0 }
   0x2   :  { %13 = vsyncpa [#allocation5 + $0x1], 0  ;;  %s9208_s18 = smov 0   ;;  %s9210_s19 = smov 0  }
   0x3   :  { %s9212_s20 = smov 0   ;;  %s9214_s21 = smov 0  }
   0x4 LB: > { %s9229_s22 = sadd.s32 4294967295, %s9170_s21   ;;  %s6675_s23 = sadd.s32 4294967294, %s9170_s21   ;;  %s9170_s21 = sphi %s9214_s21, %s10839_s21   ;;  %s9166_s20 = sphi %s9212_s20, %s10838_s20   ;;  %s9162_s19 = sphi %s9210_s19, %s10837_s19   ;;  %s9158_s18 = sphi %s9208_s18, %s10836_s18  }
   0x5   : > { %s9233_s24 = sadd.s32 1, %s9170_s21   ;;  %s136_s25 = sadd.s32 1, %s9166_s20 }
   0x6   : > { %s133_s26 = ssub.s32 %s9170_s21, %s9233_s24  ;;  %p146_p0 = scmp.ne.s32.totalorder %s9166_s20, %s9162_s19 }
   0x7   : > { %p134_p1 = scmp.eq.s32.totalorder %s133_s26, 0  ;;  %p147_p2 = scmp.eq.s32.totalorder %s9229_s22, 1 }
   0x8   : > { %p152_p3 = scmp.ne.s32.totalorder %s9162_s19, %s9158_s18  ;;  %p153_p4 = scmp.eq.s32.totalorder %s6675_s23, 1 }
   0x9   : > { %s9244_s27 = scalar_select %p134_p1, %s9166_s20, %s136_s25  }
   0xa   : > { %p9246_p5 = por %p147_p2, %p146_p0  ;;  %p9250_p6 = por %p153_p4, %p152_p3 }
   0xb   : > { %p6676_p7 = scmp.ge.s32.totalorder %s9170_s21, 1  ;;  %p160_p8 = scmp.lt.s32.totalorder %s9170_s21, 3 }
   0xc   : > { %s10823_s28 = scalar_select %p9246_p5, 1, 0 }
   0xd   : > { %s10824_s29 = scalar_select %p9250_p6, 1, 0 }
   0xe   : > { %p10820_p9 = scmp.eq.s32.totalorder %s9229_s22, 0  ;;  %p9257_p10 = pnand %p6676_p7, %p160_p8 }
   0xf   : > { %s9172_s6 = smov [#allocation3]   ;;  %s9076_s11 = scalar_lea.hbm %s10817_s3, 32768 }
  0x10   : > { %s10825_s30 = scalar_select %p9257_p10, 1, 0 }
  0x11   : > { %s178_s7 = sshll.u32 %s9172_s6, 4  ;;  %p8726_p11 = pneg %p9257_p10  ;;  %s179_s7 = int_to_ptr.vmem [resolvable:$true] %s178_s7 }
  0x12   : > { %p9077_p13 = scmp.ne.s32.totalorder %s10817_s3, %s9076_s11  ;;  %p9083_p3 = scmp.lt.u32.totalorder %s9076_s11, %s10817_s3 }
  0x13   : > { %p9265_p12 = pnand %p10820_p9, %p8726_p11 }
  0x15   : > { %p9078_p0 = pneg %p9265_p12 }
  0x17   : > { %p9079_p1 = pnand %p9078_p0, %p9077_p13 }
  0x19   : > { %p9080_p2 = pneg %p9079_p1 }
  0x1b   : > { %p9085_p4 = pnand %p9083_p3, %p9080_p2 }
  0x1d   : > { %9088 = shalt.err (!%p9085_p4)
}
  0x1e   : > { %s9089_s16 = scalar_lea.vmem %s179_s7, 32768  ;;  %p9097_p9 = scmp.lt.s32.totalorder %s179_s7, %s179_s7 }
  0x1f   : > { %p9090_p7 = scmp.ne.s32.totalorder %s179_s7, %s9089_s16  ;;  %p9098_p6 = scmp.lt.s32.totalorder %s9089_s16, %s9089_s16 }
  0x21   : > { %p9092_p8 = pnand %p9090_p7, %p9078_p0  ;;  %p9099_p5 = por %p9098_p6, %p9097_p9 }
  0x23   : > { %p9093_p11 = pneg %p9092_p8 }
  0x25   : > { %p9100_p10 = pnand %p9099_p5, %p9093_p11 }
  0x27   : > { %9103 = shalt.err (!%p9100_p10)
}
  0x28   : > { %s9173_s17 = smov 64   ;;  %s9174_s23 = smov 4  }
  0x29   : > { %8729 = dma.hbm_to_vmem [thread:$0]  (!%p9265_p12), %s10817_s3, 32768, %s179_s7, [#allocation4], %s9173_s17, %s9173_s17, %s9174_s23  }
  0x2a   : > { %p10827_p13 = scmp.ne.s32.totalorder %s10825_s30, 0 }
  0x2b   : > { %p10828_p1 = scmp.eq.s32.totalorder (!%p10827_p13), %s9229_s22, 0 }
  0x2c   : > { %207 = sbr.rel (%p10827_p13) target bundleno = 1661 (0x67d), region = 40 }
  0x33   : > { %9149 = dma.done.wait (%p10828_p1), [#allocation4], 32768   ;;  %p10829_p0 = pmov %p10828_p1 }
  0x34   : > { %s6682_s6 = sshll.u32 %s9229_s22, 2  ;;  %vm395_vm0 = vcmask 1042432   ;;  %vm298_vm1 = vcmask 23552   ;;  %v6716_v0 = vld [vmem:[%s10815_s1 + $0x4] sm:$0x7]  ;;  %s9176_s14 = smov 64  }
  0x35   : > { %9151 = vsyncadd (%p10829_p0), [#allocation4], 4294934528  ;;  %p237_p5 = scmp.lt.s32.totalorder %s6682_s6, 7  ;;  %v279_v1 = vld [vmem:[%s10815_s1] sm:$0x7]  ;;  %8011 = vmatprep.subr.msk.mxu0 %vm395_vm0, %v6716_v0  ;;  %8461 = vmatprep.subr.msk.mxu1 %vm395_vm0, %v6716_v0  ;;  %s233_s17 = sand.u32 1, %s9162_s19  }
  0x36   : > { %8012 = vmatpush3.msk.msra.mxu0 %vm395_vm0, %v6716_v0  ;;  %v6799_v5 = vld [vmem:[%s10815_s1 + $0x8] sm:$0x7]  ;;  %8462 = vmatpush3.msk.msra.mxu1 %vm395_vm0, %v6716_v0  ;;  %v9402_v24 = vld [vmem:[%s10815_s1 + $0xc] sm:$0x7]  ;;  %v6891_v52 = vld [vmem:[%s10815_s1 + $0x10] sm:$0x7] }
  0x37   : > { %s10841_s6 = smov (!%p237_p5, %s6682_s6), 7  ;;  %8061 = vmatprep.subr.msk.mxu0 %vm395_vm0, %v279_v1  ;;  %s6681_s23 = sshll.u32 %s233_s17, 3 }
  0x38   : > { %s8719_s9 = smul.u32 144, %s10841_s6  ;;  %s7359_s25 = sshll.u32 %s9229_s22, 7 }
  0x39   : > { %s235_s26 = scalar_lea.vmem [#allocation6], %s6681_s23  ;;  %s10772_s10 = scalar_lea.hbm %s10819_s5, %s7359_s25 }
  0x3a   : > { %s9298_s11 = scalar_lea.vmem %s10814_s0, %s8719_s9  ;;  %s6604_s6 = sshll.u32 %s235_s26, 4  ;;  %s10774_s6 = int_to_ptr.vmem [resolvable:$true] %s6604_s6 }
  0x3b   : > { %v9305_v2 = vld [vmem:[%s9298_s11 + $0x90] sm:$0xff]  ;;  %v9308_v3 = vld [vmem:[%s9298_s11 + $0xa0] sm:$0xff]  ;;  %s6591_s7 = scalar_lea.sflag [#allocation5], %s233_s17  ;;  %s9104_s30 = scalar_lea.vmem %s10774_s6, 128 }
  0x3c   : > { %v9311_v4 = vld [vmem:[%s9298_s11 + $0xb0] sm:$0xff]  ;;  %8013 = vmatprep.mubr.msk.f32.mxu0 %vm298_vm1, %v9305_v2  ;;  %v9327_v6 = vld [vmem:[%s9298_s11 + $0xc0] sm:$0xff]  ;;  %p9105_p6 = scmp.ne.s32.totalorder %s10774_s6, %s9104_s30  ;;  %p10834_p9 = scmp.ne.s32.totalorder %s10823_s28, 0 }
  0x3d   : > { %8014 = vmatmul.mubr.msk.f32.vlgmr.msra.gmra.mrb[0].mxu0 %vm298_vm1, %v9308_v3  ;;  %v9330_v7 = vld [vmem:[%s9298_s11 + $0xd0] sm:$0xff]  ;;  %v9339_v8 = vld [vmem:[%s9298_s11 + $0xe0] sm:$0xff]  ;;  %s9177_s22 = smov [#allocation6]  }
  0x3e   : > { %8062 = vmatpush3.msk.msra.mxu0 %vm395_vm0, %v279_v1  ;;  %8016 = vmatprep.mubr.msk.f32.mxu0 %vm298_vm1, %v9311_v4  ;;  %v9342_v9 = vld [vmem:[%s9298_s11 + $0xf0] sm:$0xff]  ;;  %v9349_v10 = vld [vmem:[%s9298_s11 + $0x100] sm:$0xff]  ;;  %p9106_p10 = pnand %p9105_p6, %p10834_p9  ;;  %s9108_s12 = sshll.u32 %s9177_s22, 4  ;;  %s9109_s12 = int_to_ptr.vmem [resolvable:$false] %s9108_s12 }
  0x3f   : > { %8111 = vmatprep.subr.msk.mxu0 %vm395_vm0, %v6799_v5  ;;  %v9352_v11 = vld [vmem:[%s9298_s11 + $0x21] sm:$0xff]  ;;  %v9358_v13 = vld [vmem:[%s9298_s11 + $0x31] sm:$0xff]  ;;  %p9111_p2 = scmp.lt.s32.totalorder %s10774_s6, %s9109_s12 }
  0x40   : > { %v9355_v12 = vld [vmem:[%s9298_s11 + $0x1] sm:$0xff]  ;;  %8028 = vmatprep.mubr.msk.f32.mxu1 %vm298_vm1, %v9352_v11  ;;  %v9374_v15 = vld [vmem:[%s9298_s11 + $0x11] sm:$0xff]  ;;  %p9107_p12 = pneg %p9106_p10 }
  0x41   : > { %8017 = vmatmul.mubr.msk.f32.gmra.mrb[2].mxu0 %vm298_vm1, %v9327_v6  ;;  %v9363_v14 = vld [vmem:[%s9298_s11 + $0x41] sm:$0xff]  ;;  %8029 = vmatmul.mubr.msk.f32.vlgmr.msra.gmra.mrb[0].mxu1 %vm298_vm1, %v9358_v13  ;;  %v9378_v17 = vld [vmem:[%s9298_s11 + $0x51] sm:$0xff] }
  0x42   : > { %8019 = vmatprep.mubr.msk.f32.mxu0 %vm298_vm1, %v9330_v7  ;;  %8031 = vmatprep.mubr.msk.f32.mxu1 %vm298_vm1, %v9363_v14  ;;  %v244_v16 = vld [vmem:[%s9298_s11] sm:$0xff]  ;;  %v245_v19 = vld [vmem:[%s9298_s11 + $0x10] sm:$0xff] }
  0x43   : > { %v9381_v18 = vld [vmem:[%s9298_s11 + $0x61] sm:$0xff]  ;;  %v9393_v21 = vld [vmem:[%s9298_s11 + $0x71] sm:$0xff] }
  0x44   : > { %v246_v20 = vld [vmem:[%s9298_s11 + $0x20] sm:$0xff]  ;;  %v247_v22 = vld [vmem:[%s9298_s11 + $0x30] sm:$0xff] }
  0x45   : > { %8020 = vmatmul.mubr.msk.f32.gmra.mrb[4].mxu0 %vm298_vm1, %v9339_v8  ;;  %8032 = vmatmul.mubr.msk.f32.gmra.mrb[2].mxu1 %vm298_vm1, %v9378_v17  ;;  %v9397_v23 = vld [vmem:[%s9298_s11 + $0x1b0] sm:$0xff]  ;;  %v248_v25 = vld [vmem:[%s9298_s11 + $0x40] sm:$0xff] }
  0x46   : > { %8022 = vmatprep.mubr.msk.f32.mxu0 %vm298_vm1, %v9342_v9  ;;  %8034 = vmatprep.mubr.msk.f32.mxu1 %vm298_vm1, %v9381_v18  ;;  %v9409_v26 = vld [vmem:[%s9298_s11 + $0x1c0] sm:$0xff]  ;;  %v9416_v27 = vld [vmem:[%s9298_s11 + $0x1d0] sm:$0xff] }
  0x47   : > { %v249_v28 = vld [vmem:[%s9298_s11 + $0x50] sm:$0xff]  ;;  %v250_v29 = vld [vmem:[%s9298_s11 + $0x60] sm:$0xff] }
  0x48   : > { %v6703_v30 = vld [vmem:[%s9298_s11 + $0x1e0] sm:$0xff]  ;;  %v6704_v31 = vld [vmem:[%s9298_s11 + $0x1f0] sm:$0xff] }
  0x49   : > { %8023 = vmatmul.mubr.msk.f32.gmra.mrb[6].mxu0 %vm298_vm1, %v9349_v10  ;;  %8035 = vmatmul.mubr.msk.f32.gmra.mrb[4].mxu1 %vm298_vm1, %v9393_v21  ;;  %v251_v32 = vld [vmem:[%s9298_s11 + $0x70] sm:$0xff]  ;;  %v6705_v33 = vld [vmem:[%s9298_s11 + $0x200] sm:$0xff] }
  0x4a   : > { %8025 = vmatprep.mubr.msk.f32.mxu0 %vm298_vm1, %v9355_v12  ;;  %8037 = vmatprep.mubr.msk.f32.mxu1 %vm298_vm1, %v9397_v23  ;;  %v6706_v34 = vld [vmem:[%s9298_s11 + $0x210] sm:$0xff]  ;;  %v6707_v35 = vld [vmem:[%s9298_s11 + $0x220] sm:$0xff] }
  0x4b   : > { %v9444_v36 = vld [vmem:[%s9298_s11 + $0x121] sm:$0xff]  ;;  %v9450_v37 = vld [vmem:[%s9298_s11 + $0x131] sm:$0xff] }
  0x4c   : > { %v9457_v38 = vld [vmem:[%s9298_s11 + $0x141] sm:$0xff]  ;;  %v9464_v39 = vld [vmem:[%s9298_s11 + $0x151] sm:$0xff] }
  0x4d   : > { %8026 = vmatmul.mubr.msk.f32.gmra.mrb[8].mxu0 %vm298_vm1, %v9374_v15  ;;  %8038 = vmatmul.mubr.msk.f32.gmra.mrb[6].mxu1 %vm298_vm1, %v9409_v26  ;;  %v9471_v40 = vld [vmem:[%s9298_s11 + $0x161] sm:$0xff]  ;;  %v9481_v42 = vld [vmem:[%s9298_s11 + $0x171] sm:$0xff] }
  0x4e   : > { %8063 = vmatprep.mubr.msk.f32.mxu0 %vm298_vm1, %v244_v16  ;;  %8040 = vmatprep.mubr.msk.f32.mxu1 %vm298_vm1, %v9416_v27  ;;  %v9478_v41 = vld [vmem:[%s9298_s11 + $0x120] sm:$0xff]  ;;  %v9491_v44 = vld [vmem:[%s9298_s11 + $0x130] sm:$0xff] }
  0x4f   : > { %v9488_v43 = vld [vmem:[%s9298_s11 + $0x181] sm:$0xff]  ;;  %v6715_v46 = vld [vmem:[%s9298_s11 + $0x191] sm:$0xff] }
  0x50   : > { %v9498_v45 = vld [vmem:[%s9298_s11 + $0x140] sm:$0xff]  ;;  %v9506_v47 = vld [vmem:[%s9298_s11 + $0x150] sm:$0xff] }
  0x51   : > { %8064 = vmatmul.mubr.msk.f32.vlgmr.msra.gmra.mrb[0].mxu0 %vm298_vm1, %v245_v19  ;;  %8041 = vmatmul.mubr.msk.f32.gmra.mrb[8].mxu1 %vm298_vm1, %v6703_v30  ;;  %v9512_v48 = vld [vmem:[%s9298_s11 + $0x160] sm:$0xff]  ;;  %v9517_v49 = vld [vmem:[%s9298_s11 + $0x170] sm:$0xff] }
  0x52   : > { %8112 = vmatpush3.msk.msra.mxu0 %vm395_vm0, %v6799_v5  ;;  %8066 = vmatprep.mubr.msk.f32.mxu0 %vm298_vm1, %v246_v20  ;;  %v9522_v50 = vld [vmem:[%s9298_s11 + $0x180] sm:$0xff]  ;;  %v9531_v51 = vld [vmem:[%s9298_s11 + $0x190] sm:$0xff] }
  0x53   : > { %8161 = vmatprep.subr.msk.mxu0 %vm395_vm0, %v9402_v24  ;;  %8043 = vmatprep.mubr.msk.f32.mxu1 %vm298_vm1, %v6704_v31  ;;  %v6783_v53 = vld [vmem:[%s9298_s11 + $0x91] sm:$0xff]  ;;  %v9568_v54 = vld [vmem:[%s9298_s11 + $0xa1] sm:$0xff] }
  0x54   : > { %v9573_v55 = vld [vmem:[%s9298_s11 + $0xb1] sm:$0xff]  ;;  %v9577_v56 = vld [vmem:[%s9298_s11 + $0xc1] sm:$0xff] }
  0x55   : > { %8067 = vmatmul.mubr.msk.f32.gmra.mrb[2].mxu0 %vm298_vm1, %v247_v22  ;;  %8044 = vmatmul.mubr.msk.f32.gmra.mrb[10].mxu1 %vm298_vm1, %v6705_v33  ;;  %v9582_v57 = vld [vmem:[%s9298_s11 + $0xd1] sm:$0xff]  ;;  %v9587_v58 = vld [vmem:[%s9298_s11 + $0xe1] sm:$0xff] }
  0x56   : > { %8069 = vmatprep.mubr.msk.f32.mxu0 %vm298_vm1, %v248_v25  ;;  %8046 = vmatprep.mubr.msk.f32.mxu1 %vm298_vm1, %v6706_v34  ;;  %v9592_v59 = vld [vmem:[%s9298_s11 + $0xf1] sm:$0xff]  ;;  %v9597_v60 = vld [vmem:[%s9298_s11 + $0x101] sm:$0xff] }
  0x57   : > { %v9618_v61 = vld [vmem:[%s9298_s11 + $0x1b1] sm:$0xff]  ;;  %v9623_v62 = vld [vmem:[%s9298_s11 + $0x1c1] sm:$0xff] }
  0x58   : > { %v9627_v63 = vld [vmem:[%s9298_s11 + $0x1d1] sm:$0xff]  ;;  %v9632_v0 = vld [vmem:[%s9298_s11 + $0x1e1] sm:$0xff] }
  0x59   : > { %8070 = vmatmul.mubr.msk.f32.gmra.mrb[4].mxu0 %vm298_vm1, %v249_v28  ;;  %8047 = vmatmul.mubr.msk.f32.gmra.mrb[12].mxu1 %vm298_vm1, %v6707_v35  ;;  %v9637_v1 = vld [vmem:[%s9298_s11 + $0x1f1] sm:$0xff]  ;;  %v9744_v19 = vld [vmem:[%s9298_s11 + $0x80] sm:$0xff] }
  0x5a   : > { %8072 = vmatprep.mubr.msk.f32.mxu0 %vm298_vm1, %v250_v29  ;;  %8049 = vmatprep.mubr.msk.f32.mxu1 %vm298_vm1, %v9444_v36  ;;  %v6933_v5 = vld [vmem:[%s10815_s1 + $0x14] sm:$0x7]  ;;  %v9747_v20 = vld [vmem:[%s9298_s11 + $0x60] sm:$0xff] }
  0x5b   : > { %v9729_v16 = vld [vmem:[%s9298_s11 + $0x30] sm:$0xff]  ;;  %v9759_v22 = vld [vmem:[%s9298_s11 + $0xa0] sm:$0xff] }
  0x5c   : > { %v9774_v25 = vld [vmem:[%s9298_s11 + $0xd0] sm:$0xff]  ;;  %v9789_v28 = vld [vmem:[%s9298_s11 + $0x100] sm:$0xff] }
  0x5d   : > { %8073 = vmatmul.mubr.msk.f32.gmra.mrb[6].mxu0 %vm298_vm1, %v251_v32  ;;  %8050 = vmatmul.mubr.msk.f32.gmra.mrb[14].mxu1 %vm298_vm1, %v9450_v37  ;;  %v9794_v29 = vld [vmem:[%s9298_s11 + $0x110] sm:$0xff] }
  0x5e   : > { %8075 = vmatprep.mubr.msk.f32.mxu0 %vm298_vm1, %v9305_v2  ;;  %8052 = vmatprep.mubr.msk.f32.mxu1 %vm298_vm1, %v9457_v38  ;;  %v9642_v2 = vld [vmem:[%s9298_s11 + $0x201] sm:$0xff]  ;;  %v9821_v32 = vld [vmem:[%s9298_s11 + $0x131] sm:$0xff] }
  0x61   : > { %8076 = vmatmul.mubr.msk.f32.gmra.mrb[8].mxu0 %vm298_vm1, %v9308_v3  ;;  %8053 = vmatmul.mubr.msk.f32.gmra.mrb[16].mxu1 %vm298_vm1, %v9464_v39  ;;  %v9647_v3 = vld [vmem:[%s9298_s11 + $0x211] sm:$0xff] }
  0x62   : > { %8078 = vmatprep.mubr.msk.f32.mxu0 %vm298_vm1, %v9311_v4  ;;  %8055 = vmatprep.mubr.msk.f32.mxu1 %vm298_vm1, %v9471_v40  ;;  %v9656_v4 = vld [vmem:[%s9298_s11 + $0x221] sm:$0xff] }
  0x65   : > { %8079 = vmatmul.mubr.msk.f32.gmra.mrb[10].mxu0 %vm298_vm1, %v9327_v6  ;;  %8056 = vmatmul.mubr.msk.f32.gmra.mrb[18].mxu1 %vm298_vm1, %v9481_v42  ;;  %v9030_v6 = vld [vmem:[%s9298_s11 + $0x1b0] sm:$0xff] }
  0x66   : > { %8081 = vmatprep.mubr.msk.f32.mxu0 %vm298_vm1, %v9330_v7  ;;  %8058 = vmatprep.mubr.msk.f32.mxu1 %vm298_vm1, %v9488_v43  ;;  %v9684_v7 = vld [vmem:[%s9298_s11 + $0x1c0] sm:$0xff] }
  0x69   : > { %8082 = vmatmul.mubr.msk.f32.gmra.mrb[12].mxu0 %vm298_vm1, %v9339_v8  ;;  %8059 = vmatmul.mubr.msk.f32.gmra.mrb[20].mxu1 %vm298_vm1, %v6715_v46  ;;  %v9689_v8 = vld [vmem:[%s9298_s11 + $0x1d0] sm:$0xff] }
  0x6a   : > { %8084 = vmatprep.mubr.msk.f32.mxu0 %vm298_vm1, %v9342_v9  ;;  %v9694_v9 = vld [vmem:[%s9298_s11 + $0x1e0] sm:$0xff] }
  0x6d   : > { %8085 = vmatmul.mubr.msk.f32.gmra.mrb[14].mxu0 %vm298_vm1, %v9349_v10  ;;  %v9699_v10 = vld [vmem:[%s9298_s11 + $0x1f0] sm:$0xff] }
  0x6e   : > { %8087 = vmatprep.mubr.msk.f32.mxu0 %vm298_vm1, %v9478_v41 }
  0x71   : > { %8088 = vmatmul.mubr.msk.f32.gmra.mrb[16].mxu0 %vm298_vm1, %v9491_v44 }
  0x72   : > { %8090 = vmatprep.mubr.msk.f32.mxu0 %vm298_vm1, %v9498_v45 }
  0x75   : > { %8091 = vmatmul.mubr.msk.f32.gmra.mrb[18].mxu0 %vm298_vm1, %v9506_v47 }
  0x76   : > { %8093 = vmatprep.mubr.msk.f32.mxu0 %vm298_vm1, %v9512_v48 }
  0x79   : > { %8094 = vmatmul.mubr.msk.f32.gmra.mrb[20].mxu0 %vm298_vm1, %v9517_v49 }
  0x7a   : > { %8096 = vmatprep.mubr.msk.f32.mxu0 %vm298_vm1, %v9522_v50 }
  0x7d   : > { %8097 = vmatmul.mubr.msk.f32.gmra.mrb[22].mxu0 %vm298_vm1, %v9531_v51 }
  0x7e   : > { %8099 = vmatprep.mubr.msk.f32.mxu0 %vm298_vm1, %v9397_v23  ;;  %v9764_v23 = vld [vmem:[%s9298_s11 + $0xb0] sm:$0xff] }
  0x81   : > { %8100 = vmatmul.mubr.msk.f32.gmra.mrb[24].mxu0 %vm298_vm1, %v9409_v26  ;;  %v9779_v26 = vld [vmem:[%s9298_s11 + $0xe0] sm:$0xff] }
  0x82   : > { %8102 = vmatprep.mubr.msk.f32.mxu0 %vm298_vm1, %v9416_v27  ;;  %v9784_v27 = vld [vmem:[%s9298_s11 + $0xf0] sm:$0xff] }
  0x85   : > { %8103 = vmatmul.mubr.msk.f32.gmra.mrb[26].mxu0 %vm298_vm1, %v6703_v30  ;;  %v6983_v30 = vld [vmem:[%s10815_s1 + $0x18] sm:$0x7] }
  0x86   : > { %8105 = vmatprep.mubr.msk.f32.mxu0 %vm298_vm1, %v6704_v31  ;;  %v9052_v31 = vld [vmem:[%s9298_s11 + $0x121] sm:$0xff] }
  0x89   : > { %8106 = vmatmul.mubr.msk.f32.gmra.mrb[28].mxu0 %vm298_vm1, %v6705_v33  ;;  %v9826_v33 = vld [vmem:[%s9298_s11 + $0x141] sm:$0xff] }
  0x8a   : > { %8108 = vmatprep.mubr.msk.f32.mxu0 %vm298_vm1, %v6706_v34  ;;  %v9831_v34 = vld [vmem:[%s9298_s11 + $0x151] sm:$0xff] }
  0x8d   : > { %8109 = vmatmul.mubr.msk.f32.gmra.mrb[30].mxu0 %vm298_vm1, %v6707_v35  ;;  %v9836_v35 = vld [vmem:[%s9298_s11 + $0x161] sm:$0xff] }
  0x8e   : > { %8113 = vmatprep.mubr.msk.f32.mxu0 %vm298_vm1, %v9355_v12  ;;  %v9709_v12 = vld [vmem:[%s9298_s11 + $0x210] sm:$0xff] }
  0x91   : > { %8114 = vmatmul.mubr.msk.f32.vlgmr.msra.gmra.mrb[0].mxu0 %vm298_vm1, %v9374_v15  ;;  %v9724_v15 = vld [vmem:[%s9298_s11 + $0x20] sm:$0xff] }
  0x92   : > { %8162 = vmatpush3.msk.msra.mxu0 %vm395_vm0, %v9402_v24  ;;  %8116 = vmatprep.mubr.msk.f32.mxu0 %vm298_vm1, %v9352_v11  ;;  %v9704_v11 = vld [vmem:[%s9298_s11 + $0x200] sm:$0xff] }
  0x93   : > { %8211 = vmatprep.subr.msk.mxu0 %vm395_vm0, %v6891_v52  ;;  %v9769_v24 = vld [vmem:[%s9298_s11 + $0xc0] sm:$0xff] }
  0x95   : > { %8117 = vmatmul.mubr.msk.f32.gmra.mrb[2].mxu0 %vm298_vm1, %v9358_v13  ;;  %v9714_v13 = vld [vmem:[%s9298_s11 + $0x220] sm:$0xff] }
  0x96   : > { %8119 = vmatprep.mubr.msk.f32.mxu0 %vm298_vm1, %v9363_v14  ;;  %v9719_v14 = vld [vmem:[%s9298_s11 + $0x10] sm:$0xff] }
  0x99   : > { %8120 = vmatmul.mubr.msk.f32.gmra.mrb[4].mxu0 %vm298_vm1, %v9378_v17  ;;  %v9734_v17 = vld [vmem:[%s9298_s11 + $0x40] sm:$0xff] }
  0x9a   : > { %8122 = vmatprep.mubr.msk.f32.mxu0 %vm298_vm1, %v9381_v18  ;;  %v9739_v18 = vld [vmem:[%s9298_s11 + $0x50] sm:$0xff] }
  0x9d   : > { %8123 = vmatmul.mubr.msk.f32.gmra.mrb[6].mxu0 %vm298_vm1, %v9393_v21  ;;  %v9752_v21 = vld [vmem:[%s9298_s11 + $0x70] sm:$0xff] }
  0x9e   : > { %8125 = vmatprep.mubr.msk.f32.mxu0 %vm298_vm1, %v6783_v53  ;;  %v9070_v53 = vld [vmem:[%s9298_s11 + $0x160] sm:$0xff] }
  0xa1   : > { %8126 = vmatmul.mubr.msk.f32.gmra.mrb[8].mxu0 %vm298_vm1, %v9568_v54 }
  0xa2   : > { %8128 = vmatprep.mubr.msk.f32.mxu0 %vm298_vm1, %v9573_v55 }
  0xa5   : > { %8129 = vmatmul.mubr.msk.f32.gmra.mrb[10].mxu0 %vm298_vm1, %v9577_v56 }
  0xa6   : > { %8131 = vmatprep.mubr.msk.f32.mxu0 %vm298_vm1, %v9582_v57 }
  0xa9   : > { %8132 = vmatmul.mubr.msk.f32.gmra.mrb[12].mxu0 %vm298_vm1, %v9587_v58 }
  0xaa   : > { %8134 = vmatprep.mubr.msk.f32.mxu0 %vm298_vm1, %v9592_v59 }
  0xad   : > { %8135 = vmatmul.mubr.msk.f32.gmra.mrb[14].mxu0 %vm298_vm1, %v9597_v60 }
  0xae   : > { %8137 = vmatprep.mubr.msk.f32.mxu0 %vm298_vm1, %v9444_v36  ;;  %v9841_v36 = vld [vmem:[%s9298_s11 + $0x171] sm:$0xff] }
  0xb1   : > { %8138 = vmatmul.mubr.msk.f32.gmra.mrb[16].mxu0 %vm298_vm1, %v9450_v37  ;;  %v9846_v37 = vld [vmem:[%s9298_s11 + $0x181] sm:$0xff] }
  0xb2   : > { %8140 = vmatprep.mubr.msk.f32.mxu0 %vm298_vm1, %v9457_v38  ;;  %v9851_v38 = vld [vmem:[%s9298_s11 + $0x191] sm:$0xff] }
  0xb5   : > { %8141 = vmatmul.mubr.msk.f32.gmra.mrb[18].mxu0 %vm298_vm1, %v9464_v39  ;;  %v9872_v39 = vld [vmem:[%s9298_s11 + $0x11] sm:$0xff] }
  0xb6   : > { %8143 = vmatprep.mubr.msk.f32.mxu0 %vm298_vm1, %v9471_v40  ;;  %v9877_v40 = vld [vmem:[%s9298_s11 + $0x21] sm:$0xff] }
  0xb9   : > { %8144 = vmatmul.mubr.msk.f32.gmra.mrb[20].mxu0 %vm298_vm1, %v9481_v42  ;;  %v9887_v42 = vld [vmem:[%s9298_s11 + $0x41] sm:$0xff] }
  0xba   : > { %8146 = vmatprep.mubr.msk.f32.mxu0 %vm298_vm1, %v9488_v43  ;;  %v9892_v43 = vld [vmem:[%s9298_s11 + $0x51] sm:$0xff] }
  0xbd   : > { %8147 = vmatmul.mubr.msk.f32.gmra.mrb[22].mxu0 %vm298_vm1, %v6715_v46  ;;  %v9907_v46 = vld [vmem:[%s9298_s11 + $0x81] sm:$0xff] }
  0xbe   : > { %8149 = vmatprep.mubr.msk.f32.mxu0 %vm298_vm1, %v9618_v61 }
  0xc1   : > { %8150 = vmatmul.mubr.msk.f32.gmra.mrb[24].mxu0 %vm298_vm1, %v9623_v62 }
  0xc2   : > { %8152 = vmatprep.mubr.msk.f32.mxu0 %vm298_vm1, %v9627_v63 }
  0xc5   : > { %8153 = vmatmul.mubr.msk.f32.gmra.mrb[26].mxu0 %vm298_vm1, %v9632_v0 }
  0xc6   : > { %8155 = vmatprep.mubr.msk.f32.mxu0 %vm298_vm1, %v9637_v1 }
  0xc9   : > { %8156 = vmatmul.mubr.msk.f32.gmra.mrb[28].mxu0 %vm298_vm1, %v9642_v2 }
  0xca   : > { %8158 = vmatprep.mubr.msk.f32.mxu0 %vm298_vm1, %v9647_v3 }
  0xcd   : > { %8159 = vmatmul.mubr.msk.f32.gmra.mrb[30].mxu0 %vm298_vm1, %v9656_v4 }
  0xce   : > { %8163 = vmatprep.mubr.msk.f32.mxu0 %vm298_vm1, %v9478_v41  ;;  %v9882_v41 = vld [vmem:[%s9298_s11 + $0x31] sm:$0xff] }
  0xd1   : > { %8164 = vmatmul.mubr.msk.f32.vlgmr.msra.gmra.mrb[0].mxu0 %vm298_vm1, %v9491_v44  ;;  %v9897_v44 = vld [vmem:[%s9298_s11 + $0x61] sm:$0xff] }
  0xd2   : > { %8212 = vmatpush3.msk.msra.mxu0 %vm395_vm0, %v6891_v52  ;;  %8166 = vmatprep.mubr.msk.f32.mxu0 %vm298_vm1, %v9498_v45  ;;  %v9902_v45 = vld [vmem:[%s9298_s11 + $0x71] sm:$0xff] }
  0xd3   : > { %8261 = vmatprep.subr.msk.mxu0 %vm395_vm0, %v6933_v5  ;;  %v9069_v52 = vld [vmem:[%s9298_s11 + $0x150] sm:$0xff] }
  0xd5   : > { %8167 = vmatmul.mubr.msk.f32.gmra.mrb[2].mxu0 %vm298_vm1, %v9506_v47  ;;  %v7025_v47 = vld [vmem:[%s10815_s1 + $0x1c] sm:$0x7] }
  0xd6   : > { %8169 = vmatprep.mubr.msk.f32.mxu0 %vm298_vm1, %v9512_v48  ;;  %v9978_v48 = vld [vmem:[%s9298_s11 + $0x111] sm:$0xff] }
  0xd9   : > { %8170 = vmatmul.mubr.msk.f32.gmra.mrb[4].mxu0 %vm298_vm1, %v9517_v49  ;;  %v7067_v49 = vld [vmem:[%s10815_s1 + $0x20] sm:$0x7] }
  0xda   : > { %8172 = vmatprep.mubr.msk.f32.mxu0 %vm298_vm1, %v9522_v50  ;;  %v9067_v50 = vld [vmem:[%s9298_s11 + $0x130] sm:$0xff] }
  0xdd   : > { %8173 = vmatmul.mubr.msk.f32.gmra.mrb[6].mxu0 %vm298_vm1, %v9531_v51  ;;  %v9068_v51 = vld [vmem:[%s9298_s11 + $0x140] sm:$0xff] }
  0xde   : > { %8175 = vmatprep.mubr.msk.f32.mxu0 %vm298_vm1, %v9030_v6 }
  0xe1   : > { %8176 = vmatmul.mubr.msk.f32.gmra.mrb[8].mxu0 %vm298_vm1, %v9684_v7 }
  0xe2   : > { %8178 = vmatprep.mubr.msk.f32.mxu0 %vm298_vm1, %v9689_v8 }
  0xe5   : > { %8179 = vmatmul.mubr.msk.f32.gmra.mrb[10].mxu0 %vm298_vm1, %v9694_v9 }
  0xe6   : > { %8181 = vmatprep.mubr.msk.f32.mxu0 %vm298_vm1, %v9699_v10 }
  0xe9   : > { %8182 = vmatmul.mubr.msk.f32.gmra.mrb[12].mxu0 %vm298_vm1, %v9704_v11 }
  0xea   : > { %8184 = vmatprep.mubr.msk.f32.mxu0 %vm298_vm1, %v9709_v12 }
  0xed   : > { %8185 = vmatmul.mubr.msk.f32.gmra.mrb[14].mxu0 %vm298_vm1, %v9714_v13 }
  0xee   : > { %8187 = vmatprep.mubr.msk.f32.mxu0 %vm298_vm1, %v9719_v14 }
  0xf1   : > { %8188 = vmatmul.mubr.msk.f32.gmra.mrb[16].mxu0 %vm298_vm1, %v9724_v15 }
  0xf2   : > { %8190 = vmatprep.mubr.msk.f32.mxu0 %vm298_vm1, %v9729_v16 }
  0xf5   : > { %8191 = vmatmul.mubr.msk.f32.gmra.mrb[18].mxu0 %vm298_vm1, %v9734_v17 }
  0xf6   : > { %8193 = vmatprep.mubr.msk.f32.mxu0 %vm298_vm1, %v9739_v18 }
  0xf9   : > { %8194 = vmatmul.mubr.msk.f32.gmra.mrb[20].mxu0 %vm298_vm1, %v9747_v20 }
  0xfa   : > { %8196 = vmatprep.mubr.msk.f32.mxu0 %vm298_vm1, %v9752_v21 }
  0xfd   : > { %8197 = vmatmul.mubr.msk.f32.gmra.mrb[22].mxu0 %vm298_vm1, %v9744_v19 }
  0xfe   : > { %8199 = vmatprep.mubr.msk.f32.mxu0 %vm298_vm1, %v9759_v22 }
 0x101   : > { %8200 = vmatmul.mubr.msk.f32.gmra.mrb[24].mxu0 %vm298_vm1, %v9764_v23 }
 0x102   : > { %8202 = vmatprep.mubr.msk.f32.mxu0 %vm298_vm1, %v9769_v24 }
 0x105   : > { %8203 = vmatmul.mubr.msk.f32.gmra.mrb[26].mxu0 %vm298_vm1, %v9774_v25 }
 0x106   : > { %8205 = vmatprep.mubr.msk.f32.mxu0 %vm298_vm1, %v9779_v26 }
 0x109   : > { %8206 = vmatmul.mubr.msk.f32.gmra.mrb[28].mxu0 %vm298_vm1, %v9784_v27 }
 0x10a   : > { %8208 = vmatprep.mubr.msk.f32.mxu0 %vm298_vm1, %v9789_v28 }
 0x10d   : > { %8209 = vmatmul.mubr.msk.f32.gmra.mrb[30].mxu0 %vm298_vm1, %v9794_v29 }
 0x10e   : > { %8213 = vmatprep.mubr.msk.f32.mxu0 %vm298_vm1, %v9030_v6  ;;  %v6982_v6 = vld [vmem:[%s9298_s11 + $0x230] sm:$0xff] }
 0x111   : > { %8214 = vmatmul.mubr.msk.f32.vlgmr.msra.gmra.mrb[0].mxu0 %vm298_vm1, %v9684_v7 }
 0x112   : > { %8262 = vmatpush3.msk.msra.mxu0 %vm395_vm0, %v6933_v5  ;;  %8216 = vmatprep.mubr.msk.f32.mxu0 %vm298_vm1, %v9689_v8  ;;  %v6974_v5 = vld [vmem:[%s9298_s11 + $0x1a0] sm:$0xff] }
 0x113   : > { %8311 = vmatprep.subr.msk.mxu0 %vm395_vm0, %v6983_v30 }
 0x115   : > { %8217 = vmatmul.mubr.msk.f32.gmra.mrb[2].mxu0 %vm298_vm1, %v9694_v9 }
 0x116   : > { %8219 = vmatprep.mubr.msk.f32.mxu0 %vm298_vm1, %v9699_v10 }
 0x119   : > { %8220 = vmatmul.mubr.msk.f32.gmra.mrb[4].mxu0 %vm298_vm1, %v9704_v11 }
 0x11a   : > { %8222 = vmatprep.mubr.msk.f32.mxu0 %vm298_vm1, %v9709_v12 }
 0x11d   : > { %8223 = vmatmul.mubr.msk.f32.gmra.mrb[6].mxu0 %vm298_vm1, %v9714_v13 }
 0x11e   : > { %8225 = vmatprep.mubr.msk.f32.mxu0 %vm298_vm1, %v9052_v31 }
 0x121   : > { %8226 = vmatmul.mubr.msk.f32.gmra.mrb[8].mxu0 %vm298_vm1, %v9821_v32 }
 0x122   : > { %8228 = vmatprep.mubr.msk.f32.mxu0 %vm298_vm1, %v9826_v33 }
 0x125   : > { %8229 = vmatmul.mubr.msk.f32.gmra.mrb[10].mxu0 %vm298_vm1, %v9831_v34 }
 0x126   : > { %8231 = vmatprep.mubr.msk.f32.mxu0 %vm298_vm1, %v9836_v35 }
 0x129   : > { %8232 = vmatmul.mubr.msk.f32.gmra.mrb[12].mxu0 %vm298_vm1, %v9841_v36 }
 0x12a   : > { %8234 = vmatprep.mubr.msk.f32.mxu0 %vm298_vm1, %v9846_v37 }
 0x12d   : > { %8235 = vmatmul.mubr.msk.f32.gmra.mrb[14].mxu0 %vm298_vm1, %v9851_v38 }
 0x12e   : > { %8237 = vmatprep.mubr.msk.f32.mxu0 %vm298_vm1, %v9759_v22 }
 0x131   : > { %8238 = vmatmul.mubr.msk.f32.gmra.mrb[16].mxu0 %vm298_vm1, %v9764_v23 }
 0x132   : > { %8240 = vmatprep.mubr.msk.f32.mxu0 %vm298_vm1, %v9769_v24 }
 0x135   : > { %8241 = vmatmul.mubr.msk.f32.gmra.mrb[18].mxu0 %vm298_vm1, %v9774_v25 }
 0x136   : > { %8243 = vmatprep.mubr.msk.f32.mxu0 %vm298_vm1, %v9779_v26 }
 0x139   : > { %8244 = vmatmul.mubr.msk.f32.gmra.mrb[20].mxu0 %vm298_vm1, %v9784_v27 }
 0x13a   : > { %8246 = vmatprep.mubr.msk.f32.mxu0 %vm298_vm1, %v9789_v28 }
 0x13d   : > { %8247 = vmatmul.mubr.msk.f32.gmra.mrb[22].mxu0 %vm298_vm1, %v9794_v29 }
 0x13e   : > { %8249 = vmatprep.mubr.msk.f32.mxu0 %vm298_vm1, %v9872_v39 }
 0x141   : > { %8250 = vmatmul.mubr.msk.f32.gmra.mrb[24].mxu0 %vm298_vm1, %v9877_v40 }
 0x142   : > { %8252 = vmatprep.mubr.msk.f32.mxu0 %vm298_vm1, %v9882_v41 }
 0x145   : > { %8253 = vmatmul.mubr.msk.f32.gmra.mrb[26].mxu0 %vm298_vm1, %v9887_v42 }
 0x146   : > { %8255 = vmatprep.mubr.msk.f32.mxu0 %vm298_vm1, %v9892_v43 }
 0x149   : > { %8256 = vmatmul.mubr.msk.f32.gmra.mrb[28].mxu0 %vm298_vm1, %v9897_v44 }
 0x14a   : > { %8258 = vmatprep.mubr.msk.f32.mxu0 %vm298_vm1, %v9902_v45 }
 0x14d   : > { %8259 = vmatmul.mubr.msk.f32.gmra.mrb[30].mxu0 %vm298_vm1, %v9907_v46 }
 0x14e   : > { %8263 = vmatprep.mubr.msk.f32.mxu0 %vm298_vm1, %v9052_v31 }
 0x151   : > { %8264 = vmatmul.mubr.msk.f32.vlgmr.msra.gmra.mrb[0].mxu0 %vm298_vm1, %v9821_v32 }
 0x152   : > { %8312 = vmatpush3.msk.msra.mxu0 %vm395_vm0, %v6983_v30  ;;  %8266 = vmatprep.mubr.msk.f32.mxu0 %vm298_vm1, %v9826_v33  ;;  %v8779_v30 = vld [vmem:[#allocation3 + $0x10] sm:$0xff]  }
 0x153   : > { %8361 = vmatprep.subr.msk.mxu0 %vm395_vm0, %v7025_v47 }
 0x155   : > { %8267 = vmatmul.mubr.msk.f32.gmra.mrb[2].mxu0 %vm298_vm1, %v9831_v34 }
 0x156   : > { %8269 = vmatprep.mubr.msk.f32.mxu0 %vm298_vm1, %v9836_v35 }
 0x159   : > { %8270 = vmatmul.mubr.msk.f32.gmra.mrb[4].mxu0 %vm298_vm1, %v9841_v36 }
 0x15a   : > { %8272 = vmatprep.mubr.msk.f32.mxu0 %vm298_vm1, %v9846_v37 }
 0x15d   : > { %8273 = vmatmul.mubr.msk.f32.gmra.mrb[6].mxu0 %vm298_vm1, %v9851_v38 }
 0x15e   : > { %8275 = vmatprep.mubr.msk.f32.mxu0 %vm298_vm1, %v9618_v61  ;;  %v9073_v61 = vld [vmem:[%s9298_s11 + $0x190] sm:$0xff] }
 0x161   : > { %8276 = vmatmul.mubr.msk.f32.gmra.mrb[8].mxu0 %vm298_vm1, %v9623_v62 }
 0x162   : > { %8278 = vmatprep.mubr.msk.f32.mxu0 %vm298_vm1, %v9627_v63 }
 0x165   : > { %8279 = vmatmul.mubr.msk.f32.gmra.mrb[10].mxu0 %vm298_vm1, %v9632_v0 }
 0x166   : > { %8281 = vmatprep.mubr.msk.f32.mxu0 %vm298_vm1, %v9637_v1 }
 0x169   : > { %8282 = vmatmul.mubr.msk.f32.gmra.mrb[12].mxu0 %vm298_vm1, %v9642_v2 }
 0x16a   : > { %8284 = vmatprep.mubr.msk.f32.mxu0 %vm298_vm1, %v9647_v3 }
 0x16d   : > { %8285 = vmatmul.mubr.msk.f32.gmra.mrb[14].mxu0 %vm298_vm1, %v9656_v4 }
 0x16e   : > { %8287 = vmatprep.mubr.msk.f32.mxu0 %vm298_vm1, %v9872_v39 }
 0x171   : > { %8288 = vmatmul.mubr.msk.f32.gmra.mrb[16].mxu0 %vm298_vm1, %v9877_v40 }
 0x172   : > { %8290 = vmatprep.mubr.msk.f32.mxu0 %vm298_vm1, %v9882_v41 }
 0x175   : > { %8291 = vmatmul.mubr.msk.f32.gmra.mrb[18].mxu0 %vm298_vm1, %v9887_v42 }
 0x176   : > { %8293 = vmatprep.mubr.msk.f32.mxu0 %vm298_vm1, %v9892_v43 }
 0x179   : > { %8294 = vmatmul.mubr.msk.f32.gmra.mrb[20].mxu0 %vm298_vm1, %v9897_v44 }
 0x17a   : > { %8296 = vmatprep.mubr.msk.f32.mxu0 %vm298_vm1, %v9902_v45 }
 0x17d   : > { %8297 = vmatmul.mubr.msk.f32.gmra.mrb[22].mxu0 %vm298_vm1, %v9907_v46 }
 0x17e   : > { %8299 = vmatprep.mubr.msk.f32.mxu0 %vm298_vm1, %v9568_v54  ;;  %v9071_v54 = vld [vmem:[%s9298_s11 + $0x170] sm:$0xff] }
 0x181   : > { %8300 = vmatmul.mubr.msk.f32.gmra.mrb[24].mxu0 %vm298_vm1, %v9573_v55  ;;  %v9072_v55 = vld [vmem:[%s9298_s11 + $0x180] sm:$0xff] }
 0x182   : > { %8302 = vmatprep.mubr.msk.f32.mxu0 %vm298_vm1, %v9577_v56 }
 0x185   : > { %8303 = vmatmul.mubr.msk.f32.gmra.mrb[26].mxu0 %vm298_vm1, %v9582_v57 }
 0x186   : > { %8305 = vmatprep.mubr.msk.f32.mxu0 %vm298_vm1, %v9587_v58 }
 0x189   : > { %8306 = vmatmul.mubr.msk.f32.gmra.mrb[28].mxu0 %vm298_vm1, %v9592_v59 }
 0x18a   : > { %8308 = vmatprep.mubr.msk.f32.mxu0 %vm298_vm1, %v9597_v60 }
 0x18d   : > { %8309 = vmatmul.mubr.msk.f32.gmra.mrb[30].mxu0 %vm298_vm1, %v9978_v48 }
 0x18e   : > { %8313 = vmatprep.mubr.msk.f32.mxu0 %vm298_vm1, %v9719_v14 }
 0x191   : > { %8314 = vmatmul.mubr.msk.f32.vlgmr.msra.gmra.mrb[0].mxu0 %vm298_vm1, %v9724_v15 }
 0x192   : > { %8362 = vmatpush3.msk.msra.mxu0 %vm395_vm0, %v7025_v47  ;;  %8316 = vmatprep.mubr.msk.f32.mxu0 %vm298_vm1, %v9729_v16 }
 0x193   : > { %8411 = vmatprep.subr.msk.mxu0 %vm395_vm0, %v7067_v49 }
 0x195   : > { %8317 = vmatmul.mubr.msk.f32.gmra.mrb[2].mxu0 %vm298_vm1, %v9734_v17 }
 0x196   : > { %8319 = vmatprep.mubr.msk.f32.mxu0 %vm298_vm1, %v9739_v18 }
 0x199   : > { %8320 = vmatmul.mubr.msk.f32.gmra.mrb[4].mxu0 %vm298_vm1, %v9747_v20 }
 0x19a   : > { %8322 = vmatprep.mubr.msk.f32.mxu0 %vm298_vm1, %v9752_v21 }
 0x19d   : > { %8323 = vmatmul.mubr.msk.f32.gmra.mrb[6].mxu0 %vm298_vm1, %v9744_v19 }
 0x19e   : > { %8325 = vmatprep.mubr.msk.f32.mxu0 %vm298_vm1, %v9759_v22 }
 0x1a1   : > { %8326 = vmatmul.mubr.msk.f32.gmra.mrb[8].mxu0 %vm298_vm1, %v9764_v23 }
 0x1a2   : > { %8328 = vmatprep.mubr.msk.f32.mxu0 %vm298_vm1, %v9769_v24 }
 0x1a5   : > { %8329 = vmatmul.mubr.msk.f32.gmra.mrb[10].mxu0 %vm298_vm1, %v9774_v25 }
 0x1a6   : > { %8331 = vmatprep.mubr.msk.f32.mxu0 %vm298_vm1, %v9779_v26 }
 0x1a9   : > { %8332 = vmatmul.mubr.msk.f32.gmra.mrb[12].mxu0 %vm298_vm1, %v9784_v27 }
 0x1aa   : > { %8334 = vmatprep.mubr.msk.f32.mxu0 %vm298_vm1, %v9789_v28 }
 0x1ad   : > { %8335 = vmatmul.mubr.msk.f32.gmra.mrb[14].mxu0 %vm298_vm1, %v9794_v29 }
 0x1ae   : > { %8337 = vmatprep.mubr.msk.f32.mxu0 %vm298_vm1, %v9067_v50 }
 0x1b1   : > { %8338 = vmatmul.mubr.msk.f32.gmra.mrb[16].mxu0 %vm298_vm1, %v9068_v51 }
 0x1b2   : > { %8340 = vmatprep.mubr.msk.f32.mxu0 %vm298_vm1, %v9069_v52 }
 0x1b5   : > { %8341 = vmatmul.mubr.msk.f32.gmra.mrb[18].mxu0 %vm298_vm1, %v9070_v53 }
 0x1b6   : > { %8343 = vmatprep.mubr.msk.f32.mxu0 %vm298_vm1, %v9071_v54 }
 0x1b9   : > { %8344 = vmatmul.mubr.msk.f32.gmra.mrb[20].mxu0 %vm298_vm1, %v9072_v55 }
 0x1ba   : > { %8346 = vmatprep.mubr.msk.f32.mxu0 %vm298_vm1, %v9073_v61 }
 0x1bd   : > { %8347 = vmatmul.mubr.msk.f32.gmra.mrb[22].mxu0 %vm298_vm1, %v6974_v5 }
 0x1be   : > { %8349 = vmatprep.mubr.msk.f32.mxu0 %vm298_vm1, %v9684_v7 }
 0x1c1   : > { %8350 = vmatmul.mubr.msk.f32.gmra.mrb[24].mxu0 %vm298_vm1, %v9689_v8 }
 0x1c2   : > { %8352 = vmatprep.mubr.msk.f32.mxu0 %vm298_vm1, %v9694_v9 }
 0x1c5   : > { %8353 = vmatmul.mubr.msk.f32.gmra.mrb[26].mxu0 %vm298_vm1, %v9699_v10 }
 0x1c6   : > { %8355 = vmatprep.mubr.msk.f32.mxu0 %vm298_vm1, %v9704_v11 }
 0x1c9   : > { %8356 = vmatmul.mubr.msk.f32.gmra.mrb[28].mxu0 %vm298_vm1, %v9709_v12 }
 0x1ca   : > { %8358 = vmatprep.mubr.msk.f32.mxu0 %vm298_vm1, %v9714_v13 }
 0x1cd   : > { %8359 = vmatmul.mubr.msk.f32.gmra.mrb[30].mxu0 %vm298_vm1, %v6982_v6 }
 0x1ce   : > { %8363 = vmatprep.mubr.msk.f32.mxu0 %vm298_vm1, %v9759_v22  ;;  %v8774_v22 = vld [vmem:[#allocation3 + $0x40] sm:$0xff]  }
 0x1cf   : > { %7659 = vmatprep.subr.bf16.mxu1 %v8774_v22 }
 0x1d1   : > { %8364 = vmatmul.mubr.msk.f32.vlgmr.msra.gmra.mrb[0].mxu0 %vm298_vm1, %v9764_v23  ;;  %v8775_v23 = vld [vmem:[#allocation3] sm:$0xff]  }
 0x1d2   : > { %8412 = vmatpush3.msk.msra.mxu0 %vm395_vm0, %v7067_v49  ;;  %8366 = vmatprep.mubr.msk.f32.mxu0 %vm298_vm1, %v9769_v24  ;;  %v8776_v24 = vld [vmem:[#allocation3 + $0x48] sm:$0xff]  }
 0x1d3   : > { %7660 = vmatpush3.bf16.msra.mxu1 %v8775_v23 }
 0x1d4   : > { %7661 = vmatprep.subr.bf16.mxu1 %v8776_v24  ;;  %v9175_v24 = vmov 1966171168  }
 0x1d5   : > { %8367 = vmatmul.mubr.msk.f32.gmra.mrb[2].mxu0 %vm298_vm1, %v9774_v25 }
 0x1d6   : > { %8369 = vmatprep.mubr.msk.f32.mxu0 %vm298_vm1, %v9779_v26  ;;  %v8777_v26 = vld [vmem:[#allocation3 + $0x8] sm:$0xff]  }
 0x1d7   : > { %7662 = vmatpush3.bf16.msra.mxu1 %v8777_v26 }
 0x1d9   : > { %8370 = vmatmul.mubr.msk.f32.gmra.mrb[4].mxu0 %vm298_vm1, %v9784_v27 }
 0x1da   : > { %8372 = vmatprep.mubr.msk.f32.mxu0 %vm298_vm1, %v9789_v28  ;;  %v8778_v28 = vld [vmem:[#allocation3 + $0x50] sm:$0xff]  }
 0x1db   : > { %7663 = vmatprep.subr.bf16.mxu1 %v8778_v28 }
 0x1dc   : > { %7664 = vmatpush3.bf16.msra.mxu1 %v8779_v30 }
 0x1dd   : > { %8373 = vmatmul.mubr.msk.f32.gmra.mrb[6].mxu0 %vm298_vm1, %v9794_v29 }
 0x1de   : > { %8375 = vmatprep.mubr.msk.f32.mxu0 %vm298_vm1, %v9872_v39 }
 0x1e1   : > { %8376 = vmatmul.mubr.msk.f32.gmra.mrb[8].mxu0 %vm298_vm1, %v9877_v40 }
 0x1e2   : > { %8378 = vmatprep.mubr.msk.f32.mxu0 %vm298_vm1, %v9882_v41 }
 0x1e5   : > { %8379 = vmatmul.mubr.msk.f32.gmra.mrb[10].mxu0 %vm298_vm1, %v9887_v42 }
 0x1e6   : > { %8381 = vmatprep.mubr.msk.f32.mxu0 %vm298_vm1, %v9892_v43 }
 0x1e9   : > { %8382 = vmatmul.mubr.msk.f32.gmra.mrb[12].mxu0 %vm298_vm1, %v9897_v44 }
 0x1ea   : > { %8384 = vmatprep.mubr.msk.f32.mxu0 %vm298_vm1, %v9902_v45 }
 0x1ed   : > { %8385 = vmatmul.mubr.msk.f32.gmra.mrb[14].mxu0 %vm298_vm1, %v9907_v46 }
 0x1ee   : > { %8387 = vmatprep.mubr.msk.f32.mxu0 %vm298_vm1, %v9684_v7  ;;  %v7024_v7 = vld [vmem:[%s9298_s11 + $0x1a1] sm:$0xff] }
 0x1f1   : > { %8388 = vmatmul.mubr.msk.f32.gmra.mrb[16].mxu0 %vm298_vm1, %v9689_v8  ;;  %v9074_v8 = vld [vmem:[%s9298_s11 + $0xa1] sm:$0xff] }
 0x1f2   : > { %8390 = vmatprep.mubr.msk.f32.mxu0 %vm298_vm1, %v9694_v9  ;;  %v9075_v9 = vld [vmem:[%s9298_s11 + $0xb1] sm:$0xff] }
 0x1f5   : > { %8391 = vmatmul.mubr.msk.f32.gmra.mrb[18].mxu0 %vm298_vm1, %v9699_v10 }
 0x1f6   : > { %8393 = vmatprep.mubr.msk.f32.mxu0 %vm298_vm1, %v9704_v11 }
 0x1f9   : > { %8394 = vmatmul.mubr.msk.f32.gmra.mrb[20].mxu0 %vm298_vm1, %v9709_v12 }
 0x1fa   : > { %8396 = vmatprep.mubr.msk.f32.mxu0 %vm298_vm1, %v9714_v13 }
 0x1fd   : > { %8397 = vmatmul.mubr.msk.f32.gmra.mrb[22].mxu0 %vm298_vm1, %v6982_v6 }
 0x1fe   : > { %8399 = vmatprep.mubr.msk.f32.mxu0 %vm298_vm1, %v9821_v32 }
 0x201   : > { %8400 = vmatmul.mubr.msk.f32.gmra.mrb[24].mxu0 %vm298_vm1, %v9826_v33 }
 0x202   : > { %8402 = vmatprep.mubr.msk.f32.mxu0 %vm298_vm1, %v9831_v34 }
 0x205   : > { %8403 = vmatmul.mubr.msk.f32.gmra.mrb[26].mxu0 %vm298_vm1, %v9836_v35 }
 0x206   : > { %8405 = vmatprep.mubr.msk.f32.mxu0 %vm298_vm1, %v9841_v36 }
 0x209   : > { %8406 = vmatmul.mubr.msk.f32.gmra.mrb[28].mxu0 %vm298_vm1, %v9846_v37 }
 0x20a   : > { %8408 = vmatprep.mubr.msk.f32.mxu0 %vm298_vm1, %v9851_v38 }
 0x20d   : > { %8409 = vmatmul.mubr.msk.f32.gmra.mrb[30].mxu0 %vm298_vm1, %v7024_v7 }
 0x20e   : > { %8413 = vmatprep.mubr.msk.f32.mxu0 %vm298_vm1, %v9872_v39 }
 0x211   : > { %8414 = vmatmul.mubr.msk.f32.vlgmr.msra.gmra.mrb[0].mxu0 %vm298_vm1, %v9877_v40 }
 0x212   : > { %8416 = vmatprep.mubr.msk.f32.mxu0 %vm298_vm1, %v9882_v41 }
 0x215   : > { %8417 = vmatmul.mubr.msk.f32.gmra.mrb[2].mxu0 %vm298_vm1, %v9887_v42 }
 0x216   : > { %8419 = vmatprep.mubr.msk.f32.mxu0 %vm298_vm1, %v9892_v43 }
 0x219   : > { %8420 = vmatmul.mubr.msk.f32.gmra.mrb[4].mxu0 %vm298_vm1, %v9897_v44 }
 0x21a   : > { %8422 = vmatprep.mubr.msk.f32.mxu0 %vm298_vm1, %v9902_v45 }
 0x21d   : > { %8423 = vmatmul.mubr.msk.f32.gmra.mrb[6].mxu0 %vm298_vm1, %v9907_v46 }
 0x21e   : > { %8425 = vmatprep.mubr.msk.f32.mxu0 %vm298_vm1, %v9074_v8 }
 0x221   : > { %8426 = vmatmul.mubr.msk.f32.gmra.mrb[8].mxu0 %vm298_vm1, %v9075_v9 }
 0x222   : > { %8428 = vmatprep.mubr.msk.f32.mxu0 %vm298_vm1, %v9577_v56  ;;  %v7066_v56 = vld [vmem:[%s9298_s11 + $0x231] sm:$0xff]  ;;  %s9110_s11 = scalar_lea.vmem %s9109_s12, 256 }
 0x223   : > { %p9112_p3 = scmp.lt.s32.totalorder %s9110_s11, %s9104_s30 }
 0x225   : > { %8429 = vmatmul.mubr.msk.f32.gmra.mrb[10].mxu0 %vm298_vm1, %v9582_v57  ;;  %v8030_v57 = vpop.f32.mrb[0].mxu1  ;;  %p9113_p4 = por %p9112_p3, %p9111_p2 }
 0x226   : > { %8431 = vmatprep.mubr.msk.f32.mxu0 %vm298_vm1, %v9587_v58  ;;  %v515_v58 = vpop.f32.mrb[1].mxu1 }
 0x227   : > { %p9114_p7 = pnand %p9113_p4, %p9107_p12 }
 0x229   : > { %8432 = vmatmul.mubr.msk.f32.gmra.mrb[12].mxu0 %vm298_vm1, %v9592_v59  ;;  %v8033_v59 = vpop.f32.mrb[2].mxu1 }
 0x22a   : > { %8434 = vmatprep.mubr.msk.f32.mxu0 %vm298_vm1, %v9597_v60  ;;  %v525_v60 = vpop.f32.mrb[3].mxu1 }
 0x22d   : > { %8435 = vmatmul.mubr.msk.f32.gmra.mrb[14].mxu0 %vm298_vm1, %v9978_v48 }
 0x22e   : > { %8437 = vmatprep.mubr.msk.f32.mxu0 %vm298_vm1, %v9821_v32 }
 0x231   : > { %8438 = vmatmul.mubr.msk.f32.gmra.mrb[16].mxu0 %vm298_vm1, %v9826_v33 }
 0x232   : > { %8440 = vmatprep.mubr.msk.f32.mxu0 %vm298_vm1, %v9831_v34 }
 0x235   : > { %8441 = vmatmul.mubr.msk.f32.gmra.mrb[18].mxu0 %vm298_vm1, %v9836_v35 }
 0x236   : > { %8443 = vmatprep.mubr.msk.f32.mxu0 %vm298_vm1, %v9841_v36 }
 0x239   : > { %8444 = vmatmul.mubr.msk.f32.gmra.mrb[20].mxu0 %vm298_vm1, %v9846_v37 }
 0x23a   : > { %8446 = vmatprep.mubr.msk.f32.mxu0 %vm298_vm1, %v9851_v38 }
 0x23d   : > { %8447 = vmatmul.mubr.msk.f32.gmra.mrb[22].mxu0 %vm298_vm1, %v7024_v7 }
 0x23e   : > { %8449 = vmatprep.mubr.msk.f32.mxu0 %vm298_vm1, %v9623_v62  ;;  %v8036_v62 = vpop.f32.mrb[4].mxu1 }
 0x241   : > { %8450 = vmatmul.mubr.msk.f32.gmra.mrb[24].mxu0 %vm298_vm1, %v9627_v63  ;;  %v535_v63 = vpop.f32.mrb[5].mxu1 }
 0x242   : > { %8452 = vmatprep.mubr.msk.f32.mxu0 %vm298_vm1, %v9632_v0  ;;  %v8039_v0 = vpop.f32.mrb[6].mxu1 }
 0x245   : > { %8453 = vmatmul.mubr.msk.f32.gmra.mrb[26].mxu0 %vm298_vm1, %v9637_v1  ;;  %v545_v1 = vpop.f32.mrb[7].mxu1 }
 0x246   : > { %8455 = vmatprep.mubr.msk.f32.mxu0 %vm298_vm1, %v9642_v2  ;;  %v8042_v10 = vpop.f32.mrb[8].mxu1 }
 0x247   : > { %v555_v11 = vpop.f32.mrb[9].mxu1 }
 0x248   : > { %v10178_v2 = vpop.f32.mrb[10].mxu1 }
 0x249   : > { %8456 = vmatmul.mubr.msk.f32.gmra.mrb[28].mxu0 %vm298_vm1, %v9647_v3  ;;  %v10180_v12 = vpop.f32.mrb[11].mxu1 }
 0x24a   : > { %8458 = vmatprep.mubr.msk.f32.mxu0 %vm298_vm1, %v9656_v4  ;;  %v10182_v3 = vpop.f32.mrb[12].mxu1 }
 0x24b   : > { %v10184_v4 = vpop.f32.mrb[13].mxu1 }
 0x24c   : > { %v10186_v13 = vpop.f32.mrb[14].mxu1 }
 0x24d   : > { %8459 = vmatmul.mubr.msk.f32.gmra.mrb[30].mxu0 %vm298_vm1, %v7066_v56  ;;  %v10188_v14 = vpop.f32.mrb[15].mxu1 }
 0x24e   : > { %v10190_v15 = vpop.f32.mrb[16].mxu1 }
 0x24f   : > { %v10192_v16 = vpop.f32.mrb[17].mxu1 }
 0x250   : > { %v10194_v17 = vpop.f32.mrb[18].mxu1 }
 0x251   : > { %v10196_v18 = vpop.f32.mrb[19].mxu1 }
 0x252   : > { %v10198_v19 = vpop.f32.mrb[20].mxu1 }
 0x253   : > { %v10200_v20 = vpop.f32.mrb[21].mxu1 }
 0x2e4   : > { %v10202_v21 = vpop.f32.mrb[0].mxu0 }
 0x2e5   : > { %v10204_v25 = vpop.f32.mrb[1].mxu0 }
 0x2e8   : > { %v10206_v27 = vpop.f32.mrb[2].mxu0 }
 0x2e9   : > { %v10208_v29 = vpop.f32.mrb[3].mxu0 }
 0x2ec   : > { %v10210_v31 = vpop.f32.mrb[4].mxu0 }
 0x2ed   : > { %v10212_v32 = vpop.f32.mrb[5].mxu0 }
 0x2f0   : > { %v10214_v33 = vpop.f32.mrb[6].mxu0 }
 0x2f1   : > { %v10216_v34 = vpop.f32.mrb[7].mxu0 }
 0x2f4   : > { %v8427_v35 = vpop.f32.mrb[8].mxu0 }
 0x2f5   : > { %v3059_v36 = vmax.f32 %v10202_v21, %v8427_v35  ;;  %v2907_v37 = vpop.f32.mrb[9].mxu0  ;;  %v8780_v35 = vld [vmem:[#allocation3 + $0x58] sm:$0xff]  }
 0x2f6   : > { %v3058_v38 = vmax.f32 %v10204_v25, %v2907_v37  ;;  %v8781_v37 = vld [vmem:[#allocation3 + $0x18] sm:$0xff]   ;;  %7665 = vmatprep.subr.bf16.mxu1 %v8780_v35 }
 0x2f7   : > { %7666 = vmatpush3.bf16.msra.mxu1 %v8781_v37 }
 0x2f8   : > { %v8430_v39 = vpop.f32.mrb[10].mxu0 }
 0x2f9   : > { %v10220_v40 = vadd.f32 %v8430_v39, %v8030_v57  ;;  %v2917_v41 = vpop.f32.mrb[11].mxu0 }
 0x2fa   : > { %v10222_v42 = vadd.f32 %v2917_v41, %v515_v58 }
 0x2fb   : > { %v3061_v43 = vmax.f32 %v10206_v27, %v10220_v40 }
 0x2fc   : > { %v3060_v44 = vmax.f32 %v10208_v29, %v10222_v42  ;;  %v8433_v45 = vpop.f32.mrb[12].mxu0 }
 0x2fd   : > { %v10228_v46 = vadd.f32 %v8433_v45, %v8033_v59  ;;  %v2927_v47 = vpop.f32.mrb[13].mxu0 }
 0x2fe   : > { %v10230_v48 = vadd.f32 %v2927_v47, %v525_v60 }
 0x2ff   : > { %v3063_v49 = vmax.f32 %v10210_v31, %v10228_v46 }
 0x300   : > { %v3062_v50 = vmax.f32 %v10212_v32, %v10230_v48  ;;  %v8436_v51 = vpop.f32.mrb[14].mxu0 }
 0x301   : > { %v10236_v52 = vadd.f32 %v8436_v51, %v8036_v62  ;;  %v2937_v53 = vpop.f32.mrb[15].mxu0 }
 0x302   : > { %v10238_v54 = vadd.f32 %v2937_v53, %v535_v63 }
 0x303   : > { %v3065_v55 = vmax.f32 %v10214_v33, %v10236_v52 }
 0x304   : > { %v3064_v61 = vmax.f32 %v10216_v34, %v10238_v54  ;;  %v8439_v5 = vpop.f32.mrb[16].mxu0 }
 0x305   : > { %v8469_v6 = vadd.f32 %v8439_v5, %v8039_v0  ;;  %v2947_v7 = vpop.f32.mrb[17].mxu0 }
 0x306   : > { %v8470_v8 = vadd.f32 %v2947_v7, %v545_v1  ;;  %v3105_v1 = vlaneseq }
 0x308   : > { %v8442_v9 = vpop.f32.mrb[18].mxu0  ;;  %v10257_v28 = vshrl.u32 %v3105_v1, 7  ;;  %vm10272_vm2 = vcmp.lt.s32.totalorder %v3105_v1, 64  ;;  %vm3136_vm3 = vcmp.ge.s32.totalorder %v3105_v1, 64  ;;  %vm3137_vm4 = vcmp.lt.s32.totalorder %v3105_v1, 128 }
 0x309   : > { %v8471_v56 = vadd.f32 %v8442_v9, %v8042_v10  ;;  %v2957_v57 = vpop.f32.mrb[19].mxu0  ;;  %v3112_v10 = vunpack.c.l.s4 %v9175_v24  ;;  %vm10551_vm5 = vmand %vm3136_vm3, %vm3137_vm4 }
 0x30a   : > { %v8472_v58 = vadd.f32 %v2957_v57, %v555_v11 }
 0x30c   : > { %v8445_v59 = vpop.f32.mrb[20].mxu0 }
 0x30d   : > { %v8473_v60 = vadd.f32 %v8445_v59, %v10178_v2  ;;  %v2967_v62 = vpop.f32.mrb[21].mxu0 }
 0x30e   : > { %v10246_v63 = vadd.f32 %v2967_v62, %v10180_v12  ;;  %v3113_v12 = vunpack.c.0.s8 %v3112_v10 }
 0x310   : > { %v8448_v21 = vpop.f32.mrb[22].mxu0  ;;  %v10268_v51 = vsub.s32 %v3113_v12, %v10257_v28 }
 0x311   : > { %v10249_v22 = vadd.f32 %v8448_v21, %v10182_v3  ;;  %v2977_v23 = vpop.f32.mrb[23].mxu0  ;;  %v10262_v3 = vld [vmem:[%s10816_s2] ss:$0 sm:$0xff] }
 0x312   : > { %v10252_v0 = vadd.f32 %v2977_v23, %v10184_v4 }
 0x314   : > { %v8451_v25 = vpop.f32.mrb[24].mxu0 }
 0x315   : > { %v8477_v11 = vadd.f32 %v8451_v25, %v10186_v13  ;;  %v2987_v26 = vpop.f32.mrb[25].mxu0 }
 0x316   : > { %v8478_v2 = vadd.f32 %v2987_v26, %v10188_v14 }
 0x317   : > { %v3067_v27 = vmax.f32 %v8469_v6, %v8477_v11 }
 0x318   : > { %v3066_v4 = vmax.f32 %v8470_v8, %v8478_v2  ;;  %v8454_v30 = vpop.f32.mrb[26].mxu0 }
 0x319   : > { %v3075_v39 = vmax.f32 %v3059_v36, %v3067_v27  ;;  %v8479_v13 = vadd.f32 %v8454_v30, %v10190_v15  ;;  %v2997_v40 = vpop.f32.mrb[27].mxu0  ;;  %v8782_v15 = vld [vmem:[#allocation3 + $0x60] sm:$0xff]  }
 0x31a   : > { %v3074_v41 = vmax.f32 %v3058_v38, %v3066_v4  ;;  %v8480_v14 = vadd.f32 %v2997_v40, %v10192_v16  ;;  %7667 = vmatprep.subr.bf16.mxu1 %v8782_v15 }
 0x31b   : > { %v3090_v45 = vadd.f32 %v10262_v3, %v3075_v39  ;;  %v3069_v47 = vmax.f32 %v8471_v56, %v8479_v13 }
 0x31c   : > { %v3089_v53 = vadd.f32 %v10262_v3, %v3074_v41  ;;  %v3068_v5 = vmax.f32 %v8472_v58, %v8480_v14  ;;  %v8457_v6 = vpop.f32.mrb[28].mxu0  ;;  %v8786_v41 = vld [vmem:[#allocation3 + $0x70] sm:$0xff]  }
 0x31d   : > { %v3098_v38 = vmax.f32 %v3090_v45, 0.0  ;;  %v3077_v16 = vmax.f32 %v3061_v43, %v3069_v47  ;;  %v8481_v7 = vadd.f32 %v8457_v6, %v10194_v17  ;;  %v3007_v8 = vpop.f32.mrb[29].mxu0  ;;  %v8783_v43 = vld [vmem:[#allocation3 + $0x20] sm:$0xff]   ;;  %v8787_v14 = vld [vmem:[#allocation3 + $0x30] sm:$0xff]  }
 0x31e   : > { %v3097_v9 = vmax.f32 %v3089_v53, 0.0  ;;  %v3076_v56 = vmax.f32 %v3060_v44, %v3068_v5  ;;  %v8482_v57 = vadd.f32 %v3007_v8, %v10196_v18  ;;  %7668 = vmatpush3.bf16.msra.mxu1 %v8783_v43 }
 0x31f   : > { %v3092_v58 = vadd.f32 %v10262_v3, %v3077_v16  ;;  %v3071_v59 = vmax.f32 %v8473_v60, %v8481_v7  ;;  %v3193_v62 = vrot.slane %v3098_v38, %v10268_v51  ;;  %v3221_v21 = vcombine.high %v3098_v38, %v3098_v38  ;;  %3185 = vst.msk [vmem:[#allocation2 + $0x4] sm:$0x1] %vm10272_vm2, %v3098_v38 }
 0x320   : > { %v3091_v17 = vadd.f32 %v10262_v3, %v3076_v56  ;;  %v3070_v23 = vmax.f32 %v10246_v63, %v8482_v57  ;;  %v8460_v24 = vpop.f32.mrb[30].mxu0  ;;  %v3117_v29 = vrot.slane %v3097_v9, %v10268_v51  ;;  %v3148_v42 = vcombine.high %v3097_v9, %v3097_v9  ;;  %3109 = vst.msk [vmem:[#allocation2] sm:$0x1] %vm10272_vm2, %v3097_v9 }
 0x321   : > { %v10290_v18 = vmax.f32 %v3092_v58, 0.0  ;;  %v3079_v44 = vmax.f32 %v3063_v49, %v3071_v59  ;;  %v8483_v60 = vadd.f32 %v8460_v24, %v10198_v19  ;;  %v3017_v10 = vpop.f32.mrb[31].mxu0  ;;  %v3194_v25 = vcombine.high %v3193_v62, %v3193_v62  ;;  %v8784_v49 = vld [vmem:[#allocation3 + $0x68] sm:$0xff]  }
 0x322   : > { %v10296_v11 = vmax.f32 %v3091_v17, 0.0  ;;  %v3078_v63 = vmax.f32 %v3062_v50, %v3070_v23  ;;  %v8484_v26 = vadd.f32 %v3017_v10, %v10200_v20  ;;  %v3201_v2 = vrot.slane %v3193_v62, %v10268_v51  ;;  %v8785_v50 = vld [vmem:[#allocation3 + $0x28] sm:$0xff]   ;;  %7669 = vmatprep.subr.bf16.mxu1 %v8784_v49 }
 0x323   : > { %v3094_v27 = vadd.f32 %v10262_v3, %v3079_v44  ;;  %v3073_v31 = vmax.f32 %v10249_v22, %v8483_v60  ;;  %v3208_v46 = vrot.slane %v3194_v25, %v10268_v51  ;;  %v3118_v19 = vcombine.high %v3117_v29, %v3117_v29  ;;  %3331 = vst.msk [vmem:[#allocation2 + $0xc] sm:$0x1] %vm10272_vm2, %v10290_v18 }
 0x324   : > { %v3093_v12 = vadd.f32 %v10262_v3, %v3078_v63  ;;  %v3072_v32 = vmax.f32 %v10252_v0, %v8484_v26  ;;  %v3213_v48 = vcombine.high %v3201_v2, %v3201_v2  ;;  %v3125_v20 = vrot.slane %v3117_v29, %v10268_v51  ;;  %3258 = vst.msk [vmem:[#allocation2 + $0x8] sm:$0x1] %vm10272_vm2, %v10296_v11  ;;  %v8788_v29 = vld [vmem:[#allocation3 + $0x78] sm:$0xff]  }
 0x325   : > { %v10315_v22 = vmax.f32 %v3094_v27, 0.0  ;;  %v3081_v4 = vmax.f32 %v3065_v55, %v3073_v31  ;;  %3209 = vrot.lane.b32.xlu0 %v3208_v46, %s9176_s14  ;;  %v3216_v30 = vcombine.high %v3208_v46, %v3208_v46  ;;  %v3155_v39 = vrot.slane %v3148_v42, %v10268_v51  ;;  %7670 = vmatpush3.bf16.msra.mxu1 %v8785_v50  ;;  %v8789_v42 = vld [vmem:[#allocation3 + $0x38] sm:$0xff]   ;;  %v8790_v46 = vld [vmem:[#allocation3 + $0xc0] sm:$0xff]  }
 0x326   : > { %v10321_v0 = vmax.f32 %v3093_v12, 0.0  ;;  %v3080_v35 = vmax.f32 %v3064_v61, %v3072_v32  ;;  %v3140_v37 = vcombine.high %v3125_v20, %v3125_v20  ;;  %3215 = vst.msk [vmem:[#allocation2 + $0x5] sm:$0x1] %vm10272_vm2, %v3213_v48  ;;  %v3132_v52 = vrot.slane %v3118_v19, %v10268_v51  ;;  %7671 = vmatprep.subr.bf16.mxu1 %v8786_v41 }
 0x327   : > { %v3096_v33 = vadd.f32 %v10262_v3, %v3081_v4  ;;  %3217 = vrot.lane.b32.xlu1 %v3216_v30, %s9176_s14  ;;  %v3228_v55 = vrot.slane %v3221_v21, %v10268_v51  ;;  %v3339_v13 = vrot.slane %v10290_v18, %v10268_v51  ;;  %3477 = vst.msk [vmem:[#allocation2 + $0x14] sm:$0x1] %vm10272_vm2, %v10315_v22 }
 0x328   : > { %v3095_v34 = vadd.f32 %v10262_v3, %v3080_v35  ;;  %v3165_v54 = vcombine.high %v3155_v39, %v3155_v39  ;;  %v10340_v61 = vrot.slane %v3155_v39, %v10268_v51  ;;  %v10344_v40 = vrot.slane %v10296_v11, %v10268_v51  ;;  %3142 = vst.msk [vmem:[#allocation2 + $0x1] sm:$0x1] %vm10272_vm2, %v3140_v37 }
 0x329   : > { %3404 = vst.msk [vmem:[#allocation2 + $0x10] sm:$0x1] %vm10272_vm2, %v10321_v0  ;;  %v10351_v45 = vmax.f32 %v3096_v33, 0.0  ;;  %3133 = vrot.lane.b32.xlu0 %v3132_v52, %s9176_s14  ;;  %v10355_v3 = vrot.slane %v3228_v55, %v10268_v51  ;;  %v3238_v47 = vcombine.high %v3228_v55, %v3228_v55  ;;  %v3347_v6 = vrot.slane %v3339_v13, %v10268_v51 }
 0x32a   : > { %v10357_v53 = vmax.f32 %v3095_v34, 0.0  ;;  %v3172_v5 = vrot.slane %v3165_v54, %v10268_v51  ;;  %3164 = vst.msk [vmem:[#allocation2 + $0x2] sm:$0x1] %vm10272_vm2, %v10340_v61  ;;  %v3143_v15 = vcombine.high %v3132_v52, %v3132_v52  ;;  %v3274_v38 = vrot.slane %v10344_v40, %v10268_v51  ;;  %7672 = vmatpush3.bf16.msra.mxu1 %v8787_v14 }
 0x32b   : > { %v3294_v16 = vcombine.high %v10296_v11, %v10296_v11  ;;  %3237 = vst.msk [vmem:[#allocation2 + $0x6] sm:$0x1] %vm10272_vm2, %v10355_v3  ;;  %3623 = vst.msk [vmem:[#allocation2 + $0x1c] sm:$0x1] %vm10272_vm2, %v10351_v45  ;;  %v3359_v7 = vcombine.high %v3347_v6, %v3347_v6  ;;  %v3367_v8 = vcombine.high %v10290_v18, %v10290_v18  ;;  %7673 = vmatprep.subr.bf16.mxu1 %v8788_v29 }
 0x32c   : > { %3173 = vrot.lane.b32.xlu1 %v3172_v5, %s9176_s14  ;;  %3550 = vst.msk [vmem:[#allocation2 + $0x18] sm:$0x1] %vm10272_vm2, %v10357_v53  ;;  %v3245_v9 = vrot.slane %v3238_v47, %v10268_v51  ;;  %v3340_v56 = vcombine.high %v3339_v13, %v3339_v13  ;;  %v3286_v57 = vcombine.high %v3274_v38, %v3274_v38 }
 0x32d   : > { %3144 = vrot.lane.b32.xlu0 %v3143_v15, %s9176_s14  ;;  %v3301_v58 = vrot.slane %v3294_v16, %v10268_v51  ;;  %v3180_v59 = vcombine.high %v3172_v5, %v3172_v5  ;;  %v10384_v62 = vrot.slane %v3367_v8, %v10268_v51  ;;  %v10388_v21 = vrot.slane %v10315_v22, %v10268_v51 }
 0x32e   : > { %v10392_v43 = vrot.slane %v10321_v0, %v10268_v51  ;;  %3361 = vst.msk [vmem:[#allocation2 + $0xd] sm:$0x1] %vm10272_vm2, %v3359_v7  ;;  %v3440_v23 = vcombine.high %v10321_v0, %v10321_v0  ;;  %v3513_v24 = vcombine.high %v10315_v22, %v10315_v22  ;;  %3288 = vst.msk [vmem:[#allocation2 + $0x9] sm:$0x1] %vm10272_vm2, %v3286_v57  ;;  %7674 = vmatpush3.bf16.msra.mxu1 %v8789_v42 }
 0x32f   : > { %v10397_v17 = vrot.slane %v3301_v58, %v10268_v51  ;;  %v10408_v18 = vrot.slane %v10384_v62, %v10268_v51  ;;  %v3493_v44 = vrot.slane %v10388_v21, %v10268_v51  ;;  %v3354_v60 = vrot.slane %v3340_v56, %v10268_v51  ;;  %7681 = vmatprep.subr.bf16.mxu1 %v8790_v46 }
 0x330   : > { %3181 = vrot.lane.b32.xlu1 %v3180_v59, %s9176_s14  ;;  %v3267_v10 = vcombine.high %v10344_v40, %v10344_v40  ;;  %v3420_v25 = vrot.slane %v10392_v43, %v10268_v51  ;;  %v10419_v11 = vrot.slane %v3440_v23, %v10268_v51  ;;  %v3253_v63 = vcombine.high %v3245_v9, %v3245_v9 }
 0x331   : > { %3246 = vrot.lane.b32.xlu0 %v3245_v9, %s9176_s14  ;;  %3310 = vst.msk [vmem:[#allocation2 + $0xa] sm:$0x1] %vm10272_vm2, %v10397_v17  ;;  %v3505_v26 = vcombine.high %v3493_v44, %v3493_v44  ;;  %v10425_v2 = vrot.slane %v3513_v24, %v10268_v51  ;;  %3383 = vst.msk [vmem:[#allocation2 + $0xe] sm:$0x1] %vm10272_vm2, %v10408_v18  ;;  %v3362_v49 = vcombine.high %v3354_v60, %v3354_v60 }
 0x332   : > { %v3432_v27 = vcombine.high %v3420_v25, %v3420_v25  ;;  %v3454_v31 = vrot.slane %v10419_v11, %v10268_v51  ;;  %v3281_v12 = vrot.slane %v3267_v10, %v10268_v51  ;;  %v10441_v32 = vrot.slane %v10351_v45, %v10268_v51 }
 0x333   : > { %v3527_v19 = vrot.slane %v10425_v2, %v10268_v51  ;;  %3507 = vst.msk [vmem:[#allocation2 + $0x15] sm:$0x1] %vm10272_vm2, %v3505_v26  ;;  %v10445_v48 = vrot.slane %v10357_v53, %v10268_v51  ;;  %v3311_v20 = vcombine.high %v3301_v58, %v3301_v58  ;;  %v3586_v50 = vcombine.high %v10357_v53, %v10357_v53 }
 0x334   : > { %3254 = vrot.lane.b32.xlu1 %v3253_v63, %s9176_s14  ;;  %3434 = vst.msk [vmem:[#allocation2 + $0x11] sm:$0x1] %vm10272_vm2, %v3432_v27  ;;  %3456 = vst.msk [vmem:[#allocation2 + $0x12] sm:$0x1] %vm10272_vm2, %v3454_v31  ;;  %v3659_v22 = vcombine.high %v10351_v45, %v10351_v45  ;;  %v3177_v4 = vcombine.high %v10340_v61, %v10340_v61  ;;  %v3639_v30 = vrot.slane %v10441_v32, %v10268_v51 }
 0x335   : > { %3355 = vrot.lane.b32.xlu0 %v3354_v60, %s9176_s14  ;;  %3529 = vst.msk [vmem:[#allocation2 + $0x16] sm:$0x1] %vm10272_vm2, %v3527_v19  ;;  %v3566_v0 = vrot.slane %v10445_v48, %v10268_v51  ;;  %v10465_v35 = vrot.slane %v3586_v50, %v10268_v51  ;;  %v3289_v39 = vcombine.high %v3281_v12, %v3281_v12 }
 0x336   : > { %v3666_v37 = vrot.slane %v3659_v22, %v10268_v51  ;;  %3179 = vst.msk [vmem:[#allocation2 + $0x3] sm:$0x1] %vm10272_vm2, %v3177_v4  ;;  %v3384_v33 = vcombine.high %v10384_v62, %v10384_v62  ;;  %v3651_v52 = vcombine.high %v3639_v30, %v3639_v30  ;;  %v3318_v55 = vrot.slane %v3311_v20, %v10268_v51 }
 0x337   : > { %v3578_v13 = vcombine.high %v3566_v0, %v3566_v0  ;;  %v3600_v34 = vrot.slane %v10465_v35, %v10268_v51  ;;  %v3250_v40 = vcombine.high %v10355_v3, %v10355_v3  ;;  %v3486_v41 = vcombine.high %v10388_v21, %v10388_v21 }
 0x338   : > { %3363 = vrot.lane.b32.xlu1 %v3362_v49, %s9176_s14  ;;  %v3673_v54 = vrot.slane %v3666_v37, %v10268_v51  ;;  %v3676_v61 = vcombine.high %v3666_v37, %v3666_v37  ;;  %3653 = vst.msk [vmem:[#allocation2 + $0x1d] sm:$0x1] %vm10272_vm2, %v3651_v52  ;;  %v3323_v14 = vcombine.high %v10397_v17, %v10397_v17  ;;  %v10582_v20 = vsub.s32 3, %v10257_v28 }
 0x339   : > { %3282 = vrot.lane.b32.xlu0 %v3281_v12, %s9176_s14  ;;  %3580 = vst.msk [vmem:[#allocation2 + $0x19] sm:$0x1] %vm10272_vm2, %v3578_v13  ;;  %3602 = vst.msk [vmem:[#allocation2 + $0x1a] sm:$0x1] %vm10272_vm2, %v3600_v34  ;;  %v3391_v45 = vrot.slane %v3384_v33, %v10268_v51  ;;  %v3396_v47 = vcombine.high %v10408_v18, %v10408_v18  ;;  %v3469_v53 = vcombine.high %v3454_v31, %v3454_v31  ;;  %v8791_v33 = vld [vmem:[#allocation3 + $0x80] sm:$0xff]  }
 0x33a   : > { %3675 = vst.msk [vmem:[#allocation2 + $0x1e] sm:$0x1] %vm10272_vm2, %v3673_v54  ;;  %v3683_v3 = vrot.slane %v3676_v61, %v10268_v51  ;;  %3252 = vst.msk [vmem:[#allocation2 + $0x7] sm:$0x1] %vm10272_vm2, %v3250_v40  ;;  %v3326_v5 = vcombine.high %v3318_v55, %v3318_v55  ;;  %v3542_v6 = vcombine.high %v3527_v19, %v3527_v19  ;;  %v8794_v40 = vld [vmem:[#allocation3 + $0xd0] sm:$0xff]  }
 0x33b   : > { %3325 = vst.msk [vmem:[#allocation2 + $0xb] sm:$0x1] %vm10272_vm2, %v3323_v14  ;;  %v3615_v15 = vcombine.high %v3600_v34, %v3600_v34  ;;  %v3688_v38 = vcombine.high %v3673_v54, %v3673_v54  ;;  %3398 = vst.msk [vmem:[#allocation2 + $0xf] sm:$0x1] %vm10272_vm2, %v3396_v47  ;;  %v3399_v16 = vcombine.high %v3391_v45, %v3391_v45  ;;  %v8793_v54 = vld [vmem:[#allocation3 + $0x88] sm:$0xff]   ;;  %v8795_v14 = vld [vmem:[#allocation3 + $0x90] sm:$0xff]  }
 0x33c   : > { %3290 = vrot.lane.b32.xlu1 %v3289_v39, %s9176_s14  ;;  %3471 = vst.msk [vmem:[#allocation2 + $0x13] sm:$0x1] %vm10272_vm2, %v3469_v53  ;;  %3544 = vst.msk [vmem:[#allocation2 + $0x17] sm:$0x1] %vm10272_vm2, %v3542_v6  ;;  %v3500_v7 = vrot.slane %v3486_v41, %v10268_v51  ;;  %v3413_v8 = vcombine.high %v10392_v43, %v10392_v43  ;;  %v3457_v57 = vcombine.high %v10419_v11, %v10419_v11  ;;  %v8797_v53 = vld [vmem:[#allocation3 + $0x98] sm:$0xff]   ;;  %v8798_v6 = vld [vmem:[#allocation3 + $0xe0] sm:$0xff]  }
 0x33d   : > { %3319 = vrot.lane.b32.xlu0 %v3318_v55, %s9176_s14  ;;  %3617 = vst.msk [vmem:[#allocation2 + $0x1b] sm:$0x1] %vm10272_vm2, %v3615_v15  ;;  %3690 = vst.msk [vmem:[#allocation2 + $0x1f] sm:$0x1] %vm10272_vm2, %v3688_v38  ;;  %v3530_v59 = vcombine.high %v10425_v2, %v10425_v2  ;;  %v3632_v43 = vcombine.high %v10441_v32, %v10441_v32  ;;  %v3559_v24 = vcombine.high %v10445_v48, %v10445_v48  ;;  %v8792_v55 = vld [vmem:[#allocation3 + $0xc8] sm:$0xff]  }
 0x33e   : > { %v3508_v9 = vcombine.high %v3500_v7, %v3500_v7  ;;  %v3427_v56 = vrot.slane %v3413_v8, %v10268_v51  ;;  %v3464_v58 = vrot.slane %v3457_v57, %v10268_v51  ;;  %v3603_v18 = vcombine.high %v10465_v35, %v10465_v35 }
 0x33f   : > { %v3537_v21 = vrot.slane %v3530_v59, %v10268_v51  ;;  %v3646_v23 = vrot.slane %v3632_v43, %v10268_v51  ;;  %v3573_v42 = vrot.slane %v3559_v24, %v10268_v51  ;;  %v3691_v25 = vcombine.high %v3683_v3, %v3683_v3  ;;  %v8799_v59 = vld [vmem:[#allocation3 + $0xa0] sm:$0xff]   ;;  %v8802_v24 = vld [vmem:[#allocation3 + $0xf0] sm:$0xff]  }
 0x340   : > { %3327 = vrot.lane.b32.xlu1 %v3326_v5, %s9176_s14  ;;  %v3435_v36 = vcombine.high %v3427_v56, %v3427_v56  ;;  %v3472_v62 = vcombine.high %v3464_v58, %v3464_v58  ;;  %v3610_v60 = vrot.slane %v3603_v18, %v10268_v51  ;;  %v10576_v32 = vsub.s32 1, %v10257_v28 }
 0x341   : > { %3392 = vrot.lane.b32.xlu0 %v3391_v45, %s9176_s14  ;;  %v3545_v17 = vcombine.high %v3537_v21, %v3537_v21  ;;  %v3654_v29 = vcombine.high %v3646_v23, %v3646_v23  ;;  %v3581_v44 = vcombine.high %v3573_v42, %v3573_v42  ;;  %v10579_v48 = vsub.s32 0, %v10257_v28 }
 0x342   : > { %v3618_v10 = vcombine.high %v3610_v60, %v3610_v60  ;;  %v10611_v15 = vsub.s32 5, %v10257_v28  ;;  %v10614_v38 = vsub.s32 4, %v10257_v28 }
 0x344   : > { %3400 = vrot.lane.b32.xlu1 %v3399_v16, %s9176_s14  ;;  %v10617_v16 = vsub.s32 7, %v10257_v28 }
 0x345   : > { %3501 = vrot.lane.b32.xlu0 %v3500_v7, %s9176_s14  ;;  %v10620_v7 = vsub.s32 6, %v10257_v28 }
 0x348   : > { %3509 = vrot.lane.b32.xlu1 %v3508_v9, %s9176_s14 }
 0x349   : > { %3428 = vrot.lane.b32.xlu0 %v3427_v56, %s9176_s14 }
 0x34c   : > { %3436 = vrot.lane.b32.xlu1 %v3435_v36, %s9176_s14 }
 0x34d   : > { %3465 = vrot.lane.b32.xlu0 %v3464_v58, %s9176_s14 }
 0x350   : > { %3473 = vrot.lane.b32.xlu1 %v3472_v62, %s9176_s14 }
 0x351   : > { %3538 = vrot.lane.b32.xlu0 %v3537_v21, %s9176_s14  ;;  %v8800_v21 = vld [vmem:[#allocation3 + $0xe8] sm:$0xff]  }
 0x354   : > { %3546 = vrot.lane.b32.xlu1 %v3545_v17, %s9176_s14  ;;  %v8801_v17 = vld [vmem:[#allocation3 + $0xa8] sm:$0xff]  }
 0x355   : > { %3647 = vrot.lane.b32.xlu0 %v3646_v23, %s9176_s14 }
 0x358   : > { %3655 = vrot.lane.b32.xlu1 %v3654_v29, %s9176_s14 }
 0x359   : > { %3574 = vrot.lane.b32.xlu0 %v3573_v42, %s9176_s14  ;;  %v8803_v42 = vld [vmem:[#allocation3 + $0xb0] sm:$0xff]  }
 0x35c   : > { %3582 = vrot.lane.b32.xlu1 %v3581_v44, %s9176_s14  ;;  %v8804_v44 = vld [vmem:[#allocation3 + $0xf8] sm:$0xff]  }
 0x35d   : > { %3611 = vrot.lane.b32.xlu0 %v3610_v60, %s9176_s14  ;;  %v10653_v60 = vsub.s32 2, %v10257_v28 }
 0x360   : > { %3619 = vrot.lane.b32.xlu1 %v3618_v10, %s9176_s14 }
 0x361   : > { %3684 = vrot.lane.b32.xlu0 %v3683_v3, %s9176_s14  ;;  %v8796_v3 = vld [vmem:[#allocation3 + $0xd8] sm:$0xff]  }
 0x364   : > { %3692 = vrot.lane.b32.xlu1 %v3691_v25, %s9176_s14  ;;  %v8805_v25 = vld [vmem:[#allocation3 + $0xb8] sm:$0xff]  }
 0x397   : > { %v3210_v51 = vpop.permute.xlu0 %3209 }
 0x398   : > { %3212 = vst.msk [vmem:[#allocation2 + $0x4] sm:$0x1] %vm10551_vm5, %v3210_v51 }
 0x399   : > { %v3218_v63 = vpop.permute.xlu1 %3217 }
 0x39a   : > { %3220 = vst.msk [vmem:[#allocation2 + $0x5] sm:$0x1] %vm10551_vm5, %v3218_v63 }
 0x39b   : > { %v3134_v26 = vpop.permute.xlu0 %3133 }
 0x39c   : > { %3139 = vst.msk [vmem:[#allocation2] sm:$0x1] %vm10551_vm5, %v3134_v26  ;;  %v8806_v26 = vld [vmem:[#allocation3 + $0x140] sm:$0xff]  }
 0x39e   : > { %v3174_v2 = vpop.permute.xlu1 %3173 }
 0x39f   : > { %3176 = vst.msk [vmem:[#allocation2 + $0x2] sm:$0x1] %vm10551_vm5, %v3174_v2  ;;  %v3145_v1 = vpop.permute.xlu0 %3144 }
 0x3a0   : > { %3147 = vst.msk [vmem:[#allocation2 + $0x1] sm:$0x1] %vm10551_vm5, %v3145_v1 }
 0x3a2   : > { %v3182_v27 = vpop.permute.xlu1 %3181 }
 0x3a3   : > { %3184 = vst.msk [vmem:[#allocation2 + $0x3] sm:$0x1] %vm10551_vm5, %v3182_v27  ;;  %v3247_v31 = vpop.permute.xlu0 %3246 }
 0x3a4   : > { %3249 = vst.msk [vmem:[#allocation2 + $0x6] sm:$0x1] %vm10551_vm5, %v3247_v31 }
 0x3a6   : > { %v3255_v46 = vpop.permute.xlu1 %3254 }
 0x3a7   : > { %3257 = vst.msk [vmem:[#allocation2 + $0x7] sm:$0x1] %vm10551_vm5, %v3255_v46  ;;  %v3356_v19 = vpop.permute.xlu0 %3355 }
 0x3a8   : > { %3358 = vst.msk [vmem:[#allocation2 + $0xc] sm:$0x1] %vm10551_vm5, %v3356_v19 }
 0x3aa   : > { %v3364_v49 = vpop.permute.xlu1 %3363 }
 0x3ab   : > { %3366 = vst.msk [vmem:[#allocation2 + $0xd] sm:$0x1] %vm10551_vm5, %v3364_v49  ;;  %v3283_v12 = vpop.permute.xlu0 %3282  ;;  %v8807_v49 = vld [vmem:[#allocation3 + $0x100] sm:$0xff]  }
 0x3ac   : > { %3285 = vst.msk [vmem:[#allocation2 + $0x8] sm:$0x1] %vm10551_vm5, %v3283_v12 }
 0x3ae   : > { %v3291_v50 = vpop.permute.xlu1 %3290  ;;  %v10586_v22 = vld [vmem:[#allocation2] sm:$0xff] }
 0x3af   : > { %3293 = vst.msk [vmem:[#allocation2 + $0x9] sm:$0x1] %vm10551_vm5, %v3291_v50  ;;  %v3320_v4 = vpop.permute.xlu0 %3319  ;;  %v3711_v30 = vrot.slane %v10586_v22, %v10576_v32  ;;  %v3707_v0 = vrot.slane %v10586_v22, %v10579_v48  ;;  %v3719_v35 = vrot.slane %v10586_v22, %v10582_v20  ;;  %v3715_v63 = vrot.slane %v10586_v22, %v10653_v60 }
 0x3b0   : > { %3322 = vst.msk [vmem:[#allocation2 + $0xa] sm:$0x1] %vm10551_vm5, %v3320_v4  ;;  %v3727_v1 = vrot.slane %v10586_v22, %v10611_v15  ;;  %v8808_v4 = vld [vmem:[#allocation3 + $0x148] sm:$0xff]  }
 0x3b1   : > { %v3865_v37 = vpack.c.bf16 %v3711_v30, %v3711_v30  ;;  %v3864_v39 = vpack.c.bf16 %v3707_v0, %v3707_v0  ;;  %v3867_v34 = vpack.c.bf16 %v3719_v35, %v3719_v35  ;;  %v3866_v50 = vpack.c.bf16 %v3715_v63, %v3715_v63  ;;  %v8809_v35 = vld [vmem:[#allocation3 + $0x108] sm:$0xff]   ;;  %v8837_v63 = vld [vmem:[#allocation3 + $0x1b8] sm:$0xff]  }
 0x3b2   : > { %v3328_v52 = vpop.permute.xlu1 %3327  ;;  %v3869_v30 = vpack.c.bf16 %v3727_v1, %v3727_v1 }
 0x3b3   : > { %3330 = vst.msk [vmem:[#allocation2 + $0xb] sm:$0x1] %vm10551_vm5, %v3328_v52  ;;  %5977 = vmatprep.mubr.bf16.mxu1 %v3865_v37  ;;  %v3393_v13 = vpop.permute.xlu0 %3392  ;;  %v8812_v52 = vld [vmem:[#allocation3 + $0x158] sm:$0xff]  }
 0x3b4   : > { %5978 = vmatmul.mubr.bf16.vlgmr.msra.gmra.mrb[24].mxu1 %v3864_v39  ;;  %3395 = vst.msk [vmem:[#allocation2 + $0xe] sm:$0x1] %vm10551_vm5, %v3393_v13  ;;  %v8810_v39 = vld [vmem:[#allocation3 + $0x150] sm:$0xff]   ;;  %v8814_v13 = vld [vmem:[#allocation3 + $0x160] sm:$0xff]  }
 0x3b5   : > { %7682 = vmatpush3.bf16.msra.mxu1 %v8791_v33  ;;  %6017 = vmatprep.mubr.bf16.mxu1 %v3867_v34  ;;  %v8811_v33 = vld [vmem:[#allocation3 + $0x110] sm:$0xff]  }
 0x3b6   : > { %v3401_v61 = vpop.permute.xlu1 %3400  ;;  %7683 = vmatprep.subr.bf16.mxu1 %v8792_v55  ;;  %v8813_v55 = vld [vmem:[#allocation3 + $0x118] sm:$0xff]  }
 0x3b7   : > { %3403 = vst.msk [vmem:[#allocation2 + $0xf] sm:$0x1] %vm10551_vm5, %v3401_v61  ;;  %v3502_v41 = vpop.permute.xlu0 %3501 }
 0x3b8   : > { %3504 = vst.msk [vmem:[#allocation2 + $0x14] sm:$0x1] %vm10551_vm5, %v3502_v41  ;;  %v8815_v41 = vld [vmem:[#allocation3 + $0x120] sm:$0xff]  }
 0x3b9   : > { %7684 = vmatpush3.bf16.msra.mxu1 %v8793_v54 }
 0x3ba   : > { %v3510_v45 = vpop.permute.xlu1 %3509  ;;  %7685 = vmatprep.subr.bf16.mxu1 %v8794_v40 }
 0x3bb   : > { %3512 = vst.msk [vmem:[#allocation2 + $0x15] sm:$0x1] %vm10551_vm5, %v3510_v45  ;;  %v3429_v47 = vpop.permute.xlu0 %3428  ;;  %v8817_v45 = vld [vmem:[#allocation3 + $0x128] sm:$0xff]  }
 0x3bc   : > { %3431 = vst.msk [vmem:[#allocation2 + $0x10] sm:$0x1] %vm10551_vm5, %v3429_v47  ;;  %v8819_v47 = vld [vmem:[#allocation3 + $0x130] sm:$0xff]  }
 0x3bd   : > { %7686 = vmatpush3.bf16.msra.mxu1 %v8795_v14  ;;  %v8816_v14 = vld [vmem:[#allocation3 + $0x168] sm:$0xff]  }
 0x3be   : > { %v3437_v5 = vpop.permute.xlu1 %3436  ;;  %7687 = vmatprep.subr.bf16.mxu1 %v8796_v3  ;;  %v10622_v8 = vld [vmem:[#allocation2 + $0x8] sm:$0xff]  ;;  %v8818_v3 = vld [vmem:[#allocation3 + $0x170] sm:$0xff]  }
 0x3bf   : > { %3439 = vst.msk [vmem:[#allocation2 + $0x11] sm:$0x1] %vm10551_vm5, %v3437_v5  ;;  %v3466_v9 = vpop.permute.xlu0 %3465  ;;  %v10630_v56 = vrot.slane %v10622_v8, %v10611_v15  ;;  %v10634_v57 = vrot.slane %v10622_v8, %v10614_v38  ;;  %v10638_v36 = vrot.slane %v10622_v8, %v10617_v16  ;;  %v10642_v58 = vrot.slane %v10622_v8, %v10620_v7  ;;  %v8821_v5 = vld [vmem:[#allocation3 + $0x138] sm:$0xff]  }
 0x3c0   : > { %3468 = vst.msk [vmem:[#allocation2 + $0x12] sm:$0x1] %vm10551_vm5, %v3466_v9  ;;  %v3735_v9 = vrot.slane %v10586_v22, %v10617_v16  ;;  %v3743_v1 = vrot.slane %v10622_v8, %v10576_v32 }
 0x3c1   : > { %7688 = vmatpush3.bf16.msra.mxu1 %v8797_v53  ;;  %v8820_v53 = vld [vmem:[#allocation3 + $0x178] sm:$0xff]  }
 0x3c2   : > { %v3474_v62 = vpop.permute.xlu1 %3473  ;;  %7689 = vmatprep.subr.bf16.mxu1 %v8798_v6  ;;  %v3723_v6 = vrot.slane %v10586_v22, %v10614_v38 }
 0x3c3   : > { %3476 = vst.msk [vmem:[#allocation2 + $0x13] sm:$0x1] %vm10551_vm5, %v3474_v62  ;;  %v3539_v43 = vpop.permute.xlu0 %3538 }
 0x3c4   : > { %3541 = vst.msk [vmem:[#allocation2 + $0x16] sm:$0x1] %vm10551_vm5, %v3539_v43  ;;  %v3868_v62 = vpack.c.bf16 %v3723_v6, %v3723_v6  ;;  %v3871_v43 = vpack.c.bf16 %v3735_v9, %v3735_v9  ;;  %v8856_v6 = vld [vmem:[#allocation3 + $0x2c8] sm:$0xff]  }
 0x3c5   : > { %7690 = vmatpush3.bf16.msra.mxu1 %v8799_v59  ;;  %v8823_v59 = vld [vmem:[#allocation3 + $0x180] sm:$0xff]   ;;  %v8857_v9 = vld [vmem:[#allocation3 + $0x288] sm:$0xff]  }
 0x3c6   : > { %v3547_v23 = vpop.permute.xlu1 %3546  ;;  %7691 = vmatprep.subr.bf16.mxu1 %v8800_v21  ;;  %v8824_v21 = vld [vmem:[#allocation3 + $0x1c8] sm:$0xff]  }
 0x3c7   : > { %3549 = vst.msk [vmem:[#allocation2 + $0x17] sm:$0x1] %vm10551_vm5, %v3547_v23  ;;  %v3648_v29 = vpop.permute.xlu0 %3647  ;;  %v8826_v23 = vld [vmem:[#allocation3 + $0x1d0] sm:$0xff]  }
 0x3c8   : > { %3650 = vst.msk [vmem:[#allocation2 + $0x1c] sm:$0x1] %vm10551_vm5, %v3648_v29  ;;  %v8829_v29 = vld [vmem:[#allocation3 + $0x198] sm:$0xff]  }
 0x3c9   : > { %7692 = vmatpush3.bf16.msra.mxu1 %v8801_v17  ;;  %v8825_v17 = vld [vmem:[#allocation3 + $0x188] sm:$0xff]  }
 0x3ca   : > { %v3656_v18 = vpop.permute.xlu1 %3655  ;;  %7693 = vmatprep.subr.bf16.mxu1 %v8802_v24  ;;  %v8827_v24 = vld [vmem:[#allocation3 + $0x190] sm:$0xff]  }
 0x3cb   : > { %3658 = vst.msk [vmem:[#allocation2 + $0x1d] sm:$0x1] %vm10551_vm5, %v3656_v18  ;;  %v3575_v10 = vpop.permute.xlu0 %3574  ;;  %v8832_v18 = vld [vmem:[#allocation3 + $0x1e8] sm:$0xff]  }
 0x3cc   : > { %3577 = vst.msk [vmem:[#allocation2 + $0x18] sm:$0x1] %vm10551_vm5, %v3575_v10  ;;  %v8834_v10 = vld [vmem:[#allocation3 + $0x1f0] sm:$0xff]  }
 0x3cd   : > { %7694 = vmatpush3.bf16.msra.mxu1 %v8803_v42  ;;  %v8831_v42 = vld [vmem:[#allocation3 + $0x1a0] sm:$0xff]  }
 0x3ce   : > { %v3583_v51 = vpop.permute.xlu1 %3582  ;;  %7695 = vmatprep.subr.bf16.mxu1 %v8804_v44  ;;  %v10661_v2 = vld [vmem:[#allocation2 + $0x10] sm:$0xff]  ;;  %v8833_v44 = vld [vmem:[#allocation3 + $0x1a8] sm:$0xff]  }
 0x3cf   : > { %3585 = vst.msk [vmem:[#allocation2 + $0x19] sm:$0x1] %vm10551_vm5, %v3583_v51  ;;  %v3612_v28 = vpop.permute.xlu0 %3611  ;;  %v10671_v27 = vrot.slane %v10661_v2, %v10611_v15  ;;  %v10675_v31 = vrot.slane %v10661_v2, %v10614_v38  ;;  %v10679_v46 = vrot.slane %v10661_v2, %v10617_v16  ;;  %v10683_v19 = vrot.slane %v10661_v2, %v10620_v7  ;;  %v8836_v51 = vld [vmem:[#allocation3 + $0x1f8] sm:$0xff]  }
 0x3d0   : > { %3614 = vst.msk [vmem:[#allocation2 + $0x1a] sm:$0x1] %vm10551_vm5, %v3612_v28  ;;  %v8838_v28 = vld [vmem:[#allocation3 + $0x240] sm:$0xff]  }
 0x3d1   : > { %7696 = vmatpush3.bf16.msra.mxu1 %v8805_v25  ;;  %v8835_v25 = vld [vmem:[#allocation3 + $0x1b0] sm:$0xff]  }
 0x3d2   : > { %v3620_v12 = vpop.permute.xlu1 %3619  ;;  %7703 = vmatprep.subr.bf16.mxu1 %v8806_v26  ;;  %v3731_v26 = vrot.slane %v10586_v22, %v10620_v7  ;;  %v8844_v22 = vld [vmem:[#allocation3 + $0x258] sm:$0xff]  }
 0x3d3   : > { %3622 = vst.msk [vmem:[#allocation2 + $0x1b] sm:$0x1] %vm10551_vm5, %v3620_v12  ;;  %v3685_v0 = vpop.permute.xlu0 %3684 }
 0x3d4   : > { %6018 = vmatmul.mubr.bf16.vlgmr.msra.gmra.mrb[28].mxu1 %v3866_v50  ;;  %3687 = vst.msk [vmem:[#allocation2 + $0x1e] sm:$0x1] %vm10551_vm5, %v3685_v0  ;;  %v3870_v12 = vpack.c.bf16 %v3731_v26, %v3731_v26  ;;  %v8840_v50 = vld [vmem:[#allocation3 + $0x248] sm:$0xff]   ;;  %v8842_v0 = vld [vmem:[#allocation3 + $0x250] sm:$0xff]   ;;  %v3877_v26 = vpack.c.bf16 %v10630_v56, %v10630_v56 }
 0x3d5   : > { %7704 = vmatpush3.bf16.msra.mxu1 %v8807_v49  ;;  %6057 = vmatprep.mubr.bf16.mxu1 %v3869_v30  ;;  %v8839_v49 = vld [vmem:[#allocation3 + $0x200] sm:$0xff]   ;;  %v8841_v30 = vld [vmem:[#allocation3 + $0x208] sm:$0xff]  }
 0x3d6   : > { %v3693_v37 = vpop.permute.xlu1 %3692  ;;  %7705 = vmatprep.subr.bf16.mxu1 %v8808_v4  ;;  %v3873_v4 = vpack.c.bf16 %v3743_v1, %v3743_v1  ;;  %v8874_v1 = vld [vmem:[#allocation3 + $0x350] sm:$0xff]   ;;  %v8881_v56 = vld [vmem:[#allocation3 + $0x328] sm:$0xff]  }
 0x3d7   : > { %3695 = vst.msk [vmem:[#allocation2 + $0x1f] sm:$0x1] %vm10551_vm5, %v3693_v37  ;;  %v8846_v37 = vld [vmem:[#allocation3 + $0x260] sm:$0xff]  }
 0x3d9   : > { %7706 = vmatpush3.bf16.msra.mxu1 %v8809_v35  ;;  %v8843_v35 = vld [vmem:[#allocation3 + $0x210] sm:$0xff]  }
 0x3da   : > { %7707 = vmatprep.subr.bf16.mxu1 %v8810_v39  ;;  %v8847_v39 = vld [vmem:[#allocation3 + $0x220] sm:$0xff]  }
 0x3dd   : > { %7708 = vmatpush3.bf16.msra.mxu1 %v8811_v33  ;;  %v8848_v33 = vld [vmem:[#allocation3 + $0x268] sm:$0xff]  }
 0x3de   : > { %7709 = vmatprep.subr.bf16.mxu1 %v8812_v52  ;;  %v10691_v34 = vld [vmem:[#allocation2 + $0x18] sm:$0xff]  ;;  %v8849_v52 = vld [vmem:[#allocation3 + $0x228] sm:$0xff]  }
 0x3df   : > { %v10695_v54 = vrot.slane %v10691_v34, %v10611_v15  ;;  %v10699_v61 = vrot.slane %v10691_v34, %v10614_v38  ;;  %v10703_v11 = vrot.slane %v10691_v34, %v10617_v16  ;;  %v10707_v40 = vrot.slane %v10691_v34, %v10620_v7  ;;  %v8822_v15 = vld [vmem:[#allocation3 + $0x1c0] sm:$0xff]   ;;  %v8828_v38 = vld [vmem:[#allocation3 + $0x1d8] sm:$0xff]  }
 0x3e0   : > { %v8830_v16 = vld [vmem:[#allocation3 + $0x1e0] sm:$0xff]   ;;  %v8845_v7 = vld [vmem:[#allocation3 + $0x218] sm:$0xff]  }
 0x3e1   : > { %7710 = vmatpush3.bf16.msra.mxu1 %v8813_v55  ;;  %v8850_v55 = vld [vmem:[#allocation3 + $0x270] sm:$0xff]  }
 0x3e2   : > { %7711 = vmatprep.subr.bf16.mxu1 %v8814_v13  ;;  %v8851_v13 = vld [vmem:[#allocation3 + $0x230] sm:$0xff]  }
 0x3e5   : > { %7712 = vmatpush3.bf16.msra.mxu1 %v8815_v41  ;;  %v8852_v41 = vld [vmem:[#allocation3 + $0x278] sm:$0xff]  }
 0x3e6   : > { %7713 = vmatprep.subr.bf16.mxu1 %v8816_v14  ;;  %v8853_v14 = vld [vmem:[#allocation3 + $0x238] sm:$0xff]  }
 0x3e9   : > { %7714 = vmatpush3.bf16.msra.mxu1 %v8817_v45  ;;  %v3739_v45 = vrot.slane %v10622_v8, %v10579_v48 }
 0x3ea   : > { %7715 = vmatprep.subr.bf16.mxu1 %v8818_v3  ;;  %v8854_v3 = vld [vmem:[#allocation3 + $0x2c0] sm:$0xff]  }
 0x3ed   : > { %7716 = vmatpush3.bf16.msra.mxu1 %v8819_v47  ;;  %v3751_v47 = vrot.slane %v10622_v8, %v10582_v20 }
 0x3ee   : > { %7717 = vmatprep.subr.bf16.mxu1 %v8820_v53  ;;  %v8855_v53 = vld [vmem:[#allocation3 + $0x280] sm:$0xff]  }
 0x3f1   : > { %7718 = vmatpush3.bf16.msra.mxu1 %v8821_v5  ;;  %v3872_v5 = vpack.c.bf16 %v3739_v45, %v3739_v45  ;;  %v8892_v45 = vld [vmem:[#allocation3 + $0x3d8] sm:$0xff]  }
 0x3f2   : > { %7725 = vmatprep.subr.bf16.mxu1 %v8822_v15  ;;  %v3875_v15 = vpack.c.bf16 %v3751_v47, %v3751_v47  ;;  %v8894_v47 = vld [vmem:[#allocation3 + $0x3e0] sm:$0xff]  }
 0x3f4   : > { %6058 = vmatmul.mubr.bf16.vlgmr.msra.gmra.mrb[32].mxu1 %v3868_v62  ;;  %v8859_v62 = vld [vmem:[#allocation3 + $0x290] sm:$0xff]  }
 0x3f5   : > { %7726 = vmatpush3.bf16.msra.mxu1 %v8823_v59  ;;  %6097 = vmatprep.mubr.bf16.mxu1 %v3871_v43  ;;  %v8858_v59 = vld [vmem:[#allocation3 + $0x2d0] sm:$0xff]   ;;  %v8861_v43 = vld [vmem:[#allocation3 + $0x298] sm:$0xff]  }
 0x3f6   : > { %7727 = vmatprep.subr.bf16.mxu1 %v8824_v21  ;;  %v8860_v21 = vld [vmem:[#allocation3 + $0x2d8] sm:$0xff]  }
 0x3f9   : > { %7728 = vmatpush3.bf16.msra.mxu1 %v8825_v17  ;;  %v8862_v17 = vld [vmem:[#allocation3 + $0x2e0] sm:$0xff]  }
 0x3fa   : > { %7729 = vmatprep.subr.bf16.mxu1 %v8826_v23  ;;  %v8863_v23 = vld [vmem:[#allocation3 + $0x2a0] sm:$0xff]  }
 0x3fd   : > { %7730 = vmatpush3.bf16.msra.mxu1 %v8827_v24  ;;  %v8864_v24 = vld [vmem:[#allocation3 + $0x2e8] sm:$0xff]  }
 0x3fe   : > { %7731 = vmatprep.subr.bf16.mxu1 %v8828_v38  ;;  %v8865_v38 = vld [vmem:[#allocation3 + $0x2a8] sm:$0xff]  }
 0x401   : > { %7732 = vmatpush3.bf16.msra.mxu1 %v8829_v29  ;;  %v8866_v29 = vld [vmem:[#allocation3 + $0x2f0] sm:$0xff]  }
 0x402   : > { %7733 = vmatprep.subr.bf16.mxu1 %v8830_v16  ;;  %v8867_v16 = vld [vmem:[#allocation3 + $0x2b0] sm:$0xff]  }
 0x405   : > { %7734 = vmatpush3.bf16.msra.mxu1 %v8831_v42  ;;  %v8868_v42 = vld [vmem:[#allocation3 + $0x2f8] sm:$0xff]  }
 0x406   : > { %7735 = vmatprep.subr.bf16.mxu1 %v8832_v18  ;;  %v8869_v18 = vld [vmem:[#allocation3 + $0x2b8] sm:$0xff]  }
 0x409   : > { %7736 = vmatpush3.bf16.msra.mxu1 %v8833_v44  ;;  %v3747_v44 = vrot.slane %v10622_v8, %v10653_v60  ;;  %v8877_v8 = vld [vmem:[#allocation3 + $0x318] sm:$0xff]  }
 0x40a   : > { %7737 = vmatprep.subr.bf16.mxu1 %v8834_v10  ;;  %v8870_v10 = vld [vmem:[#allocation3 + $0x340] sm:$0xff]  }
 0x40d   : > { %7738 = vmatpush3.bf16.msra.mxu1 %v8835_v25  ;;  %v8871_v25 = vld [vmem:[#allocation3 + $0x300] sm:$0xff]  }
 0x40e   : > { %7739 = vmatprep.subr.bf16.mxu1 %v8836_v51  ;;  %v3874_v51 = vpack.c.bf16 %v3747_v44, %v3747_v44  ;;  %v8906_v44 = vld [vmem:[#allocation3 + $0x450] sm:$0xff]  }
 0x411   : > { %7740 = vmatpush3.bf16.msra.mxu1 %v8837_v63  ;;  %v8872_v63 = vld [vmem:[#allocation3 + $0x348] sm:$0xff]  }
 0x412   : > { %7747 = vmatprep.subr.bf16.mxu1 %v8838_v28  ;;  %v8873_v28 = vld [vmem:[#allocation3 + $0x308] sm:$0xff]  }
 0x414   : > { %6098 = vmatmul.mubr.bf16.vlgmr.msra.gmra.mrb[36].mxu1 %v3870_v12  ;;  %v8876_v12 = vld [vmem:[#allocation3 + $0x358] sm:$0xff]  }
 0x415   : > { %7748 = vmatpush3.bf16.msra.mxu1 %v8839_v49  ;;  %6137 = vmatprep.mubr.bf16.mxu1 %v3873_v4  ;;  %v8875_v49 = vld [vmem:[#allocation3 + $0x310] sm:$0xff]   ;;  %v8879_v4 = vld [vmem:[#allocation3 + $0x320] sm:$0xff]  }
 0x416   : > { %7749 = vmatprep.subr.bf16.mxu1 %v8840_v50  ;;  %v8878_v50 = vld [vmem:[#allocation3 + $0x360] sm:$0xff]  }
 0x419   : > { %7750 = vmatpush3.bf16.msra.mxu1 %v8841_v30  ;;  %v8880_v30 = vld [vmem:[#allocation3 + $0x368] sm:$0xff]  }
 0x41a   : > { %7751 = vmatprep.subr.bf16.mxu1 %v8842_v0  ;;  %v8882_v0 = vld [vmem:[#allocation3 + $0x370] sm:$0xff]  }
 0x41d   : > { %7752 = vmatpush3.bf16.msra.mxu1 %v8843_v35  ;;  %v8883_v35 = vld [vmem:[#allocation3 + $0x330] sm:$0xff]  }
 0x41e   : > { %7753 = vmatprep.subr.bf16.mxu1 %v8844_v22  ;;  %v8884_v22 = vld [vmem:[#allocation3 + $0x378] sm:$0xff]  }
 0x421   : > { %7754 = vmatpush3.bf16.msra.mxu1 %v8845_v7  ;;  %v8885_v7 = vld [vmem:[#allocation3 + $0x338] sm:$0xff]  }
 0x422   : > { %7755 = vmatprep.subr.bf16.mxu1 %v8846_v37  ;;  %v8886_v37 = vld [vmem:[#allocation3 + $0x3c0] sm:$0xff]  }
 0x425   : > { %7756 = vmatpush3.bf16.msra.mxu1 %v8847_v39  ;;  %v8887_v39 = vld [vmem:[#allocation3 + $0x380] sm:$0xff]  }
 0x426   : > { %7757 = vmatprep.subr.bf16.mxu1 %v8848_v33  ;;  %v3876_v33 = vpack.c.bf16 %v10634_v57, %v10634_v57  ;;  %v8895_v57 = vld [vmem:[#allocation3 + $0x3a0] sm:$0xff]  }
 0x429   : > { %7758 = vmatpush3.bf16.msra.mxu1 %v8849_v52  ;;  %v8888_v52 = vld [vmem:[#allocation3 + $0x3c8] sm:$0xff]  }
 0x42a   : > { %7759 = vmatprep.subr.bf16.mxu1 %v8850_v55  ;;  %v3879_v55 = vpack.c.bf16 %v10638_v36, %v10638_v36  ;;  %v8897_v36 = vld [vmem:[#allocation3 + $0x3a8] sm:$0xff]  }
 0x42d   : > { %7760 = vmatpush3.bf16.msra.mxu1 %v8851_v13  ;;  %v8889_v13 = vld [vmem:[#allocation3 + $0x388] sm:$0xff]  }
 0x42e   : > { %7761 = vmatprep.subr.bf16.mxu1 %v8852_v41  ;;  %v8890_v41 = vld [vmem:[#allocation3 + $0x3d0] sm:$0xff]  }
 0x431   : > { %7762 = vmatpush3.bf16.msra.mxu1 %v8853_v14  ;;  %v8891_v14 = vld [vmem:[#allocation3 + $0x390] sm:$0xff]  }
 0x432   : > { %7769 = vmatprep.subr.bf16.mxu1 %v8854_v3  ;;  %v8893_v3 = vld [vmem:[#allocation3 + $0x398] sm:$0xff]  }
 0x434   : > { %6138 = vmatmul.mubr.bf16.vlgmr.msra.gmra.mrb[40].mxu1 %v3872_v5  ;;  %v8898_v5 = vld [vmem:[#allocation3 + $0x3f0] sm:$0xff]  }
 0x435   : > { %7770 = vmatpush3.bf16.msra.mxu1 %v8855_v53  ;;  %6177 = vmatprep.mubr.bf16.mxu1 %v3875_v15  ;;  %v8896_v53 = vld [vmem:[#allocation3 + $0x3e8] sm:$0xff]  }
 0x436   : > { %7771 = vmatprep.subr.bf16.mxu1 %v8856_v6 }
 0x439   : > { %7772 = vmatpush3.bf16.msra.mxu1 %v8857_v9 }
 0x43a   : > { %7773 = vmatprep.subr.bf16.mxu1 %v8858_v59 }
 0x43d   : > { %7774 = vmatpush3.bf16.msra.mxu1 %v8859_v62  ;;  %v8899_v62 = vld [vmem:[#allocation3 + $0x3b0] sm:$0xff]  }
 0x43e   : > { %7775 = vmatprep.subr.bf16.mxu1 %v8860_v21 }
 0x441   : > { %7776 = vmatpush3.bf16.msra.mxu1 %v8861_v43  ;;  %v8900_v43 = vld [vmem:[#allocation3 + $0x3f8] sm:$0xff]  }
 0x442   : > { %7777 = vmatprep.subr.bf16.mxu1 %v8862_v17  ;;  %v8901_v17 = vld [vmem:[#allocation3 + $0x3b8] sm:$0xff]  }
 0x445   : > { %7778 = vmatpush3.bf16.msra.mxu1 %v8863_v23  ;;  %v8902_v23 = vld [vmem:[#allocation3 + $0x440] sm:$0xff]  }
 0x446   : > { %7779 = vmatprep.subr.bf16.mxu1 %v8864_v24  ;;  %v3775_v24 = vrot.slane %v10661_v2, %v10576_v32 }
 0x449   : > { %7780 = vmatpush3.bf16.msra.mxu1 %v8865_v38  ;;  %v8903_v38 = vld [vmem:[#allocation3 + $0x400] sm:$0xff]  }
 0x44a   : > { %7781 = vmatprep.subr.bf16.mxu1 %v8866_v29  ;;  %v3878_v29 = vpack.c.bf16 %v10642_v58, %v10642_v58  ;;  %v8912_v58 = vld [vmem:[#allocation3 + $0x468] sm:$0xff]  }
 0x44d   : > { %7782 = vmatpush3.bf16.msra.mxu1 %v8867_v16  ;;  %v8904_v16 = vld [vmem:[#allocation3 + $0x448] sm:$0xff]  }
 0x44e   : > { %7783 = vmatprep.subr.bf16.mxu1 %v8868_v42  ;;  %v3881_v42 = vpack.c.bf16 %v3775_v24, %v3775_v24 }
 0x451   : > { %7784 = vmatpush3.bf16.msra.mxu1 %v8869_v18  ;;  %v8905_v18 = vld [vmem:[#allocation3 + $0x408] sm:$0xff]  }
 0x452   : > { %7791 = vmatprep.subr.bf16.mxu1 %v8870_v10  ;;  %v8907_v10 = vld [vmem:[#allocation3 + $0x410] sm:$0xff]  }
 0x454   : > { %6178 = vmatmul.mubr.bf16.vlgmr.msra.gmra.mrb[44].mxu1 %v3874_v51  ;;  %v8909_v51 = vld [vmem:[#allocation3 + $0x418] sm:$0xff]  }
 0x455   : > { %7792 = vmatpush3.bf16.msra.mxu1 %v8871_v25  ;;  %6217 = vmatprep.mubr.bf16.mxu1 %v3877_v26  ;;  %v8908_v25 = vld [vmem:[#allocation3 + $0x458] sm:$0xff]   ;;  %v8911_v26 = vld [vmem:[#allocation3 + $0x420] sm:$0xff]  }
 0x456   : > { %7793 = vmatprep.subr.bf16.mxu1 %v8872_v63  ;;  %v8910_v63 = vld [vmem:[#allocation3 + $0x460] sm:$0xff]  }
 0x459   : > { %7794 = vmatpush3.bf16.msra.mxu1 %v8873_v28  ;;  %v8913_v28 = vld [vmem:[#allocation3 + $0x428] sm:$0xff]  }
 0x45a   : > { %7795 = vmatprep.subr.bf16.mxu1 %v8874_v1  ;;  %v4408_v1 = vld [vmem:[%s10818_s4] sm:$0x1] }
 0x45d   : > { %7796 = vmatpush3.bf16.msra.mxu1 %v8875_v49  ;;  %v8914_v49 = vld [vmem:[#allocation3 + $0x470] sm:$0xff]  }
 0x45e   : > { %7797 = vmatprep.subr.bf16.mxu1 %v8876_v12 }
 0x461   : > { %7798 = vmatpush3.bf16.msra.mxu1 %v8877_v8 }
 0x462   : > { %7799 = vmatprep.subr.bf16.mxu1 %v8878_v50 }
 0x465   : > { %7800 = vmatpush3.bf16.msra.mxu1 %v8879_v4 }
 0x466   : > { %7801 = vmatprep.subr.bf16.mxu1 %v8880_v30 }
 0x469   : > { %7802 = vmatpush3.bf16.msra.mxu1 %v8881_v56  ;;  %v8915_v56 = vld [vmem:[#allocation3 + $0x430] sm:$0xff]  }
 0x46a   : > { %7803 = vmatprep.subr.bf16.mxu1 %v8882_v0 }
 0x46d   : > { %7804 = vmatpush3.bf16.msra.mxu1 %v8883_v35  ;;  %v8916_v35 = vld [vmem:[#allocation3 + $0x478] sm:$0xff]  }
 0x46e   : > { %7805 = vmatprep.subr.bf16.mxu1 %v8884_v22 }
 0x471   : > { %7806 = vmatpush3.bf16.msra.mxu1 %v8885_v7  ;;  %v8917_v7 = vld [vmem:[#allocation3 + $0x438] sm:$0xff]  }
 0x472   : > { %7813 = vmatprep.subr.bf16.mxu1 %v8886_v37  ;;  %v3771_v37 = vrot.slane %v10661_v2, %v10579_v48 }
 0x474   : > { %6218 = vmatmul.mubr.bf16.vlgmr.msra.gmra.mrb[48].mxu1 %v3876_v33  ;;  %v3783_v33 = vrot.slane %v10661_v2, %v10582_v20 }
 0x475   : > { %7814 = vmatpush3.bf16.msra.mxu1 %v8887_v39  ;;  %6257 = vmatprep.mubr.bf16.mxu1 %v3879_v55  ;;  %v8918_v39 = vld [vmem:[#allocation3 + $0x4c0] sm:$0xff]   ;;  %v3880_v55 = vpack.c.bf16 %v3771_v37, %v3771_v37 }
 0x476   : > { %7815 = vmatprep.subr.bf16.mxu1 %v8888_v52  ;;  %v8919_v52 = vld [vmem:[#allocation3 + $0x480] sm:$0xff]  }
 0x477   : > { %v8951_v37 = vld [vmem:[#allocation3 + $0x580] sm:$0xff]  }
 0x479   : > { %7816 = vmatpush3.bf16.msra.mxu1 %v8889_v13  ;;  %v8920_v13 = vld [vmem:[#allocation3 + $0x4c8] sm:$0xff]  }
 0x47a   : > { %7817 = vmatprep.subr.bf16.mxu1 %v8890_v41  ;;  %v3883_v41 = vpack.c.bf16 %v3783_v33, %v3783_v33  ;;  %v8952_v33 = vld [vmem:[#allocation3 + $0x5c8] sm:$0xff]  }
 0x47d   : > { %7818 = vmatpush3.bf16.msra.mxu1 %v8891_v14  ;;  %v8921_v14 = vld [vmem:[#allocation3 + $0x488] sm:$0xff]  }
 0x47e   : > { %7819 = vmatprep.subr.bf16.mxu1 %v8892_v45  ;;  %v8922_v45 = vld [vmem:[#allocation3 + $0x4d0] sm:$0xff]  }
 0x481   : > { %7820 = vmatpush3.bf16.msra.mxu1 %v8893_v3  ;;  %v8923_v3 = vld [vmem:[#allocation3 + $0x490] sm:$0xff]  }
 0x482   : > { %7821 = vmatprep.subr.bf16.mxu1 %v8894_v47  ;;  %v8924_v47 = vld [vmem:[#allocation3 + $0x4d8] sm:$0xff]  }
 0x485   : > { %7822 = vmatpush3.bf16.msra.mxu1 %v8895_v57  ;;  %v8925_v57 = vld [vmem:[#allocation3 + $0x498] sm:$0xff]  }
 0x486   : > { %7823 = vmatprep.subr.bf16.mxu1 %v8896_v53  ;;  %v8926_v53 = vld [vmem:[#allocation3 + $0x4e0] sm:$0xff]  }
 0x487   : > { %v7675_v6 = vpop.f32.mrb[24].mxu1 }
 0x488   : > { %v7676_v15 = vpop.f32.mrb[25].mxu1 }
 0x489   : > { %v7677_v9 = vadd.f32 %v7676_v15, %v7675_v6  ;;  %7824 = vmatpush3.bf16.msra.mxu1 %v8897_v36  ;;  %v7678_v59 = vpop.f32.mrb[26].mxu1  ;;  %v8927_v36 = vld [vmem:[#allocation3 + $0x4a0] sm:$0xff]   ;;  %v8929_v6 = vld [vmem:[#allocation3 + $0x4a8] sm:$0xff]   ;;  %v8930_v15 = vld [vmem:[#allocation3 + $0x4f0] sm:$0xff]  }
 0x48a   : > { %v7679_v21 = vpop.f32.mrb[27].mxu1  ;;  %7825 = vmatprep.subr.bf16.mxu1 %v8898_v5  ;;  %v8928_v5 = vld [vmem:[#allocation3 + $0x4e8] sm:$0xff]  }
 0x48b   : > { %v5980_v50 = vadd.f32 %v7677_v9, %v4408_v1  ;;  %v8944_v1 = vld [vmem:[#allocation3 + $0x568] sm:$0xff]  }
 0x48d   : > { %7826 = vmatpush3.bf16.msra.mxu1 %v8899_v62 }
 0x48e   : > { %7827 = vmatprep.subr.bf16.mxu1 %v8900_v43  ;;  %v8931_v43 = vld [vmem:[#allocation3 + $0x4b0] sm:$0xff]  }
 0x491   : > { %7828 = vmatpush3.bf16.msra.mxu1 %v8901_v17 }
 0x492   : > { %7835 = vmatprep.subr.bf16.mxu1 %v8902_v23  ;;  %v8932_v23 = vld [vmem:[#allocation3 + $0x4f8] sm:$0xff]  }
 0x494   : > { %6258 = vmatmul.mubr.bf16.vlgmr.msra.gmra.mrb[52].mxu1 %v3878_v29  ;;  %v3779_v29 = vrot.slane %v10661_v2, %v10653_v60  ;;  %v8941_v2 = vld [vmem:[#allocation3 + $0x518] sm:$0xff]  }
 0x495   : > { %7836 = vmatpush3.bf16.msra.mxu1 %v8903_v38  ;;  %6297 = vmatprep.mubr.bf16.mxu1 %v3881_v42  ;;  %v8933_v38 = vld [vmem:[#allocation3 + $0x4b8] sm:$0xff]   ;;  %v8935_v42 = vld [vmem:[#allocation3 + $0x500] sm:$0xff]  }
 0x496   : > { %7837 = vmatprep.subr.bf16.mxu1 %v8904_v16  ;;  %v8934_v16 = vld [vmem:[#allocation3 + $0x540] sm:$0xff]  }
 0x499   : > { %7838 = vmatpush3.bf16.msra.mxu1 %v8905_v18  ;;  %v3882_v18 = vpack.c.bf16 %v3779_v29, %v3779_v29 }
 0x49a   : > { %7839 = vmatprep.subr.bf16.mxu1 %v8906_v44  ;;  %v8936_v44 = vld [vmem:[#allocation3 + $0x548] sm:$0xff]  }
 0x49d   : > { %7840 = vmatpush3.bf16.msra.mxu1 %v8907_v10  ;;  %v3885_v10 = vpack.c.bf16 %v10671_v27, %v10671_v27  ;;  %v8945_v27 = vld [vmem:[#allocation3 + $0x528] sm:$0xff]  }
 0x49e   : > { %7841 = vmatprep.subr.bf16.mxu1 %v8908_v25  ;;  %v8937_v25 = vld [vmem:[#allocation3 + $0x508] sm:$0xff]  }
 0x4a1   : > { %7842 = vmatpush3.bf16.msra.mxu1 %v8909_v51  ;;  %v8938_v51 = vld [vmem:[#allocation3 + $0x550] sm:$0xff]  }
 0x4a2   : > { %7843 = vmatprep.subr.bf16.mxu1 %v8910_v63  ;;  %v8939_v63 = vld [vmem:[#allocation3 + $0x510] sm:$0xff]  }
 0x4a5   : > { %7844 = vmatpush3.bf16.msra.mxu1 %v8911_v26  ;;  %v8940_v26 = vld [vmem:[#allocation3 + $0x558] sm:$0xff]  }
 0x4a6   : > { %7845 = vmatprep.subr.bf16.mxu1 %v8912_v58  ;;  %v8942_v58 = vld [vmem:[#allocation3 + $0x560] sm:$0xff]  }
 0x4a7   : > { %v7697_v12 = vpop.f32.mrb[28].mxu1 }
 0x4a8   : > { %v7698_v8 = vpop.f32.mrb[29].mxu1 }
 0x4a9   : > { %v7699_v4 = vadd.f32 %v7698_v8, %v7697_v12  ;;  %v7700_v30 = vpop.f32.mrb[30].mxu1  ;;  %7846 = vmatpush3.bf16.msra.mxu1 %v8913_v28  ;;  %v8943_v28 = vld [vmem:[#allocation3 + $0x520] sm:$0xff]  }
 0x4aa   : > { %v7701_v0 = vpop.f32.mrb[31].mxu1  ;;  %7847 = vmatprep.subr.bf16.mxu1 %v8914_v49  ;;  %v8946_v49 = vld [vmem:[#allocation3 + $0x570] sm:$0xff]  }
 0x4ab   : > { %v6020_v22 = vadd.f32 %v7699_v4, %v5980_v50  ;;  %v8947_v30 = vld [vmem:[#allocation3 + $0x530] sm:$0xff]   ;;  %v8948_v0 = vld [vmem:[#allocation3 + $0x578] sm:$0xff]  }
 0x4ad   : > { %7848 = vmatpush3.bf16.msra.mxu1 %v8915_v56 }
 0x4ae   : > { %7849 = vmatprep.subr.bf16.mxu1 %v8916_v35 }
 0x4b1   : > { %7850 = vmatpush3.bf16.msra.mxu1 %v8917_v7  ;;  %v8950_v7 = vld [vmem:[#allocation3 + $0x5c0] sm:$0xff]  }
 0x4b2   : > { %7857 = vmatprep.subr.bf16.mxu1 %v8918_v39  ;;  %v3884_v39 = vpack.c.bf16 %v10675_v31, %v10675_v31  ;;  %v8959_v31 = vld [vmem:[#allocation3 + $0x5a0] sm:$0xff]  }
 0x4b4   : > { %6298 = vmatmul.mubr.bf16.vlgmr.msra.gmra.mrb[56].mxu1 %v3880_v55  ;;  %v8953_v55 = vld [vmem:[#allocation3 + $0x588] sm:$0xff]  }
 0x4b5   : > { %7858 = vmatpush3.bf16.msra.mxu1 %v8919_v52  ;;  %6337 = vmatprep.mubr.bf16.mxu1 %v3883_v41  ;;  %v3887_v52 = vpack.c.bf16 %v10679_v46, %v10679_v46  ;;  %v8955_v41 = vld [vmem:[#allocation3 + $0x590] sm:$0xff]   ;;  %v8961_v46 = vld [vmem:[#allocation3 + $0x5a8] sm:$0xff]  }
 0x4b6   : > { %7859 = vmatprep.subr.bf16.mxu1 %v8920_v13  ;;  %v8954_v13 = vld [vmem:[#allocation3 + $0x5d0] sm:$0xff]  }
 0x4b9   : > { %7860 = vmatpush3.bf16.msra.mxu1 %v8921_v14  ;;  %v8956_v14 = vld [vmem:[#allocation3 + $0x5d8] sm:$0xff]  }
 0x4ba   : > { %7861 = vmatprep.subr.bf16.mxu1 %v8922_v45  ;;  %v8957_v45 = vld [vmem:[#allocation3 + $0x598] sm:$0xff]  }
 0x4bd   : > { %7862 = vmatpush3.bf16.msra.mxu1 %v8923_v3  ;;  %v8958_v3 = vld [vmem:[#allocation3 + $0x5e0] sm:$0xff]  }
 0x4be   : > { %7863 = vmatprep.subr.bf16.mxu1 %v8924_v47  ;;  %v8960_v47 = vld [vmem:[#allocation3 + $0x5e8] sm:$0xff]  }
 0x4c1   : > { %7864 = vmatpush3.bf16.msra.mxu1 %v8925_v57  ;;  %v8962_v57 = vld [vmem:[#allocation3 + $0x5f0] sm:$0xff]  }
 0x4c2   : > { %7865 = vmatprep.subr.bf16.mxu1 %v8926_v53 }
 0x4c5   : > { %7866 = vmatpush3.bf16.msra.mxu1 %v8927_v36 }
 0x4c6   : > { %7867 = vmatprep.subr.bf16.mxu1 %v8928_v5 }
 0x4c7   : > { %v7719_v9 = vpop.f32.mrb[32].mxu1 }
 0x4c8   : > { %v7720_v59 = vpop.f32.mrb[33].mxu1 }
 0x4c9   : > { %v7721_v62 = vadd.f32 %v7720_v59, %v7719_v9  ;;  %v7722_v21 = vpop.f32.mrb[34].mxu1  ;;  %7868 = vmatpush3.bf16.msra.mxu1 %v8929_v6  ;;  %v8964_v59 = vld [vmem:[#allocation3 + $0x5f8] sm:$0xff]  }
 0x4ca   : > { %v7723_v17 = vpop.f32.mrb[35].mxu1  ;;  %7869 = vmatprep.subr.bf16.mxu1 %v8930_v15  ;;  %v8963_v15 = vld [vmem:[#allocation3 + $0x5b0] sm:$0xff]   ;;  %v8965_v21 = vld [vmem:[#allocation3 + $0x5b8] sm:$0xff]  }
 0x4cb   : > { %v6060_v24 = vadd.f32 %v7721_v62, %v6020_v22  ;;  %v8949_v22 = vld [vmem:[#allocation3 + $0x538] sm:$0xff]   ;;  %v3807_v17 = vrot.slane %v10691_v34, %v10576_v32 }
 0x4cc   : > { %v8973_v32 = vld [vmem:[#allocation3 + $0x618] sm:$0xff]  }
 0x4cd   : > { %7870 = vmatpush3.bf16.msra.mxu1 %v8931_v43  ;;  %v8966_v43 = vld [vmem:[#allocation3 + $0x640] sm:$0xff]   ;;  %v3889_v29 = vpack.c.bf16 %v3807_v17, %v3807_v17  ;;  %v9002_v17 = vld [vmem:[#allocation3 + $0x750] sm:$0xff]  }
 0x4ce   : > { %7871 = vmatprep.subr.bf16.mxu1 %v8932_v23  ;;  %v8967_v23 = vld [vmem:[#allocation3 + $0x600] sm:$0xff]  }
 0x4d1   : > { %7872 = vmatpush3.bf16.msra.mxu1 %v8933_v38  ;;  %v8968_v38 = vld [vmem:[#allocation3 + $0x648] sm:$0xff]  }
 0x4d2   : > { %7879 = vmatprep.subr.bf16.mxu1 %v8934_v16  ;;  %v8969_v16 = vld [vmem:[#allocation3 + $0x608] sm:$0xff]  }
 0x4d4   : > { %6338 = vmatmul.mubr.bf16.vlgmr.msra.gmra.mrb[60].mxu1 %v3882_v18  ;;  %v8971_v18 = vld [vmem:[#allocation3 + $0x610] sm:$0xff]  }
 0x4d5   : > { %7880 = vmatpush3.bf16.msra.mxu1 %v8935_v42  ;;  %6377 = vmatprep.mubr.bf16.mxu1 %v3885_v10  ;;  %v8970_v42 = vld [vmem:[#allocation3 + $0x650] sm:$0xff]   ;;  %v8974_v10 = vld [vmem:[#allocation3 + $0x660] sm:$0xff]  }
 0x4d6   : > { %7881 = vmatprep.subr.bf16.mxu1 %v8936_v44  ;;  %v8972_v44 = vld [vmem:[#allocation3 + $0x658] sm:$0xff]  }
 0x4d9   : > { %7882 = vmatpush3.bf16.msra.mxu1 %v8937_v25  ;;  %v8975_v25 = vld [vmem:[#allocation3 + $0x620] sm:$0xff]  }
 0x4da   : > { %7883 = vmatprep.subr.bf16.mxu1 %v8938_v51  ;;  %v8977_v51 = vld [vmem:[#allocation3 + $0x628] sm:$0xff]  }
 0x4dd   : > { %7884 = vmatpush3.bf16.msra.mxu1 %v8939_v63  ;;  %v8978_v63 = vld [vmem:[#allocation3 + $0x670] sm:$0xff]  }
 0x4de   : > { %7885 = vmatprep.subr.bf16.mxu1 %v8940_v26 }
 0x4e1   : > { %7886 = vmatpush3.bf16.msra.mxu1 %v8941_v2 }
 0x4e2   : > { %7887 = vmatprep.subr.bf16.mxu1 %v8942_v58 }
 0x4e5   : > { %7888 = vmatpush3.bf16.msra.mxu1 %v8943_v28 }
 0x4e6   : > { %7889 = vmatprep.subr.bf16.mxu1 %v8944_v1  ;;  %v8979_v1 = vld [vmem:[#allocation3 + $0x630] sm:$0xff]  }
 0x4e7   : > { %v7741_v12 = vpop.f32.mrb[36].mxu1 }
 0x4e8   : > { %v7742_v8 = vpop.f32.mrb[37].mxu1 }
 0x4e9   : > { %v7743_v50 = vadd.f32 %v7742_v8, %v7741_v12  ;;  %v7744_v4 = vpop.f32.mrb[38].mxu1  ;;  %7890 = vmatpush3.bf16.msra.mxu1 %v8945_v27  ;;  %v8981_v8 = vld [vmem:[#allocation3 + $0x638] sm:$0xff]  }
 0x4ea   : > { %v7745_v56 = vpop.f32.mrb[39].mxu1  ;;  %7891 = vmatprep.subr.bf16.mxu1 %v8946_v49  ;;  %v8980_v49 = vld [vmem:[#allocation3 + $0x678] sm:$0xff]   ;;  %v8982_v4 = vld [vmem:[#allocation3 + $0x6c0] sm:$0xff]  }
 0x4eb   : > { %v6100_v35 = vadd.f32 %v7743_v50, %v6060_v24  ;;  %v3886_v24 = vpack.c.bf16 %v10683_v19, %v10683_v19  ;;  %v8976_v19 = vld [vmem:[#allocation3 + $0x668] sm:$0xff]   ;;  %v3803_v50 = vrot.slane %v10691_v34, %v10579_v48  ;;  %v8983_v56 = vld [vmem:[#allocation3 + $0x680] sm:$0xff]  }
 0x4ed   : > { %7892 = vmatpush3.bf16.msra.mxu1 %v8947_v30  ;;  %v3815_v30 = vrot.slane %v10691_v34, %v10582_v20  ;;  %v8990_v20 = vld [vmem:[#allocation3 + $0x6e0] sm:$0xff]  }
 0x4ee   : > { %7893 = vmatprep.subr.bf16.mxu1 %v8948_v0  ;;  %v3888_v0 = vpack.c.bf16 %v3803_v50, %v3803_v50  ;;  %v9021_v50 = vld [vmem:[#allocation3 + $0x798] sm:$0xff]  }
 0x4f1   : > { %7894 = vmatpush3.bf16.msra.mxu1 %v8949_v22  ;;  %v3891_v22 = vpack.c.bf16 %v3815_v30, %v3815_v30  ;;  %v9024_v30 = vld [vmem:[#allocation3 + $0x7e8] sm:$0xff]  }
 0x4f2   : > { %7901 = vmatprep.subr.bf16.mxu1 %v8950_v7  ;;  %v8985_v7 = vld [vmem:[#allocation3 + $0x688] sm:$0xff]  }
 0x4f4   : > { %6378 = vmatmul.mubr.bf16.vlgmr.msra.gmra.mrb[64].mxu1 %v3884_v39  ;;  %v8987_v39 = vld [vmem:[#allocation3 + $0x690] sm:$0xff]  }
 0x4f5   : > { %7902 = vmatpush3.bf16.msra.mxu1 %v8951_v37  ;;  %6417 = vmatprep.mubr.bf16.mxu1 %v3887_v52  ;;  %v8986_v37 = vld [vmem:[#allocation3 + $0x6d0] sm:$0xff]   ;;  %v8989_v52 = vld [vmem:[#allocation3 + $0x698] sm:$0xff]  }
 0x4f6   : > { %7903 = vmatprep.subr.bf16.mxu1 %v8952_v33  ;;  %v8988_v33 = vld [vmem:[#allocation3 + $0x6d8] sm:$0xff]  }
 0x4f9   : > { %7904 = vmatpush3.bf16.msra.mxu1 %v8953_v55  ;;  %v8991_v55 = vld [vmem:[#allocation3 + $0x6a0] sm:$0xff]  }
 0x4fa   : > { %7905 = vmatprep.subr.bf16.mxu1 %v8954_v13  ;;  %v8992_v13 = vld [vmem:[#allocation3 + $0x6e8] sm:$0xff]  }
 0x4fd   : > { %7906 = vmatpush3.bf16.msra.mxu1 %v8955_v41  ;;  %v8993_v41 = vld [vmem:[#allocation3 + $0x6a8] sm:$0xff]  }
 0x4fe   : > { %7907 = vmatprep.subr.bf16.mxu1 %v8956_v14  ;;  %v8994_v14 = vld [vmem:[#allocation3 + $0x6f0] sm:$0xff]  }
 0x501   : > { %7908 = vmatpush3.bf16.msra.mxu1 %v8957_v45 }
 0x502   : > { %7909 = vmatprep.subr.bf16.mxu1 %v8958_v3 }
 0x505   : > { %7910 = vmatpush3.bf16.msra.mxu1 %v8959_v31 }
 0x506   : > { %7911 = vmatprep.subr.bf16.mxu1 %v8960_v47 }
 0x507   : > { %v7763_v53 = vpop.f32.mrb[40].mxu1 }
 0x508   : > { %v7764_v36 = vpop.f32.mrb[41].mxu1 }
 0x509   : > { %v7765_v5 = vadd.f32 %v7764_v36, %v7763_v53  ;;  %v7766_v6 = vpop.f32.mrb[42].mxu1  ;;  %7912 = vmatpush3.bf16.msra.mxu1 %v8961_v46  ;;  %v8995_v46 = vld [vmem:[#allocation3 + $0x6b0] sm:$0xff]   ;;  %v8996_v53 = vld [vmem:[#allocation3 + $0x6f8] sm:$0xff]  }
 0x50a   : > { %v7767_v9 = vpop.f32.mrb[43].mxu1  ;;  %7913 = vmatprep.subr.bf16.mxu1 %v8962_v57  ;;  %v3811_v6 = vrot.slane %v10691_v34, %v10653_v60  ;;  %v9005_v60 = vld [vmem:[#allocation3 + $0x718] sm:$0xff]   ;;  %v9006_v34 = vld [vmem:[#allocation3 + $0x760] sm:$0xff]  }
 0x50b   : > { %v6140_v62 = vadd.f32 %v7765_v5, %v6100_v35  ;;  %v8984_v35 = vld [vmem:[#allocation3 + $0x6c8] sm:$0xff]   ;;  %v8997_v5 = vld [vmem:[#allocation3 + $0x6b8] sm:$0xff]   ;;  %v8999_v9 = vld [vmem:[#allocation3 + $0x700] sm:$0xff]  }
 0x50d   : > { %7914 = vmatpush3.bf16.msra.mxu1 %v8963_v15  ;;  %v8998_v15 = vld [vmem:[#allocation3 + $0x740] sm:$0xff]  }
 0x50e   : > { %7915 = vmatprep.subr.bf16.mxu1 %v8964_v59  ;;  %v3890_v59 = vpack.c.bf16 %v3811_v6, %v3811_v6 }
 0x511   : > { %7916 = vmatpush3.bf16.msra.mxu1 %v8965_v21  ;;  %v3893_v21 = vpack.c.bf16 %v10695_v54, %v10695_v54  ;;  %v9009_v54 = vld [vmem:[#allocation3 + $0x728] sm:$0xff]  }
 0x512   : > { %7923 = vmatprep.subr.bf16.mxu1 %v8966_v43  ;;  %v9001_v43 = vld [vmem:[#allocation3 + $0x708] sm:$0xff]  }
 0x514   : > { %6418 = vmatmul.mubr.bf16.vlgmr.msra.gmra.mrb[68].mxu1 %v3886_v24  ;;  %v9004_v24 = vld [vmem:[#allocation3 + $0x758] sm:$0xff]  }
 0x515   : > { %7924 = vmatpush3.bf16.msra.mxu1 %v8967_v23  ;;  %6457 = vmatprep.mubr.bf16.mxu1 %v3889_v29  ;;  %v9003_v23 = vld [vmem:[#allocation3 + $0x710] sm:$0xff]   ;;  %v9008_v29 = vld [vmem:[#allocation3 + $0x768] sm:$0xff]  }
 0x516   : > { %7925 = vmatprep.subr.bf16.mxu1 %v8968_v38  ;;  %v9007_v38 = vld [vmem:[#allocation3 + $0x720] sm:$0xff]  }
 0x519   : > { %7926 = vmatpush3.bf16.msra.mxu1 %v8969_v16  ;;  %v9010_v16 = vld [vmem:[#allocation3 + $0x770] sm:$0xff]  }
 0x51a   : > { %7927 = vmatprep.subr.bf16.mxu1 %v8970_v42 }
 0x51d   : > { %7928 = vmatpush3.bf16.msra.mxu1 %v8971_v18 }
 0x51e   : > { %7929 = vmatprep.subr.bf16.mxu1 %v8972_v44 }
 0x521   : > { %7930 = vmatpush3.bf16.msra.mxu1 %v8973_v32 }
 0x522   : > { %7931 = vmatprep.subr.bf16.mxu1 %v8974_v10  ;;  %v9011_v10 = vld [vmem:[#allocation3 + $0x730] sm:$0xff]  }
 0x525   : > { %7932 = vmatpush3.bf16.msra.mxu1 %v8975_v25 }
 0x526   : > { %7933 = vmatprep.subr.bf16.mxu1 %v8976_v19  ;;  %v9012_v19 = vld [vmem:[#allocation3 + $0x778] sm:$0xff]  }
 0x527   : > { %v7785_v26 = vpop.f32.mrb[44].mxu1 }
 0x528   : > { %v7786_v2 = vpop.f32.mrb[45].mxu1 }
 0x529   : > { %v7787_v58 = vadd.f32 %v7786_v2, %v7785_v26  ;;  %v7788_v28 = vpop.f32.mrb[46].mxu1  ;;  %7934 = vmatpush3.bf16.msra.mxu1 %v8977_v51  ;;  %v9014_v26 = vld [vmem:[#allocation3 + $0x7c0] sm:$0xff]  }
 0x52a   : > { %v7789_v27 = vpop.f32.mrb[47].mxu1  ;;  %7935 = vmatprep.subr.bf16.mxu1 %v8978_v63  ;;  %v9013_v63 = vld [vmem:[#allocation3 + $0x738] sm:$0xff]   ;;  %v9015_v2 = vld [vmem:[#allocation3 + $0x780] sm:$0xff]   ;;  %v9016_v28 = vld [vmem:[#allocation3 + $0x7c8] sm:$0xff]  }
 0x52b   : > { %v6180_v12 = vadd.f32 %v7787_v58, %v6140_v62  ;;  %v9000_v62 = vld [vmem:[#allocation3 + $0x748] sm:$0xff]   ;;  %v3892_v58 = vpack.c.bf16 %v10699_v61, %v10699_v61  ;;  %v9023_v61 = vld [vmem:[#allocation3 + $0x7a0] sm:$0xff]  }
 0x52c   : > { %v9017_v27 = vld [vmem:[#allocation3 + $0x788] sm:$0xff]  }
 0x52d   : > { %7936 = vmatpush3.bf16.msra.mxu1 %v8979_v1  ;;  %v3895_v1 = vpack.c.bf16 %v10703_v11, %v10703_v11  ;;  %v9025_v11 = vld [vmem:[#allocation3 + $0x7a8] sm:$0xff]  }
 0x52e   : > { %7937 = vmatprep.subr.bf16.mxu1 %v8980_v49  ;;  %v9018_v49 = vld [vmem:[#allocation3 + $0x7d0] sm:$0xff]  }
 0x531   : > { %7938 = vmatpush3.bf16.msra.mxu1 %v8981_v8  ;;  %v9020_v8 = vld [vmem:[#allocation3 + $0x7d8] sm:$0xff]  }
 0x532   : > { %7945 = vmatprep.subr.bf16.mxu1 %v8982_v4  ;;  %v9022_v4 = vld [vmem:[#allocation3 + $0x7e0] sm:$0xff]  }
 0x534   : > { %6458 = vmatmul.mubr.bf16.vlgmr.msra.gmra.mrb[72].mxu1 %v3888_v0 }
 0x535   : > { %7946 = vmatpush3.bf16.msra.mxu1 %v8983_v56  ;;  %6497 = vmatprep.mubr.bf16.mxu1 %v3891_v22  ;;  %v9026_v56 = vld [vmem:[#allocation3 + $0x7f0] sm:$0xff]  }
 0x536   : > { %7947 = vmatprep.subr.bf16.mxu1 %v8984_v35 }
 0x539   : > { %7948 = vmatpush3.bf16.msra.mxu1 %v8985_v7 }
 0x53a   : > { %7949 = vmatprep.subr.bf16.mxu1 %v8986_v37  ;;  %v9027_v37 = vld [vmem:[#allocation3 + $0x7b0] sm:$0xff]  }
 0x53d   : > { %7950 = vmatpush3.bf16.msra.mxu1 %v8987_v39 }
 0x53e   : > { %7951 = vmatprep.subr.bf16.mxu1 %v8988_v33  ;;  %v9028_v33 = vld [vmem:[#allocation3 + $0x7f8] sm:$0xff]  }
 0x541   : > { %7952 = vmatpush3.bf16.msra.mxu1 %v8989_v52 }
 0x542   : > { %7953 = vmatprep.subr.bf16.mxu1 %v8990_v20  ;;  %v9029_v20 = vld [vmem:[#allocation3 + $0x7b8] sm:$0xff]  }
 0x545   : > { %7954 = vmatpush3.bf16.msra.mxu1 %v8991_v55  ;;  %v3894_v55 = vpack.c.bf16 %v10707_v40, %v10707_v40 }
 0x546   : > { %7955 = vmatprep.subr.bf16.mxu1 %v8992_v13 }
 0x547   : > { %v7807_v45 = vpop.f32.mrb[48].mxu1 }
 0x548   : > { %v7808_v3 = vpop.f32.mrb[49].mxu1 }
 0x549   : > { %v7809_v31 = vadd.f32 %v7808_v3, %v7807_v45  ;;  %v7810_v47 = vpop.f32.mrb[50].mxu1  ;;  %7956 = vmatpush3.bf16.msra.mxu1 %v8993_v41 }
 0x54a   : > { %v7811_v57 = vpop.f32.mrb[51].mxu1  ;;  %7957 = vmatprep.subr.bf16.mxu1 %v8994_v14 }
 0x54b   : > { %v6220_v36 = vadd.f32 %v7809_v31, %v6180_v12  ;;  %v9019_v12 = vld [vmem:[#allocation3 + $0x790] sm:$0xff]  }
 0x54d   : > { %7958 = vmatpush3.bf16.msra.mxu1 %v8995_v46 }
 0x54e   : > { %7959 = vmatprep.subr.bf16.mxu1 %v8996_v53 }
 0x551   : > { %7960 = vmatpush3.bf16.msra.mxu1 %v8997_v5 }
 0x552   : > { %7967 = vmatprep.subr.bf16.mxu1 %v8998_v15 }
 0x554   : > { %6498 = vmatmul.mubr.bf16.vlgmr.msra.gmra.mrb[76].mxu1 %v3890_v59 }
 0x555   : > { %7968 = vmatpush3.bf16.msra.mxu1 %v8999_v9  ;;  %6537 = vmatprep.mubr.bf16.mxu1 %v3893_v21 }
 0x556   : > { %7969 = vmatprep.subr.bf16.mxu1 %v9000_v62 }
 0x559   : > { %7970 = vmatpush3.bf16.msra.mxu1 %v9001_v43 }
 0x55a   : > { %7971 = vmatprep.subr.bf16.mxu1 %v9002_v17 }
 0x55d   : > { %7972 = vmatpush3.bf16.msra.mxu1 %v9003_v23 }
 0x55e   : > { %7973 = vmatprep.subr.bf16.mxu1 %v9004_v24 }
 0x561   : > { %7974 = vmatpush3.bf16.msra.mxu1 %v9005_v60 }
 0x562   : > { %7975 = vmatprep.subr.bf16.mxu1 %v9006_v34 }
 0x565   : > { %7976 = vmatpush3.bf16.msra.mxu1 %v9007_v38 }
 0x566   : > { %7977 = vmatprep.subr.bf16.mxu1 %v9008_v29 }
 0x567   : > { %v7829_v42 = vpop.f32.mrb[52].mxu1 }
 0x568   : > { %v7830_v18 = vpop.f32.mrb[53].mxu1 }
 0x569   : > { %v7831_v44 = vadd.f32 %v7830_v18, %v7829_v42  ;;  %v7832_v32 = vpop.f32.mrb[54].mxu1  ;;  %7978 = vmatpush3.bf16.msra.mxu1 %v9009_v54 }
 0x56a   : > { %v7833_v25 = vpop.f32.mrb[55].mxu1  ;;  %7979 = vmatprep.subr.bf16.mxu1 %v9010_v16 }
 0x56b   : > { %v6260_v51 = vadd.f32 %v7831_v44, %v6220_v36 }
 0x56d   : > { %7980 = vmatpush3.bf16.msra.mxu1 %v9011_v10 }
 0x56e   : > { %7981 = vmatprep.subr.bf16.mxu1 %v9012_v19 }
 0x571   : > { %7982 = vmatpush3.bf16.msra.mxu1 %v9013_v63 }
 0x572   : > { %7989 = vmatprep.subr.bf16.mxu1 %v9014_v26 }
 0x574   : > { %6538 = vmatmul.mubr.bf16.vlgmr.msra.gmra.mrb[80].mxu1 %v3892_v58 }
 0x575   : > { %7990 = vmatpush3.bf16.msra.mxu1 %v9015_v2  ;;  %6577 = vmatprep.mubr.bf16.mxu1 %v3895_v1 }
 0x576   : > { %7991 = vmatprep.subr.bf16.mxu1 %v9016_v28 }
 0x579   : > { %7992 = vmatpush3.bf16.msra.mxu1 %v9017_v27 }
 0x57a   : > { %7993 = vmatprep.subr.bf16.mxu1 %v9018_v49 }
 0x57d   : > { %7994 = vmatpush3.bf16.msra.mxu1 %v9019_v12 }
 0x57e   : > { %7995 = vmatprep.subr.bf16.mxu1 %v9020_v8 }
 0x581   : > { %7996 = vmatpush3.bf16.msra.mxu1 %v9021_v50 }
 0x582   : > { %7997 = vmatprep.subr.bf16.mxu1 %v9022_v4 }
 0x585   : > { %7998 = vmatpush3.bf16.msra.mxu1 %v9023_v61 }
 0x586   : > { %7999 = vmatprep.subr.bf16.mxu1 %v9024_v30 }
 0x587   : > { %v7851_v0 = vpop.f32.mrb[56].mxu1 }
 0x588   : > { %v7852_v35 = vpop.f32.mrb[57].mxu1 }
 0x589   : > { %v7853_v22 = vadd.f32 %v7852_v35, %v7851_v0  ;;  %v7854_v7 = vpop.f32.mrb[58].mxu1  ;;  %8000 = vmatpush3.bf16.msra.mxu1 %v9025_v11 }
 0x58a   : > { %v7855_v39 = vpop.f32.mrb[59].mxu1  ;;  %8001 = vmatprep.subr.bf16.mxu1 %v9026_v56 }
 0x58b   : > { %v6300_v52 = vadd.f32 %v7853_v22, %v6260_v51 }
 0x58d   : > { %8002 = vmatpush3.bf16.msra.mxu1 %v9027_v37 }
 0x58e   : > { %8003 = vmatprep.subr.bf16.mxu1 %v9028_v33 }
 0x591   : > { %8004 = vmatpush3.bf16.msra.mxu1 %v9029_v20 }
 0x594   : > { %6578 = vmatmul.mubr.bf16.vlgmr.msra.gmra.mrb[84].mxu1 %v3894_v55 }
 0x5a7   : > { %v7873_v13 = vpop.f32.mrb[60].mxu1 }
 0x5a8   : > { %v7874_v41 = vpop.f32.mrb[61].mxu1 }
 0x5a9   : > { %v7875_v14 = vadd.f32 %v7874_v41, %v7873_v13  ;;  %v7876_v45 = vpop.f32.mrb[62].mxu1 }
 0x5aa   : > { %v7877_v3 = vpop.f32.mrb[63].mxu1 }
 0x5ab   : > { %v6340_v31 = vadd.f32 %v7875_v14, %v6300_v52 }
 0x5c7   : > { %v7895_v47 = vpop.f32.mrb[64].mxu1 }
 0x5c8   : > { %v7896_v46 = vpop.f32.mrb[65].mxu1 }
 0x5c9   : > { %v7897_v57 = vadd.f32 %v7896_v46, %v7895_v47  ;;  %v7898_v53 = vpop.f32.mrb[66].mxu1 }
 0x5ca   : > { %v7899_v36 = vpop.f32.mrb[67].mxu1 }
 0x5cb   : > { %v6380_v5 = vadd.f32 %v7897_v57, %v6340_v31 }
 0x5e7   : > { %v7917_v6 = vpop.f32.mrb[68].mxu1 }
 0x5e8   : > { %v7918_v15 = vpop.f32.mrb[69].mxu1 }
 0x5e9   : > { %v7919_v9 = vadd.f32 %v7918_v15, %v7917_v6  ;;  %v7920_v59 = vpop.f32.mrb[70].mxu1 }
 0x5ea   : > { %v7921_v62 = vpop.f32.mrb[71].mxu1 }
 0x5eb   : > { %v6420_v21 = vadd.f32 %v7919_v9, %v6380_v5 }
 0x607   : > { %v7939_v40 = vpop.f32.mrb[72].mxu1 }
 0x608   : > { %v7940_v43 = vpop.f32.mrb[73].mxu1 }
 0x609   : > { %v7941_v17 = vadd.f32 %v7940_v43, %v7939_v40  ;;  %v7942_v23 = vpop.f32.mrb[74].mxu1 }
 0x60a   : > { %v7943_v24 = vpop.f32.mrb[75].mxu1 }
 0x60b   : > { %v6460_v60 = vadd.f32 %v7941_v17, %v6420_v21 }
 0x627   : > { %v7961_v34 = vpop.f32.mrb[76].mxu1 }
 0x628   : > { %v7962_v38 = vpop.f32.mrb[77].mxu1 }
 0x629   : > { %v7963_v29 = vadd.f32 %v7962_v38, %v7961_v34  ;;  %v7964_v54 = vpop.f32.mrb[78].mxu1 }
 0x62a   : > { %v7965_v16 = vpop.f32.mrb[79].mxu1 }
 0x62b   : > { %v6500_v42 = vadd.f32 %v7963_v29, %v6460_v60 }
 0x647   : > { %v7983_v18 = vpop.f32.mrb[80].mxu1 }
 0x648   : > { %v7984_v44 = vpop.f32.mrb[81].mxu1 }
 0x649   : > { %v7985_v32 = vadd.f32 %v7984_v44, %v7983_v18  ;;  %v7986_v10 = vpop.f32.mrb[82].mxu1 }
 0x64a   : > { %v7987_v25 = vpop.f32.mrb[83].mxu1 }
 0x64b   : > { %v6540_v19 = vadd.f32 %v7985_v32, %v6500_v42 }
 0x667   : > { %v8005_v51 = vpop.f32.mrb[84].mxu1 }
 0x668   : > { %v8006_v63 = vpop.f32.mrb[85].mxu1 }
 0x669   : > { %v8007_v26 = vadd.f32 %v8006_v63, %v8005_v51  ;;  %v8008_v2 = vpop.f32.mrb[86].mxu1 }
 0x66a   : > { %v8009_v58 = vpop.f32.mrb[87].mxu1 }
 0x66b   : > { %v6580_v28 = vadd.f32 %v8007_v26, %v6540_v19 }
 0x66d   : > { %v6588_v1 = vrot.slane %v6580_v28, %v10579_v48 }
 0x66f   : > { %6589 = vst [vmem:[%s235_s26] sm:$0xff] %v6588_v1 }
 0x670   : > { %9117 = shalt.err (!%p9114_p7)
}
 0x671   : > { %s9118_s13 = scalar_lea.hbm %s10772_s10, 128  ;;  %s9122_s16 = scalar_lea.hbm %s10819_s5, 256 }
 0x672   : > { %p9119_p8 = scmp.ne.s32.totalorder %s10772_s10, %s9118_s13  ;;  %p9123_p1 = scmp.lt.u32.totalorder %s10772_s10, %s10819_s5 }
 0x673   : > { %p9124_p0 = scmp.lt.u32.totalorder %s9122_s16, %s9118_s13  ;;  %p9126_p6 = scmp.lt.u32.totalorder %s9118_s13, %s10772_s10 }
 0x674   : > { %p9120_p11 = pnand %p9119_p8, %p10834_p9 }
 0x675   : > { %p9125_p5 = por %p9124_p0, %p9123_p1 }
 0x676   : > { %p9121_p13 = pneg %p9120_p11 }
 0x677   : > { %p9127_p10 = por %p9126_p6, %p9125_p5 }
 0x679   : > { %p9128_p12 = pnand %p9127_p10, %p9121_p13 }
 0x67b   : > { %9131 = shalt.err (!%p9128_p12)
}
 0x67c   : > { %8724 = dma.vmem_to_hbm [thread:$0]  (%p10834_p9), %s10774_s6, 128, %s10772_s10, %s6591_s7  }
 0x67d PF: > { %p8736_p2 = scmp.ge.s32.totalorder %s9170_s21, 2  ;;  %s6616_s25 = sand.u32 1, %s9158_s18  }
 0x67e   : > { %p10835_p3 = scmp.ne.s32.totalorder %s10824_s29, 0  ;;  %s6617_s26 = scalar_lea.sflag [#allocation5], %s6616_s25 }
 0x680   : > { %p8731_p4 = pnand %p8736_p2, %p10835_p3 }
 0x682   : > { %9153 = dma.done.wait (!%p8731_p4), %s6617_s26, 128  }
 0x683   : > { %9155 = vsyncadd (!%p8731_p4), %s6617_s26, 4294967168  ;;  %p16_p7 = scmp.ge.s32.totalorder %s9233_s24, 4   ;;  %s10836_s18 = smov %s9162_s19 }
 0x684   : > { %s10837_s19 = smov %s9166_s20  ;;  %s10838_s20 = smov %s9244_s27 }
 0x685   : > { %s10839_s21 = smov %s9233_s24  ;;  %18 = sbr.rel (!%p16_p7) target bundleno = 4 (0x4), region = 95 }
 0x68c   :  { %6622 = vsyncpa [#allocation4], 1 }
 0x68d   :  { %6624 = vsyncpa [#allocation4 + $0x1], 1 }
 0x68e   :  { %6625 = vsyncpa [#allocation5], 1 }
 0x68f   :  { %6627 = vsyncpa [#allocation5 + $0x1], 1 }

</bundles_post_ra>
